<compile_context>
chip_gen: v7x
topology: tpu7x:2x2x1
jax: 0.10.0
libtpu: 0.0.40
codegen_flags: <defaults>
</compile_context>

<pallas_src>
import jax
import jax.numpy as jnp
from jax.experimental import pallas as pl
from jax.experimental.pallas import tpu as pltpu

_HIGHEST = jax.lax.Precision.HIGHEST


def _make_lstm_kernel(num_layers, hidden_size, seq_len):
    L, H, T = num_layers, hidden_size, seq_len

    def kernel(*refs):
        # inputs : x (T,d_in), h0 (L,H), c0 (L,H), then per layer
        #          (w_ih (d_in,4H), w_hh (H,4H), b (1,4H)),
        #          then head (Wt (H,out), b (1,out))
        # outputs: y (T,out), hn (L,H), cn (L,H)   [hn/cn aliased onto h0/c0]
        x_ref, h0_ref, c0_ref = refs[0], refs[1], refs[2]
        layer_refs = refs[3:3 + 3 * L]
        w_head_ref, b_head_ref = refs[3 + 3 * L], refs[4 + 3 * L]
        y_ref, hn_ref, cn_ref = refs[5 + 3 * L], refs[6 + 3 * L], refs[7 + 3 * L]

        inp = x_ref[...]                                  # (T, d_in)
        for l in range(L):
            w_ih = layer_refs[3 * l][...]                 # (d_in, 4H)
            w_hh = layer_refs[3 * l + 1][...]             # (H, 4H)
            bias = layer_refs[3 * l + 2][...]             # (1, 4H)

            # Non-recurrent projection for all T timesteps in one MXU matmul;
            # bias folded in here, off the recurrent critical path.  Kept as a
            # register value: (T,4H) f32 = (8,128) = exactly one vreg.
            xproj = jnp.dot(inp, w_ih, precision=_HIGHEST,
                            preferred_element_type=jnp.float32) + bias

            h = h0_ref[l:l + 1, :]                        # (1, H)
            c = c0_ref[l:l + 1, :]                        # (1, H)

            # Fully unrolled serial recurrence (T = 8).  Each step: one
            # (1,H)@(H,4H) matmul + 3 EUP ops + a handful of VPU ops.
            hs = []
            for t in range(T):
                gates = xproj[t:t + 1, :] + jnp.dot(
                    h, w_hh, precision=_HIGHEST,
                    preferred_element_type=jnp.float32)   # (1, 4H)
                sig = jax.nn.sigmoid(gates)               # one EUP pass, 128 lanes
                g_g = jnp.tanh(gates[:, 2 * H:3 * H])     # tanh only on g slice
                i_g = sig[:, 0 * H:1 * H]
                f_g = sig[:, 1 * H:2 * H]
                o_g = sig[:, 3 * H:4 * H]
                c = f_g * c + i_g * g_g
                h = o_g * jnp.tanh(c)
                hs.append(h)                              # stays in vregs

            inp = jnp.concatenate(hs, axis=0)             # (T, H): next layer input
            hn_ref[l:l + 1, :] = h
            cn_ref[l:l + 1, :] = c

        # Linear head + sigmoid on the whole top-layer sequence: one batched
        # (T,H)@(H,out) matmul and a single contiguous output store.
        y_ref[...] = jax.nn.sigmoid(
            jnp.dot(inp, w_head_ref[...], precision=_HIGHEST,
                    preferred_element_type=jnp.float32) + b_head_ref[...])

    return kernel


def stateful_lstm2_pallas(x, params, state=None):
    """Forward pass of StatefulLSTM2. Returns (sigmoid(head(lstm(x))), (hn, cn))."""
    lstm = params["lstm"]
    L = len(lstm)
    H = lstm[0]["w_hh"].shape[1]
    T = x.shape[0]
    out_size = params["head"]["w"].shape[0]

    if state is None:
        h0 = jnp.zeros((L, H), jnp.float32)
        c0 = jnp.zeros((L, H), jnp.float32)
    else:
        h0, c0 = state

    inputs = [x.astype(jnp.float32), h0.astype(jnp.float32), c0.astype(jnp.float32)]
    for l in range(L):
        p = lstm[l]
        # torch layout (4H, d_in), rows in [i,f,g,o] order -> transpose gives
        # (d_in, 4H) with gate columns already in [i,f,g,o] order.
        inputs += [
            p["w_ih"].T.astype(jnp.float32),                         # (d_in, 4H)
            p["w_hh"].T.astype(jnp.float32),                         # (H, 4H)
            (p["b_ih"] + p["b_hh"]).reshape(1, 4 * H).astype(jnp.float32),
        ]
    inputs += [params["head"]["w"].T.astype(jnp.float32),            # (H, out)
               params["head"]["b"].reshape(1, out_size).astype(jnp.float32)]

    kernel = _make_lstm_kernel(L, H, T)
    y, hn, cn = pl.pallas_call(
        kernel,
        out_shape=(
            jax.ShapeDtypeStruct((T, out_size), jnp.float32),
            jax.ShapeDtypeStruct((L, H), jnp.float32),
            jax.ShapeDtypeStruct((L, H), jnp.float32),
        ),
        in_specs=[pl.BlockSpec(memory_space=pltpu.MemorySpace.VMEM)
                  for _ in inputs],
        out_specs=(pl.BlockSpec(memory_space=pltpu.MemorySpace.VMEM),
                   pl.BlockSpec(memory_space=pltpu.MemorySpace.VMEM),
                   pl.BlockSpec(memory_space=pltpu.MemorySpace.VMEM)),
        # Carried state updates in place: h0 -> hn, c0 -> cn.
        input_output_aliases={1: 1, 2: 2},
    )(*inputs)
    return y, (hn, cn)


def init_params(key, input_size, hidden_size, output_size, num_layers):
    """Deterministic init mimicking torch defaults: U(-1/sqrt(H), 1/sqrt(H))."""
    bound = 1.0 / (hidden_size ** 0.5)
    keys = jax.random.split(key, 4 * num_layers + 2)
    ki = 0
    lstm = []
    for l in range(num_layers):
        d_in = input_size if l == 0 else hidden_size
        w_ih = jax.random.uniform(keys[ki], (4 * hidden_size, d_in),
                                  jnp.float32, -bound, bound); ki += 1
        w_hh = jax.random.uniform(keys[ki], (4 * hidden_size, hidden_size),
                                  jnp.float32, -bound, bound); ki += 1
        b_ih = jax.random.uniform(keys[ki], (4 * hidden_size,),
                                  jnp.float32, -bound, bound); ki += 1
        b_hh = jax.random.uniform(keys[ki], (4 * hidden_size,),
                                  jnp.float32, -bound, bound); ki += 1
        lstm.append(dict(w_ih=w_ih, w_hh=w_hh, b_ih=b_ih, b_hh=b_hh))
    w_head = jax.random.uniform(keys[ki], (output_size, hidden_size),
                                jnp.float32, -bound, bound); ki += 1
    b_head = jax.random.uniform(keys[ki], (output_size,),
                                jnp.float32, -bound, bound)
    return dict(lstm=lstm, head=dict(w=w_head, b=b_head))


def reference_forward(x, params, state=None):
    """Pure-JAX reference matching torch.nn.LSTM + Linear + sigmoid semantics."""
    lstm = params["lstm"]
    L = len(lstm)
    H = lstm[0]["w_hh"].shape[1]
    T = x.shape[0]
    if state is None:
        hn = jnp.zeros((L, H), jnp.float32)
        cn = jnp.zeros((L, H), jnp.float32)
    else:
        hn, cn = state
    hs = [hn[l] for l in range(L)]
    cs = [cn[l] for l in range(L)]
    ys = []
    for t in range(T):
        inp = x[t]
        for l in range(L):
            p = lstm[l]
            gates = (jnp.dot(p["w_ih"], inp, precision=_HIGHEST) + p["b_ih"]
                     + jnp.dot(p["w_hh"], hs[l], precision=_HIGHEST) + p["b_hh"])
            i_g = jax.nn.sigmoid(gates[0 * H:1 * H])
            f_g = jax.nn.sigmoid(gates[1 * H:2 * H])
            g_g = jnp.tanh(gates[2 * H:3 * H])
            o_g = jax.nn.sigmoid(gates[3 * H:4 * H])
            cs[l] = f_g * cs[l] + i_g * g_g
            hs[l] = o_g * jnp.tanh(cs[l])
            inp = hs[l]
        y = jax.nn.sigmoid(jnp.dot(params["head"]["w"], inp, precision=_HIGHEST)
                           + params["head"]["b"])
        ys.append(y)
    return jnp.stack(ys, 0), (jnp.stack(hs, 0), jnp.stack(cs, 0))


if __name__ == "__main__":
    input_size, hidden_size, output_size, num_layers = 16, 32, 8, 2
    seq_len = 8

    key = jax.random.PRNGKey(0)
    pkey, xkey = jax.random.split(key)
    params = init_params(pkey, input_size, hidden_size, output_size, num_layers)
    x = jax.random.normal(xkey, (seq_len, input_size), jnp.float32)

    # Call 1: fresh state (state=None), like a freshly reset StatefulLSTM2.
    y1, state1 = stateful_lstm2_pallas(x, params, state=None)
    # Call 2: stateful — feed the (hn, cn) that the module would have stashed.
    y2, state2 = stateful_lstm2_pallas(x, params, state=state1)
    jax.block_until_ready((y1, y2, state2))

    # Correctness check against a HIGHEST-precision pure-JAX reference.  The
    # kernel's matmuls also run at HIGHEST precision (exact f32), so only the
    # transcendental approximations differ — tight tolerance.
    y1_ref, s1_ref = reference_forward(x, params, None)
    y2_ref, s2_ref = reference_forward(x, params, s1_ref)
    assert jnp.allclose(y1, y1_ref, atol=1e-3), "y1 mismatch"
    assert jnp.allclose(y2, y2_ref, atol=1e-3), "y2 mismatch"
    assert jnp.allclose(state2[0], s2_ref[0], atol=1e-3), "hn mismatch"
    assert jnp.allclose(state2[1], s2_ref[1], atol=1e-3), "cn mismatch"
    assert y1.shape == (seq_len, output_size)
    assert state1[0].shape == (num_layers, hidden_size)
    assert state1[1].shape == (num_layers, hidden_size)

    print("KERNEL_OK")
</pallas_src>

<mosaic_0001>
module attributes {stable_mosaic.version = 11 : i64} {
  func.func @kernel(%arg0: memref<8x16xf32, #tpu.memory_space<vmem>>, %arg1: memref<2x32xf32, #tpu.memory_space<vmem>>, %arg2: memref<2x32xf32, #tpu.memory_space<vmem>>, %arg3: memref<16x128xf32, #tpu.memory_space<vmem>>, %arg4: memref<32x128xf32, #tpu.memory_space<vmem>>, %arg5: memref<1x128xf32, #tpu.memory_space<vmem>>, %arg6: memref<32x128xf32, #tpu.memory_space<vmem>>, %arg7: memref<32x128xf32, #tpu.memory_space<vmem>>, %arg8: memref<1x128xf32, #tpu.memory_space<vmem>>, %arg9: memref<32x8xf32, #tpu.memory_space<vmem>>, %arg10: memref<1x8xf32, #tpu.memory_space<vmem>>, %arg11: memref<8x8xf32, #tpu.memory_space<vmem>>, %arg12: memref<2x32xf32, #tpu.memory_space<vmem>>, %arg13: memref<2x32xf32, #tpu.memory_space<vmem>>) attributes {dimension_semantics = [], scalar_prefetch = 0 : i64, scratch_operands = 0 : i64, tpu.core_type = #tpu.core_type<tc>} {
    %c0 = arith.constant 0 : index
    %c0_0 = arith.constant 0 : index
    %0 = vector.load %arg0[%c0, %c0_0] : memref<8x16xf32, #tpu.memory_space<vmem>>, vector<8x16xf32>
    %c0_1 = arith.constant 0 : index
    %c0_2 = arith.constant 0 : index
    %1 = vector.load %arg3[%c0_1, %c0_2] : memref<16x128xf32, #tpu.memory_space<vmem>>, vector<16x128xf32>
    %c0_3 = arith.constant 0 : index
    %c0_4 = arith.constant 0 : index
    %2 = vector.load %arg4[%c0_3, %c0_4] : memref<32x128xf32, #tpu.memory_space<vmem>>, vector<32x128xf32>
    %c0_5 = arith.constant 0 : index
    %c0_6 = arith.constant 0 : index
    %3 = vector.load %arg5[%c0_5, %c0_6] : memref<1x128xf32, #tpu.memory_space<vmem>>, vector<1x128xf32>
    %cst = arith.constant dense<0.000000e+00> : vector<8x128xf32>
    %4 = tpu.matmul %0, %1, %cst {dimension_numbers = #tpu.dot_dimension_numbers<[1], [0], [0], [1], [0, 0, 1, 1], [], []>, precision = #tpu.contract_precision<fp32>} : vector<8x16xf32>, vector<16x128xf32>, vector<8x128xf32> -> vector<8x128xf32>
    %5 = vector.broadcast %3 : vector<1x128xf32> to vector<8x128xf32>
    %6 = arith.addf %4, %5 : vector<8x128xf32>
    %c0_7 = arith.constant 0 : index
    %c0_8 = arith.constant 0 : index
    %7 = vector.load %arg1[%c0_7, %c0_8] : memref<2x32xf32, #tpu.memory_space<vmem>>, vector<1x32xf32>
    %c0_9 = arith.constant 0 : index
    %c0_10 = arith.constant 0 : index
    %8 = vector.load %arg2[%c0_9, %c0_10] : memref<2x32xf32, #tpu.memory_space<vmem>>, vector<1x32xf32>
    %9 = vector.extract_strided_slice %6 {offsets = [0, 0], sizes = [1, 128], strides = [1, 1]} : vector<8x128xf32> to vector<1x128xf32>
    %cst_11 = arith.constant dense<0.000000e+00> : vector<1x128xf32>
    %10 = tpu.matmul %7, %2, %cst_11 {dimension_numbers = #tpu.dot_dimension_numbers<[1], [0], [0], [1], [0, 0, 1, 1], [], []>, precision = #tpu.contract_precision<fp32>} : vector<1x32xf32>, vector<32x128xf32>, vector<1x128xf32> -> vector<1x128xf32>
    %11 = arith.addf %9, %10 : vector<1x128xf32>
    %12 = arith.negf %11 : vector<1x128xf32>
    %13 = math.exp %12 : vector<1x128xf32>
    %cst_12 = arith.constant 1.000000e+00 : f32
    %14 = vector.broadcast %cst_12 : f32 to vector<1x128xf32>
    %15 = arith.addf %14, %13 : vector<1x128xf32>
    %16 = arith.divf %14, %15 : vector<1x128xf32>
    %17 = vector.extract_strided_slice %11 {offsets = [0, 64], sizes = [1, 32], strides = [1, 1]} : vector<1x128xf32> to vector<1x32xf32>
    %18 = math.tanh %17 : vector<1x32xf32>
    %19 = vector.extract_strided_slice %16 {offsets = [0, 0], sizes = [1, 32], strides = [1, 1]} : vector<1x128xf32> to vector<1x32xf32>
    %20 = vector.extract_strided_slice %16 {offsets = [0, 32], sizes = [1, 32], strides = [1, 1]} : vector<1x128xf32> to vector<1x32xf32>
    %21 = vector.extract_strided_slice %16 {offsets = [0, 96], sizes = [1, 32], strides = [1, 1]} : vector<1x128xf32> to vector<1x32xf32>
    %22 = arith.mulf %20, %8 : vector<1x32xf32>
    %23 = arith.mulf %19, %18 : vector<1x32xf32>
    %24 = arith.addf %22, %23 : vector<1x32xf32>
    %25 = math.tanh %24 : vector<1x32xf32>
    %26 = arith.mulf %21, %25 : vector<1x32xf32>
    %27 = vector.extract_strided_slice %6 {offsets = [1, 0], sizes = [1, 128], strides = [1, 1]} : vector<8x128xf32> to vector<1x128xf32>
    %cst_13 = arith.constant dense<0.000000e+00> : vector<1x128xf32>
    %28 = tpu.matmul %26, %2, %cst_13 {dimension_numbers = #tpu.dot_dimension_numbers<[1], [0], [0], [1], [0, 0, 1, 1], [], []>, precision = #tpu.contract_precision<fp32>} : vector<1x32xf32>, vector<32x128xf32>, vector<1x128xf32> -> vector<1x128xf32>
    %29 = arith.addf %27, %28 : vector<1x128xf32>
    %30 = arith.negf %29 : vector<1x128xf32>
    %31 = math.exp %30 : vector<1x128xf32>
    %cst_14 = arith.constant 1.000000e+00 : f32
    %32 = vector.broadcast %cst_14 : f32 to vector<1x128xf32>
    %33 = arith.addf %32, %31 : vector<1x128xf32>
    %34 = arith.divf %32, %33 : vector<1x128xf32>
    %35 = vector.extract_strided_slice %29 {offsets = [0, 64], sizes = [1, 32], strides = [1, 1]} : vector<1x128xf32> to vector<1x32xf32>
    %36 = math.tanh %35 : vector<1x32xf32>
    %37 = vector.extract_strided_slice %34 {offsets = [0, 0], sizes = [1, 32], strides = [1, 1]} : vector<1x128xf32> to vector<1x32xf32>
    %38 = vector.extract_strided_slice %34 {offsets = [0, 32], sizes = [1, 32], strides = [1, 1]} : vector<1x128xf32> to vector<1x32xf32>
    %39 = vector.extract_strided_slice %34 {offsets = [0, 96], sizes = [1, 32], strides = [1, 1]} : vector<1x128xf32> to vector<1x32xf32>
    %40 = arith.mulf %38, %24 : vector<1x32xf32>
    %41 = arith.mulf %37, %36 : vector<1x32xf32>
    %42 = arith.addf %40, %41 : vector<1x32xf32>
    %43 = math.tanh %42 : vector<1x32xf32>
    %44 = arith.mulf %39, %43 : vector<1x32xf32>
    %45 = vector.extract_strided_slice %6 {offsets = [2, 0], sizes = [1, 128], strides = [1, 1]} : vector<8x128xf32> to vector<1x128xf32>
    %cst_15 = arith.constant dense<0.000000e+00> : vector<1x128xf32>
    %46 = tpu.matmul %44, %2, %cst_15 {dimension_numbers = #tpu.dot_dimension_numbers<[1], [0], [0], [1], [0, 0, 1, 1], [], []>, precision = #tpu.contract_precision<fp32>} : vector<1x32xf32>, vector<32x128xf32>, vector<1x128xf32> -> vector<1x128xf32>
    %47 = arith.addf %45, %46 : vector<1x128xf32>
    %48 = arith.negf %47 : vector<1x128xf32>
    %49 = math.exp %48 : vector<1x128xf32>
    %cst_16 = arith.constant 1.000000e+00 : f32
    %50 = vector.broadcast %cst_16 : f32 to vector<1x128xf32>
    %51 = arith.addf %50, %49 : vector<1x128xf32>
    %52 = arith.divf %50, %51 : vector<1x128xf32>
    %53 = vector.extract_strided_slice %47 {offsets = [0, 64], sizes = [1, 32], strides = [1, 1]} : vector<1x128xf32> to vector<1x32xf32>
    %54 = math.tanh %53 : vector<1x32xf32>
    %55 = vector.extract_strided_slice %52 {offsets = [0, 0], sizes = [1, 32], strides = [1, 1]} : vector<1x128xf32> to vector<1x32xf32>
    %56 = vector.extract_strided_slice %52 {offsets = [0, 32], sizes = [1, 32], strides = [1, 1]} : vector<1x128xf32> to vector<1x32xf32>
    %57 = vector.extract_strided_slice %52 {offsets = [0, 96], sizes = [1, 32], strides = [1, 1]} : vector<1x128xf32> to vector<1x32xf32>
    %58 = arith.mulf %56, %42 : vector<1x32xf32>
    %59 = arith.mulf %55, %54 : vector<1x32xf32>
    %60 = arith.addf %58, %59 : vector<1x32xf32>
    %61 = math.tanh %60 : vector<1x32xf32>
    %62 = arith.mulf %57, %61 : vector<1x32xf32>
    %63 = vector.extract_strided_slice %6 {offsets = [3, 0], sizes = [1, 128], strides = [1, 1]} : vector<8x128xf32> to vector<1x128xf32>
    %cst_17 = arith.constant dense<0.000000e+00> : vector<1x128xf32>
    %64 = tpu.matmul %62, %2, %cst_17 {dimension_numbers = #tpu.dot_dimension_numbers<[1], [0], [0], [1], [0, 0, 1, 1], [], []>, precision = #tpu.contract_precision<fp32>} : vector<1x32xf32>, vector<32x128xf32>, vector<1x128xf32> -> vector<1x128xf32>
    %65 = arith.addf %63, %64 : vector<1x128xf32>
    %66 = arith.negf %65 : vector<1x128xf32>
    %67 = math.exp %66 : vector<1x128xf32>
    %cst_18 = arith.constant 1.000000e+00 : f32
    %68 = vector.broadcast %cst_18 : f32 to vector<1x128xf32>
    %69 = arith.addf %68, %67 : vector<1x128xf32>
    %70 = arith.divf %68, %69 : vector<1x128xf32>
    %71 = vector.extract_strided_slice %65 {offsets = [0, 64], sizes = [1, 32], strides = [1, 1]} : vector<1x128xf32> to vector<1x32xf32>
    %72 = math.tanh %71 : vector<1x32xf32>
    %73 = vector.extract_strided_slice %70 {offsets = [0, 0], sizes = [1, 32], strides = [1, 1]} : vector<1x128xf32> to vector<1x32xf32>
    %74 = vector.extract_strided_slice %70 {offsets = [0, 32], sizes = [1, 32], strides = [1, 1]} : vector<1x128xf32> to vector<1x32xf32>
    %75 = vector.extract_strided_slice %70 {offsets = [0, 96], sizes = [1, 32], strides = [1, 1]} : vector<1x128xf32> to vector<1x32xf32>
    %76 = arith.mulf %74, %60 : vector<1x32xf32>
    %77 = arith.mulf %73, %72 : vector<1x32xf32>
    %78 = arith.addf %76, %77 : vector<1x32xf32>
    %79 = math.tanh %78 : vector<1x32xf32>
    %80 = arith.mulf %75, %79 : vector<1x32xf32>
    %81 = vector.extract_strided_slice %6 {offsets = [4, 0], sizes = [1, 128], strides = [1, 1]} : vector<8x128xf32> to vector<1x128xf32>
    %cst_19 = arith.constant dense<0.000000e+00> : vector<1x128xf32>
    %82 = tpu.matmul %80, %2, %cst_19 {dimension_numbers = #tpu.dot_dimension_numbers<[1], [0], [0], [1], [0, 0, 1, 1], [], []>, precision = #tpu.contract_precision<fp32>} : vector<1x32xf32>, vector<32x128xf32>, vector<1x128xf32> -> vector<1x128xf32>
    %83 = arith.addf %81, %82 : vector<1x128xf32>
    %84 = arith.negf %83 : vector<1x128xf32>
    %85 = math.exp %84 : vector<1x128xf32>
    %cst_20 = arith.constant 1.000000e+00 : f32
    %86 = vector.broadcast %cst_20 : f32 to vector<1x128xf32>
    %87 = arith.addf %86, %85 : vector<1x128xf32>
    %88 = arith.divf %86, %87 : vector<1x128xf32>
    %89 = vector.extract_strided_slice %83 {offsets = [0, 64], sizes = [1, 32], strides = [1, 1]} : vector<1x128xf32> to vector<1x32xf32>
    %90 = math.tanh %89 : vector<1x32xf32>
    %91 = vector.extract_strided_slice %88 {offsets = [0, 0], sizes = [1, 32], strides = [1, 1]} : vector<1x128xf32> to vector<1x32xf32>
    %92 = vector.extract_strided_slice %88 {offsets = [0, 32], sizes = [1, 32], strides = [1, 1]} : vector<1x128xf32> to vector<1x32xf32>
    %93 = vector.extract_strided_slice %88 {offsets = [0, 96], sizes = [1, 32], strides = [1, 1]} : vector<1x128xf32> to vector<1x32xf32>
    %94 = arith.mulf %92, %78 : vector<1x32xf32>
    %95 = arith.mulf %91, %90 : vector<1x32xf32>
    %96 = arith.addf %94, %95 : vector<1x32xf32>
    %97 = math.tanh %96 : vector<1x32xf32>
    %98 = arith.mulf %93, %97 : vector<1x32xf32>
    %99 = vector.extract_strided_slice %6 {offsets = [5, 0], sizes = [1, 128], strides = [1, 1]} : vector<8x128xf32> to vector<1x128xf32>
    %cst_21 = arith.constant dense<0.000000e+00> : vector<1x128xf32>
    %100 = tpu.matmul %98, %2, %cst_21 {dimension_numbers = #tpu.dot_dimension_numbers<[1], [0], [0], [1], [0, 0, 1, 1], [], []>, precision = #tpu.contract_precision<fp32>} : vector<1x32xf32>, vector<32x128xf32>, vector<1x128xf32> -> vector<1x128xf32>
    %101 = arith.addf %99, %100 : vector<1x128xf32>
    %102 = arith.negf %101 : vector<1x128xf32>
    %103 = math.exp %102 : vector<1x128xf32>
    %cst_22 = arith.constant 1.000000e+00 : f32
    %104 = vector.broadcast %cst_22 : f32 to vector<1x128xf32>
    %105 = arith.addf %104, %103 : vector<1x128xf32>
    %106 = arith.divf %104, %105 : vector<1x128xf32>
    %107 = vector.extract_strided_slice %101 {offsets = [0, 64], sizes = [1, 32], strides = [1, 1]} : vector<1x128xf32> to vector<1x32xf32>
    %108 = math.tanh %107 : vector<1x32xf32>
    %109 = vector.extract_strided_slice %106 {offsets = [0, 0], sizes = [1, 32], strides = [1, 1]} : vector<1x128xf32> to vector<1x32xf32>
    %110 = vector.extract_strided_slice %106 {offsets = [0, 32], sizes = [1, 32], strides = [1, 1]} : vector<1x128xf32> to vector<1x32xf32>
    %111 = vector.extract_strided_slice %106 {offsets = [0, 96], sizes = [1, 32], strides = [1, 1]} : vector<1x128xf32> to vector<1x32xf32>
    %112 = arith.mulf %110, %96 : vector<1x32xf32>
    %113 = arith.mulf %109, %108 : vector<1x32xf32>
    %114 = arith.addf %112, %113 : vector<1x32xf32>
    %115 = math.tanh %114 : vector<1x32xf32>
    %116 = arith.mulf %111, %115 : vector<1x32xf32>
    %117 = vector.extract_strided_slice %6 {offsets = [6, 0], sizes = [1, 128], strides = [1, 1]} : vector<8x128xf32> to vector<1x128xf32>
    %cst_23 = arith.constant dense<0.000000e+00> : vector<1x128xf32>
    %118 = tpu.matmul %116, %2, %cst_23 {dimension_numbers = #tpu.dot_dimension_numbers<[1], [0], [0], [1], [0, 0, 1, 1], [], []>, precision = #tpu.contract_precision<fp32>} : vector<1x32xf32>, vector<32x128xf32>, vector<1x128xf32> -> vector<1x128xf32>
    %119 = arith.addf %117, %118 : vector<1x128xf32>
    %120 = arith.negf %119 : vector<1x128xf32>
    %121 = math.exp %120 : vector<1x128xf32>
    %cst_24 = arith.constant 1.000000e+00 : f32
    %122 = vector.broadcast %cst_24 : f32 to vector<1x128xf32>
    %123 = arith.addf %122, %121 : vector<1x128xf32>
    %124 = arith.divf %122, %123 : vector<1x128xf32>
    %125 = vector.extract_strided_slice %119 {offsets = [0, 64], sizes = [1, 32], strides = [1, 1]} : vector<1x128xf32> to vector<1x32xf32>
    %126 = math.tanh %125 : vector<1x32xf32>
    %127 = vector.extract_strided_slice %124 {offsets = [0, 0], sizes = [1, 32], strides = [1, 1]} : vector<1x128xf32> to vector<1x32xf32>
    %128 = vector.extract_strided_slice %124 {offsets = [0, 32], sizes = [1, 32], strides = [1, 1]} : vector<1x128xf32> to vector<1x32xf32>
    %129 = vector.extract_strided_slice %124 {offsets = [0, 96], sizes = [1, 32], strides = [1, 1]} : vector<1x128xf32> to vector<1x32xf32>
    %130 = arith.mulf %128, %114 : vector<1x32xf32>
    %131 = arith.mulf %127, %126 : vector<1x32xf32>
    %132 = arith.addf %130, %131 : vector<1x32xf32>
    %133 = math.tanh %132 : vector<1x32xf32>
    %134 = arith.mulf %129, %133 : vector<1x32xf32>
    %135 = vector.extract_strided_slice %6 {offsets = [7, 0], sizes = [1, 128], strides = [1, 1]} : vector<8x128xf32> to vector<1x128xf32>
    %cst_25 = arith.constant dense<0.000000e+00> : vector<1x128xf32>
    %136 = tpu.matmul %134, %2, %cst_25 {dimension_numbers = #tpu.dot_dimension_numbers<[1], [0], [0], [1], [0, 0, 1, 1], [], []>, precision = #tpu.contract_precision<fp32>} : vector<1x32xf32>, vector<32x128xf32>, vector<1x128xf32> -> vector<1x128xf32>
    %137 = arith.addf %135, %136 : vector<1x128xf32>
    %138 = arith.negf %137 : vector<1x128xf32>
    %139 = math.exp %138 : vector<1x128xf32>
    %cst_26 = arith.constant 1.000000e+00 : f32
    %140 = vector.broadcast %cst_26 : f32 to vector<1x128xf32>
    %141 = arith.addf %140, %139 : vector<1x128xf32>
    %142 = arith.divf %140, %141 : vector<1x128xf32>
    %143 = vector.extract_strided_slice %137 {offsets = [0, 64], sizes = [1, 32], strides = [1, 1]} : vector<1x128xf32> to vector<1x32xf32>
    %144 = math.tanh %143 : vector<1x32xf32>
    %145 = vector.extract_strided_slice %142 {offsets = [0, 0], sizes = [1, 32], strides = [1, 1]} : vector<1x128xf32> to vector<1x32xf32>
    %146 = vector.extract_strided_slice %142 {offsets = [0, 32], sizes = [1, 32], strides = [1, 1]} : vector<1x128xf32> to vector<1x32xf32>
    %147 = vector.extract_strided_slice %142 {offsets = [0, 96], sizes = [1, 32], strides = [1, 1]} : vector<1x128xf32> to vector<1x32xf32>
    %148 = arith.mulf %146, %132 : vector<1x32xf32>
    %149 = arith.mulf %145, %144 : vector<1x32xf32>
    %150 = arith.addf %148, %149 : vector<1x32xf32>
    %151 = math.tanh %150 : vector<1x32xf32>
    %152 = arith.mulf %147, %151 : vector<1x32xf32>
    %153 = tpu.concatenate %26, %44, %62, %80, %98, %116, %134, %152 in 0 : vector<1x32xf32>, vector<1x32xf32>, vector<1x32xf32>, vector<1x32xf32>, vector<1x32xf32>, vector<1x32xf32>, vector<1x32xf32>, vector<1x32xf32> -> vector<8x32xf32>
    %c0_27 = arith.constant 0 : index
    %c0_28 = arith.constant 0 : index
    %154 = vector.load %arg12[%c0_27, %c0_28] : memref<2x32xf32, #tpu.memory_space<vmem>>, vector<1x32xf32>
    tpu.vector_store %arg12[%c0_27, %c0_28], %152 {strides = array<i32>} : memref<2x32xf32, #tpu.memory_space<vmem>>, vector<1x32xf32>,
    %c0_29 = arith.constant 0 : index
    %c0_30 = arith.constant 0 : index
    %155 = vector.load %arg13[%c0_29, %c0_30] : memref<2x32xf32, #tpu.memory_space<vmem>>, vector<1x32xf32>
    tpu.vector_store %arg13[%c0_29, %c0_30], %150 {strides = array<i32>} : memref<2x32xf32, #tpu.memory_space<vmem>>, vector<1x32xf32>,
    %c0_31 = arith.constant 0 : index
    %c0_32 = arith.constant 0 : index
    %156 = vector.load %arg6[%c0_31, %c0_32] : memref<32x128xf32, #tpu.memory_space<vmem>>, vector<32x128xf32>
    %c0_33 = arith.constant 0 : index
    %c0_34 = arith.constant 0 : index
    %157 = vector.load %arg7[%c0_33, %c0_34] : memref<32x128xf32, #tpu.memory_space<vmem>>, vector<32x128xf32>
    %c0_35 = arith.constant 0 : index
    %c0_36 = arith.constant 0 : index
    %158 = vector.load %arg8[%c0_35, %c0_36] : memref<1x128xf32, #tpu.memory_space<vmem>>, vector<1x128xf32>
    %cst_37 = arith.constant dense<0.000000e+00> : vector<8x128xf32>
    %159 = tpu.matmul %153, %156, %cst_37 {dimension_numbers = #tpu.dot_dimension_numbers<[1], [0], [0], [1], [0, 0, 1, 1], [], []>, precision = #tpu.contract_precision<fp32>} : vector<8x32xf32>, vector<32x128xf32>, vector<8x128xf32> -> vector<8x128xf32>
    %160 = vector.broadcast %158 : vector<1x128xf32> to vector<8x128xf32>
    %161 = arith.addf %159, %160 : vector<8x128xf32>
    %c1 = arith.constant 1 : index
    %c0_38 = arith.constant 0 : index
    %162 = vector.load %arg1[%c1, %c0_38] : memref<2x32xf32, #tpu.memory_space<vmem>>, vector<1x32xf32>
    %c1_39 = arith.constant 1 : index
    %c0_40 = arith.constant 0 : index
    %163 = vector.load %arg2[%c1_39, %c0_40] : memref<2x32xf32, #tpu.memory_space<vmem>>, vector<1x32xf32>
    %164 = vector.extract_strided_slice %161 {offsets = [0, 0], sizes = [1, 128], strides = [1, 1]} : vector<8x128xf32> to vector<1x128xf32>
    %cst_41 = arith.constant dense<0.000000e+00> : vector<1x128xf32>
    %165 = tpu.matmul %162, %157, %cst_41 {dimension_numbers = #tpu.dot_dimension_numbers<[1], [0], [0], [1], [0, 0, 1, 1], [], []>, precision = #tpu.contract_precision<fp32>} : vector<1x32xf32>, vector<32x128xf32>, vector<1x128xf32> -> vector<1x128xf32>
    %166 = arith.addf %164, %165 : vector<1x128xf32>
    %167 = arith.negf %166 : vector<1x128xf32>
    %168 = math.exp %167 : vector<1x128xf32>
    %cst_42 = arith.constant 1.000000e+00 : f32
    %169 = vector.broadcast %cst_42 : f32 to vector<1x128xf32>
    %170 = arith.addf %169, %168 : vector<1x128xf32>
    %171 = arith.divf %169, %170 : vector<1x128xf32>
    %172 = vector.extract_strided_slice %166 {offsets = [0, 64], sizes = [1, 32], strides = [1, 1]} : vector<1x128xf32> to vector<1x32xf32>
    %173 = math.tanh %172 : vector<1x32xf32>
    %174 = vector.extract_strided_slice %171 {offsets = [0, 0], sizes = [1, 32], strides = [1, 1]} : vector<1x128xf32> to vector<1x32xf32>
    %175 = vector.extract_strided_slice %171 {offsets = [0, 32], sizes = [1, 32], strides = [1, 1]} : vector<1x128xf32> to vector<1x32xf32>
    %176 = vector.extract_strided_slice %171 {offsets = [0, 96], sizes = [1, 32], strides = [1, 1]} : vector<1x128xf32> to vector<1x32xf32>
    %177 = arith.mulf %175, %163 : vector<1x32xf32>
    %178 = arith.mulf %174, %173 : vector<1x32xf32>
    %179 = arith.addf %177, %178 : vector<1x32xf32>
    %180 = math.tanh %179 : vector<1x32xf32>
    %181 = arith.mulf %176, %180 : vector<1x32xf32>
    %182 = vector.extract_strided_slice %161 {offsets = [1, 0], sizes = [1, 128], strides = [1, 1]} : vector<8x128xf32> to vector<1x128xf32>
    %cst_43 = arith.constant dense<0.000000e+00> : vector<1x128xf32>
    %183 = tpu.matmul %181, %157, %cst_43 {dimension_numbers = #tpu.dot_dimension_numbers<[1], [0], [0], [1], [0, 0, 1, 1], [], []>, precision = #tpu.contract_precision<fp32>} : vector<1x32xf32>, vector<32x128xf32>, vector<1x128xf32> -> vector<1x128xf32>
    %184 = arith.addf %182, %183 : vector<1x128xf32>
    %185 = arith.negf %184 : vector<1x128xf32>
    %186 = math.exp %185 : vector<1x128xf32>
    %cst_44 = arith.constant 1.000000e+00 : f32
    %187 = vector.broadcast %cst_44 : f32 to vector<1x128xf32>
    %188 = arith.addf %187, %186 : vector<1x128xf32>
    %189 = arith.divf %187, %188 : vector<1x128xf32>
    %190 = vector.extract_strided_slice %184 {offsets = [0, 64], sizes = [1, 32], strides = [1, 1]} : vector<1x128xf32> to vector<1x32xf32>
    %191 = math.tanh %190 : vector<1x32xf32>
    %192 = vector.extract_strided_slice %189 {offsets = [0, 0], sizes = [1, 32], strides = [1, 1]} : vector<1x128xf32> to vector<1x32xf32>
    %193 = vector.extract_strided_slice %189 {offsets = [0, 32], sizes = [1, 32], strides = [1, 1]} : vector<1x128xf32> to vector<1x32xf32>
    %194 = vector.extract_strided_slice %189 {offsets = [0, 96], sizes = [1, 32], strides = [1, 1]} : vector<1x128xf32> to vector<1x32xf32>
    %195 = arith.mulf %193, %179 : vector<1x32xf32>
    %196 = arith.mulf %192, %191 : vector<1x32xf32>
    %197 = arith.addf %195, %196 : vector<1x32xf32>
    %198 = math.tanh %197 : vector<1x32xf32>
    %199 = arith.mulf %194, %198 : vector<1x32xf32>
    %200 = vector.extract_strided_slice %161 {offsets = [2, 0], sizes = [1, 128], strides = [1, 1]} : vector<8x128xf32> to vector<1x128xf32>
    %cst_45 = arith.constant dense<0.000000e+00> : vector<1x128xf32>
    %201 = tpu.matmul %199, %157, %cst_45 {dimension_numbers = #tpu.dot_dimension_numbers<[1], [0], [0], [1], [0, 0, 1, 1], [], []>, precision = #tpu.contract_precision<fp32>} : vector<1x32xf32>, vector<32x128xf32>, vector<1x128xf32> -> vector<1x128xf32>
    %202 = arith.addf %200, %201 : vector<1x128xf32>
    %203 = arith.negf %202 : vector<1x128xf32>
    %204 = math.exp %203 : vector<1x128xf32>
    %cst_46 = arith.constant 1.000000e+00 : f32
    %205 = vector.broadcast %cst_46 : f32 to vector<1x128xf32>
    %206 = arith.addf %205, %204 : vector<1x128xf32>
    %207 = arith.divf %205, %206 : vector<1x128xf32>
    %208 = vector.extract_strided_slice %202 {offsets = [0, 64], sizes = [1, 32], strides = [1, 1]} : vector<1x128xf32> to vector<1x32xf32>
    %209 = math.tanh %208 : vector<1x32xf32>
    %210 = vector.extract_strided_slice %207 {offsets = [0, 0], sizes = [1, 32], strides = [1, 1]} : vector<1x128xf32> to vector<1x32xf32>
    %211 = vector.extract_strided_slice %207 {offsets = [0, 32], sizes = [1, 32], strides = [1, 1]} : vector<1x128xf32> to vector<1x32xf32>
    %212 = vector.extract_strided_slice %207 {offsets = [0, 96], sizes = [1, 32], strides = [1, 1]} : vector<1x128xf32> to vector<1x32xf32>
    %213 = arith.mulf %211, %197 : vector<1x32xf32>
    %214 = arith.mulf %210, %209 : vector<1x32xf32>
    %215 = arith.addf %213, %214 : vector<1x32xf32>
    %216 = math.tanh %215 : vector<1x32xf32>
    %217 = arith.mulf %212, %216 : vector<1x32xf32>
    %218 = vector.extract_strided_slice %161 {offsets = [3, 0], sizes = [1, 128], strides = [1, 1]} : vector<8x128xf32> to vector<1x128xf32>
    %cst_47 = arith.constant dense<0.000000e+00> : vector<1x128xf32>
    %219 = tpu.matmul %217, %157, %cst_47 {dimension_numbers = #tpu.dot_dimension_numbers<[1], [0], [0], [1], [0, 0, 1, 1], [], []>, precision = #tpu.contract_precision<fp32>} : vector<1x32xf32>, vector<32x128xf32>, vector<1x128xf32> -> vector<1x128xf32>
    %220 = arith.addf %218, %219 : vector<1x128xf32>
    %221 = arith.negf %220 : vector<1x128xf32>
    %222 = math.exp %221 : vector<1x128xf32>
    %cst_48 = arith.constant 1.000000e+00 : f32
    %223 = vector.broadcast %cst_48 : f32 to vector<1x128xf32>
    %224 = arith.addf %223, %222 : vector<1x128xf32>
    %225 = arith.divf %223, %224 : vector<1x128xf32>
    %226 = vector.extract_strided_slice %220 {offsets = [0, 64], sizes = [1, 32], strides = [1, 1]} : vector<1x128xf32> to vector<1x32xf32>
    %227 = math.tanh %226 : vector<1x32xf32>
    %228 = vector.extract_strided_slice %225 {offsets = [0, 0], sizes = [1, 32], strides = [1, 1]} : vector<1x128xf32> to vector<1x32xf32>
    %229 = vector.extract_strided_slice %225 {offsets = [0, 32], sizes = [1, 32], strides = [1, 1]} : vector<1x128xf32> to vector<1x32xf32>
    %230 = vector.extract_strided_slice %225 {offsets = [0, 96], sizes = [1, 32], strides = [1, 1]} : vector<1x128xf32> to vector<1x32xf32>
    %231 = arith.mulf %229, %215 : vector<1x32xf32>
    %232 = arith.mulf %228, %227 : vector<1x32xf32>
    %233 = arith.addf %231, %232 : vector<1x32xf32>
    %234 = math.tanh %233 : vector<1x32xf32>
    %235 = arith.mulf %230, %234 : vector<1x32xf32>
    %236 = vector.extract_strided_slice %161 {offsets = [4, 0], sizes = [1, 128], strides = [1, 1]} : vector<8x128xf32> to vector<1x128xf32>
    %cst_49 = arith.constant dense<0.000000e+00> : vector<1x128xf32>
    %237 = tpu.matmul %235, %157, %cst_49 {dimension_numbers = #tpu.dot_dimension_numbers<[1], [0], [0], [1], [0, 0, 1, 1], [], []>, precision = #tpu.contract_precision<fp32>} : vector<1x32xf32>, vector<32x128xf32>, vector<1x128xf32> -> vector<1x128xf32>
    %238 = arith.addf %236, %237 : vector<1x128xf32>
    %239 = arith.negf %238 : vector<1x128xf32>
    %240 = math.exp %239 : vector<1x128xf32>
    %cst_50 = arith.constant 1.000000e+00 : f32
    %241 = vector.broadcast %cst_50 : f32 to vector<1x128xf32>
    %242 = arith.addf %241, %240 : vector<1x128xf32>
    %243 = arith.divf %241, %242 : vector<1x128xf32>
    %244 = vector.extract_strided_slice %238 {offsets = [0, 64], sizes = [1, 32], strides = [1, 1]} : vector<1x128xf32> to vector<1x32xf32>
    %245 = math.tanh %244 : vector<1x32xf32>
    %246 = vector.extract_strided_slice %243 {offsets = [0, 0], sizes = [1, 32], strides = [1, 1]} : vector<1x128xf32> to vector<1x32xf32>
    %247 = vector.extract_strided_slice %243 {offsets = [0, 32], sizes = [1, 32], strides = [1, 1]} : vector<1x128xf32> to vector<1x32xf32>
    %248 = vector.extract_strided_slice %243 {offsets = [0, 96], sizes = [1, 32], strides = [1, 1]} : vector<1x128xf32> to vector<1x32xf32>
    %249 = arith.mulf %247, %233 : vector<1x32xf32>
    %250 = arith.mulf %246, %245 : vector<1x32xf32>
    %251 = arith.addf %249, %250 : vector<1x32xf32>
    %252 = math.tanh %251 : vector<1x32xf32>
    %253 = arith.mulf %248, %252 : vector<1x32xf32>
    %254 = vector.extract_strided_slice %161 {offsets = [5, 0], sizes = [1, 128], strides = [1, 1]} : vector<8x128xf32> to vector<1x128xf32>
    %cst_51 = arith.constant dense<0.000000e+00> : vector<1x128xf32>
    %255 = tpu.matmul %253, %157, %cst_51 {dimension_numbers = #tpu.dot_dimension_numbers<[1], [0], [0], [1], [0, 0, 1, 1], [], []>, precision = #tpu.contract_precision<fp32>} : vector<1x32xf32>, vector<32x128xf32>, vector<1x128xf32> -> vector<1x128xf32>
    %256 = arith.addf %254, %255 : vector<1x128xf32>
    %257 = arith.negf %256 : vector<1x128xf32>
    %258 = math.exp %257 : vector<1x128xf32>
    %cst_52 = arith.constant 1.000000e+00 : f32
    %259 = vector.broadcast %cst_52 : f32 to vector<1x128xf32>
    %260 = arith.addf %259, %258 : vector<1x128xf32>
    %261 = arith.divf %259, %260 : vector<1x128xf32>
    %262 = vector.extract_strided_slice %256 {offsets = [0, 64], sizes = [1, 32], strides = [1, 1]} : vector<1x128xf32> to vector<1x32xf32>
    %263 = math.tanh %262 : vector<1x32xf32>
    %264 = vector.extract_strided_slice %261 {offsets = [0, 0], sizes = [1, 32], strides = [1, 1]} : vector<1x128xf32> to vector<1x32xf32>
    %265 = vector.extract_strided_slice %261 {offsets = [0, 32], sizes = [1, 32], strides = [1, 1]} : vector<1x128xf32> to vector<1x32xf32>
    %266 = vector.extract_strided_slice %261 {offsets = [0, 96], sizes = [1, 32], strides = [1, 1]} : vector<1x128xf32> to vector<1x32xf32>
    %267 = arith.mulf %265, %251 : vector<1x32xf32>
    %268 = arith.mulf %264, %263 : vector<1x32xf32>
    %269 = arith.addf %267, %268 : vector<1x32xf32>
    %270 = math.tanh %269 : vector<1x32xf32>
    %271 = arith.mulf %266, %270 : vector<1x32xf32>
    %272 = vector.extract_strided_slice %161 {offsets = [6, 0], sizes = [1, 128], strides = [1, 1]} : vector<8x128xf32> to vector<1x128xf32>
    %cst_53 = arith.constant dense<0.000000e+00> : vector<1x128xf32>
    %273 = tpu.matmul %271, %157, %cst_53 {dimension_numbers = #tpu.dot_dimension_numbers<[1], [0], [0], [1], [0, 0, 1, 1], [], []>, precision = #tpu.contract_precision<fp32>} : vector<1x32xf32>, vector<32x128xf32>, vector<1x128xf32> -> vector<1x128xf32>
    %274 = arith.addf %272, %273 : vector<1x128xf32>
    %275 = arith.negf %274 : vector<1x128xf32>
    %276 = math.exp %275 : vector<1x128xf32>
    %cst_54 = arith.constant 1.000000e+00 : f32
    %277 = vector.broadcast %cst_54 : f32 to vector<1x128xf32>
    %278 = arith.addf %277, %276 : vector<1x128xf32>
    %279 = arith.divf %277, %278 : vector<1x128xf32>
    %280 = vector.extract_strided_slice %274 {offsets = [0, 64], sizes = [1, 32], strides = [1, 1]} : vector<1x128xf32> to vector<1x32xf32>
    %281 = math.tanh %280 : vector<1x32xf32>
    %282 = vector.extract_strided_slice %279 {offsets = [0, 0], sizes = [1, 32], strides = [1, 1]} : vector<1x128xf32> to vector<1x32xf32>
    %283 = vector.extract_strided_slice %279 {offsets = [0, 32], sizes = [1, 32], strides = [1, 1]} : vector<1x128xf32> to vector<1x32xf32>
    %284 = vector.extract_strided_slice %279 {offsets = [0, 96], sizes = [1, 32], strides = [1, 1]} : vector<1x128xf32> to vector<1x32xf32>
    %285 = arith.mulf %283, %269 : vector<1x32xf32>
    %286 = arith.mulf %282, %281 : vector<1x32xf32>
    %287 = arith.addf %285, %286 : vector<1x32xf32>
    %288 = math.tanh %287 : vector<1x32xf32>
    %289 = arith.mulf %284, %288 : vector<1x32xf32>
    %290 = vector.extract_strided_slice %161 {offsets = [7, 0], sizes = [1, 128], strides = [1, 1]} : vector<8x128xf32> to vector<1x128xf32>
    %cst_55 = arith.constant dense<0.000000e+00> : vector<1x128xf32>
    %291 = tpu.matmul %289, %157, %cst_55 {dimension_numbers = #tpu.dot_dimension_numbers<[1], [0], [0], [1], [0, 0, 1, 1], [], []>, precision = #tpu.contract_precision<fp32>} : vector<1x32xf32>, vector<32x128xf32>, vector<1x128xf32> -> vector<1x128xf32>
    %292 = arith.addf %290, %291 : vector<1x128xf32>
    %293 = arith.negf %292 : vector<1x128xf32>
    %294 = math.exp %293 : vector<1x128xf32>
    %cst_56 = arith.constant 1.000000e+00 : f32
    %295 = vector.broadcast %cst_56 : f32 to vector<1x128xf32>
    %296 = arith.addf %295, %294 : vector<1x128xf32>
    %297 = arith.divf %295, %296 : vector<1x128xf32>
    %298 = vector.extract_strided_slice %292 {offsets = [0, 64], sizes = [1, 32], strides = [1, 1]} : vector<1x128xf32> to vector<1x32xf32>
    %299 = math.tanh %298 : vector<1x32xf32>
    %300 = vector.extract_strided_slice %297 {offsets = [0, 0], sizes = [1, 32], strides = [1, 1]} : vector<1x128xf32> to vector<1x32xf32>
    %301 = vector.extract_strided_slice %297 {offsets = [0, 32], sizes = [1, 32], strides = [1, 1]} : vector<1x128xf32> to vector<1x32xf32>
    %302 = vector.extract_strided_slice %297 {offsets = [0, 96], sizes = [1, 32], strides = [1, 1]} : vector<1x128xf32> to vector<1x32xf32>
    %303 = arith.mulf %301, %287 : vector<1x32xf32>
    %304 = arith.mulf %300, %299 : vector<1x32xf32>
    %305 = arith.addf %303, %304 : vector<1x32xf32>
    %306 = math.tanh %305 : vector<1x32xf32>
    %307 = arith.mulf %302, %306 : vector<1x32xf32>
    %308 = tpu.concatenate %181, %199, %217, %235, %253, %271, %289, %307 in 0 : vector<1x32xf32>, vector<1x32xf32>, vector<1x32xf32>, vector<1x32xf32>, vector<1x32xf32>, vector<1x32xf32>, vector<1x32xf32>, vector<1x32xf32> -> vector<8x32xf32>
    %c1_57 = arith.constant 1 : index
    %c0_58 = arith.constant 0 : index
    %309 = vector.load %arg12[%c1_57, %c0_58] : memref<2x32xf32, #tpu.memory_space<vmem>>, vector<1x32xf32>
    tpu.vector_store %arg12[%c1_57, %c0_58], %307 {strides = array<i32>} : memref<2x32xf32, #tpu.memory_space<vmem>>, vector<1x32xf32>,
    %c1_59 = arith.constant 1 : index
    %c0_60 = arith.constant 0 : index
    %310 = vector.load %arg13[%c1_59, %c0_60] : memref<2x32xf32, #tpu.memory_space<vmem>>, vector<1x32xf32>
    tpu.vector_store %arg13[%c1_59, %c0_60], %305 {strides = array<i32>} : memref<2x32xf32, #tpu.memory_space<vmem>>, vector<1x32xf32>,
    %c0_61 = arith.constant 0 : index
    %c0_62 = arith.constant 0 : index
    %311 = vector.load %arg9[%c0_61, %c0_62] : memref<32x8xf32, #tpu.memory_space<vmem>>, vector<32x8xf32>
    %cst_63 = arith.constant dense<0.000000e+00> : vector<8x8xf32>
    %312 = tpu.matmul %308, %311, %cst_63 {dimension_numbers = #tpu.dot_dimension_numbers<[1], [0], [0], [1], [0, 0, 1, 1], [], []>, precision = #tpu.contract_precision<fp32>} : vector<8x32xf32>, vector<32x8xf32>, vector<8x8xf32> -> vector<8x8xf32>
    %c0_64 = arith.constant 0 : index
    %c0_65 = arith.constant 0 : index
    %313 = vector.load %arg10[%c0_64, %c0_65] : memref<1x8xf32, #tpu.memory_space<vmem>>, vector<1x8xf32>
    %314 = vector.broadcast %313 : vector<1x8xf32> to vector<8x8xf32>
    %315 = arith.addf %312, %314 : vector<8x8xf32>
    %316 = arith.negf %315 : vector<8x8xf32>
    %317 = math.exp %316 : vector<8x8xf32>
    %cst_66 = arith.constant 1.000000e+00 : f32
    %318 = vector.broadcast %cst_66 : f32 to vector<8x8xf32>
    %319 = arith.addf %318, %317 : vector<8x8xf32>
    %320 = arith.divf %318, %319 : vector<8x8xf32>
    %c0_67 = arith.constant 0 : index
    %c0_68 = arith.constant 0 : index
    %321 = vector.load %arg11[%c0_67, %c0_68] : memref<8x8xf32, #tpu.memory_space<vmem>>, vector<8x8xf32>
    tpu.vector_store %arg11[%c0_67, %c0_68], %320 {strides = array<i32>} : memref<8x8xf32, #tpu.memory_space<vmem>>, vector<8x8xf32>,
    return
  }
}

</mosaic_0001>

<bundles_post_ra>
// kernel: tpu_custom_call.1
= control target key start
LH: loop header
LB: loop body
LE: loop exit
PB: predicated region body
PF: predicated region fallthrough
CT: control target
= control target key end

     0   :  { %19 = vsyncpa [#allocation3], 0  ;;  %s14223_s0 = inlined_call_operand.vmem [shape: f32[8,16], index: 0, kind: input, shape index: {}]   ;;  %s14224_s1 = inlined_call_operand.hbm [shape: f32[2,32], index: 1, kind: input, shape index: {}, may-alias: {1,12}]   ;;  %s14225_s2 = inlined_call_operand.hbm [shape: f32[2,32], index: 2, kind: input, shape index: {}, may-alias: {2,13}]   ;;  %s14226_s3 = inlined_call_operand.vmem [shape: f32[16,128], index: 3, kind: input, shape index: {}]   ;;  %s14227_s4 = inlined_call_operand.vmem [shape: f32[32,128], index: 4, kind: input, shape index: {}]   ;;  %s14228_s5 = inlined_call_operand.vmem [shape: f32[1,128], index: 5, kind: input, shape index: {}]   ;;  %s14229_s6 = inlined_call_operand.hbm [shape: f32[32,128], index: 6, kind: input, shape index: {}]   ;;  %s14230_s7 = inlined_call_operand.hbm [shape: f32[32,128], index: 7, kind: input, shape index: {}]   ;;  %s14231_s8 = inlined_call_operand.vmem [shape: f32[1,128], index: 8, kind: input, shape index: {}]   ;;  %s14232_s9 = inlined_call_operand.vmem [shape: f32[32,8], index: 9, kind: input, shape index: {}]   ;;  %s14233_s10 = inlined_call_operand.vmem [shape: f32[1,8], index: 10, kind: input, shape index: {}]   ;;  %s14234_s11 = inlined_call_operand.hbm [shape: f32[8,8], index: 11, kind: output, shape index: {0}]   ;;  %s14235_s12 = inlined_call_operand.hbm [shape: f32[2,32], index: 12, kind: output, shape index: {1}, may-alias: {1,12}]   ;;  %s14236_s13 = inlined_call_operand.hbm [shape: f32[2,32], index: 13, kind: output, shape index: {2}, may-alias: {2,13}]  }
   0x1   :  { %20 = vsyncpa [#allocation6], 0 }
   0x2   :  { %21 = vsyncpa [#allocation9], 0 }
   0x3   :  { %22 = vsyncpa [#allocation4], 0 }
   0x4   :  { %23 = vsyncpa [#allocation12], 0  ;;  %s12973_s25 = smov [#allocation5]   ;;  %s12974_s27 = smov [#allocation2]  }
   0x5   :  { %s42_s26 = sshll.u32 %s12973_s25, 4  ;;  %s32_s28 = sshll.u32 %s12974_s27, 4  ;;  %s43_s26 = int_to_ptr.vmem [resolvable:$true] %s42_s26  ;;  %s33_s28 = int_to_ptr.vmem [resolvable:$true] %s32_s28 }
   0x6   :  { %s12809_s14 = scalar_lea.hbm %s14225_s2, 32 }
   0x7   :  { %p12810_p0 = scmp.ne.s32.totalorder %s14225_s2, %s12809_s14  ;;  %p12813_p1 = scmp.lt.u32.totalorder %s12809_s14, %s14225_s2 }
   0x9   :  { %p12815_p2 = pnand %p12813_p1, %p12810_p0 }
   0xb   :  { %12818 = shalt.err (!%p12815_p2)
}
   0xc   :  { %s12819_s19 = scalar_lea.vmem %s43_s26, 32  ;;  %p12824_p4 = scmp.lt.s32.totalorder %s43_s26, %s43_s26 }
   0xd   :  { %p12820_p3 = scmp.ne.s32.totalorder %s43_s26, %s12819_s19  ;;  %p12825_p5 = scmp.lt.s32.totalorder %s12819_s19, %s12819_s19 }
   0xf   :  { %p12826_p6 = por %p12825_p5, %p12824_p4 }
  0x11   :  { %p12827_p7 = pnand %p12826_p6, %p12820_p3 }
  0x13   :  { %12830 = shalt.err (!%p12827_p7)
}
  0x14   :  { %45 = dma.hbm_to_vmem [thread:$0]  %s14225_s2, 32, %s43_s26, [#allocation6]  }
  0x15   :  { %s12831_s24 = scalar_lea.hbm %s14224_s1, 32 }
  0x16   :  { %p12832_p8 = scmp.ne.s32.totalorder %s14224_s1, %s12831_s24  ;;  %p12835_p9 = scmp.lt.u32.totalorder %s12831_s24, %s14224_s1 }
  0x18   :  { %p12837_p10 = pnand %p12835_p9, %p12832_p8 }
  0x1a   :  { %12840 = shalt.err (!%p12837_p10)
}
  0x1b   :  { %s12841_s14 = scalar_lea.vmem %s33_s28, 32  ;;  %p12846_p12 = scmp.lt.s32.totalorder %s33_s28, %s33_s28 }
  0x1c   :  { %p12842_p11 = scmp.ne.s32.totalorder %s33_s28, %s12841_s14  ;;  %p12847_p13 = scmp.lt.s32.totalorder %s12841_s14, %s12841_s14 }
  0x1e   :  { %p12848_p0 = por %p12847_p13, %p12846_p12 }
  0x20   :  { %p12849_p1 = pnand %p12848_p0, %p12842_p11 }
  0x22   :  { %12852 = shalt.err (!%p12849_p1)
}
  0x23   :  { %35 = dma.hbm_to_vmem [thread:$0]  %s14224_s1, 32, %s33_s28, [#allocation3]  }
  0x24   :  { %s12975_s15 = smov [#allocation7]   ;;  %s12853_s19 = scalar_lea.hbm %s14229_s6, 512 }
  0x25   :  { %s57_s16 = sshll.u32 %s12975_s15, 4  ;;  %p12854_p2 = scmp.ne.s32.totalorder %s14229_s6, %s12853_s19  ;;  %s58_s16 = int_to_ptr.vmem [resolvable:$true] %s57_s16 }
  0x26   :  { %p12857_p3 = scmp.lt.u32.totalorder %s12853_s19, %s14229_s6 }
  0x28   :  { %p12859_p4 = pnand %p12857_p3, %p12854_p2 }
  0x2a   :  { %12862 = shalt.err (!%p12859_p4)
}
  0x2b   :  { %s12863_s24 = scalar_lea.vmem %s58_s16, 512  ;;  %p12868_p6 = scmp.lt.s32.totalorder %s58_s16, %s58_s16 }
  0x2c   :  { %p12864_p5 = scmp.ne.s32.totalorder %s58_s16, %s12863_s24  ;;  %p12869_p7 = scmp.lt.s32.totalorder %s12863_s24, %s12863_s24 }
  0x2e   :  { %p12870_p8 = por %p12869_p7, %p12868_p6 }
  0x30   :  { %p12871_p9 = pnand %p12870_p8, %p12864_p5 }
  0x32   :  { %12874 = shalt.err (!%p12871_p9)
}
  0x33   :  { %s12976_s1 = smov 128   ;;  %s12977_s28 = smov 8  }
  0x34   :  { %63 = dma.hbm_to_vmem [thread:$0]  %s14229_s6, 512, %s58_s16, [#allocation6], %s12976_s1, %s12976_s1, %s12977_s28  }
  0x35   :  { %s12978_s29 = smov [#allocation8]   ;;  %s12875_s26 = scalar_lea.hbm %s14230_s7, 512 }
  0x36   :  { %s69_s30 = sshll.u32 %s12978_s29, 4  ;;  %p12876_p10 = scmp.ne.s32.totalorder %s14230_s7, %s12875_s26  ;;  %s70_s30 = int_to_ptr.vmem [resolvable:$true] %s69_s30 }
  0x37   :  { %p12879_p11 = scmp.lt.u32.totalorder %s12875_s26, %s14230_s7 }
  0x39   :  { %p12881_p12 = pnand %p12879_p11, %p12876_p10 }
  0x3b   :  { %12884 = shalt.err (!%p12881_p12)
}
  0x3c   :  { %s12885_s20 = scalar_lea.vmem %s70_s30, 512  ;;  %p12890_p0 = scmp.lt.s32.totalorder %s70_s30, %s70_s30 }
  0x3d   :  { %p12886_p13 = scmp.ne.s32.totalorder %s70_s30, %s12885_s20  ;;  %p12891_p1 = scmp.lt.s32.totalorder %s12885_s20, %s12885_s20 }
  0x3f   :  { %p12892_p2 = por %p12891_p1, %p12890_p0 }
  0x41   :  { %p12893_p3 = pnand %p12892_p2, %p12886_p13 }
  0x43   :  { %12896 = shalt.err (!%p12893_p3)
}
  0x44   :  { %75 = dma.hbm_to_vmem [thread:$0]  %s14230_s7, 512, %s70_s30, [#allocation9], %s12976_s1, %s12976_s1, %s12977_s28  }
  0x45   :  { %12963 = dma.done.wait [#allocation3], 32  }
  0x46   :  { %12964 = vsyncadd [#allocation3], 4294967264 }
  0x47   :  { %12965 = dma.done.wait [#allocation6], 544  }
  0x48   :  { %12966 = vsyncadd [#allocation6], 4294966752 }
  0x49   :  { %12967 = dma.done.wait [#allocation9], 512  }
  0x4a   :  { %12968 = vsyncadd [#allocation9], 4294966784  ;;  %v12979_v0 = vmov 0.0|0.0   ;;  %vm12980_vm0 = vmmov 0   ;;  %v12981_v1 = vmov 0.0   ;;  %vm108_vm1 = vcmask 130048  }
  0x4b   :  { %11827 = vmatprep.subr.bf16.mxu0 %v12979_v0  ;;  %11824 = vmatprep.subr.bf16.mxu1 %v12979_v0  ;;  %v95_v2 = vld [vmem:[%s14226_s3] sm:$0xff]  ;;  %v96_v3 = vld [vmem:[%s14226_s3 + $0x8] sm:$0xff]  ;;  %vm573_vm2 = vcmask 261120   ;;  %v99_v10 = vld [vmem:[%s14227_s4 + $0x10] sm:$0xff]  ;;  %s12982_s26 = smov 64   ;;  %vm4744_vm3 = vcmask 1040384  }
  0x4c   :  { %10605 = vmatprep.mubr.msk.f32.mxu0 %vm12980_vm0, %v12981_v1  ;;  %10598 = vmatprep.mubr.msk.f32.mxu1 %vm12980_vm0, %v12981_v1  ;;  %v94_v4 = vld [vmem:[%s14223_s0] sm:$0xff]  ;;  %v113_v5 = vand.u32 4294901760, %v95_v2  ;;  %v116_v6 = vand.u32 4294901760, %v96_v3  ;;  %v98_v9 = vld [vmem:[%s14227_s4 + $0x8] sm:$0xff]  ;;  %v100_v14 = vld [vmem:[%s14227_s4 + $0x18] sm:$0xff]  ;;  %v584_v15 = vand.u32 4294901760, %v99_v10 }
  0x4d   :  { %v110_v7 = vsel %vm108_vm1, %v94_v4, 0  ;;  %v97_v8 = vld [vmem:[%s14227_s4] sm:$0xff]  ;;  %v581_v13 = vand.u32 4294901760, %v98_v9  ;;  %v587_v19 = vand.u32 4294901760, %v100_v14  ;;  %vm4746_vm4 = vcmask 1041408  }
  0x4e   :  { %v13130_v11 = vand.u32 4294901760, %v110_v7  ;;  %v578_v12 = vand.u32 4294901760, %v97_v8  ;;  %v13135_v16 = vsub.f32 %v95_v2, %v113_v5  ;;  %v13137_v17 = vsub.f32 %v96_v3, %v116_v6  ;;  %v571_v20 = vld [vmem:[#allocation2] sm:$0x1] }
  0x4f   :  { %v13139_v18 = vpack.c.bf16 %v116_v6, %v113_v5  ;;  %v575_v22 = vsel %vm573_vm2, %v571_v20, 0  ;;  %v665_v30 = vsub.f32 %v98_v9, %v581_v13  ;;  %v13159_v33 = vsub.f32 %v99_v10, %v584_v15 }
  0x50   :  { %v13142_v21 = vsub.f32 %v110_v7, %v13130_v11  ;;  %v13145_v23 = vsub.f32 %v97_v8, %v578_v12  ;;  %v192_v24 = vand.u32 4294901760, %v13135_v16  ;;  %v199_v25 = vand.u32 4294901760, %v13137_v17 }
  0x51   :  { %11826 = vmatpush3.bf16.msra.mxu1 %v13139_v18  ;;  %v13150_v26 = vpack.c.bf16 %v581_v13, %v578_v12  ;;  %v13154_v28 = vand.u32 4294901760, %v575_v22  ;;  %v13161_v34 = vsub.f32 %v100_v14, %v587_v19  ;;  %v666_v38 = vand.u32 4294901760, %v665_v30  ;;  %v10016_v12 = vld [vmem:[%s14228_s5] ss:$0 sm:$0xff]  ;;  %s12983_s5 = smov 32  }
  0x52   :  { %11842 = vmatprep.subr.bf16.mxu1 %v12979_v0  ;;  %v181_v27 = vand.u32 4294901760, %v13142_v21  ;;  %v659_v29 = vand.u32 4294901760, %v13145_v23  ;;  %v193_v31 = vsub.f32 %v13135_v16, %v192_v24  ;;  %v200_v32 = vsub.f32 %v13137_v17, %v199_v25 }
  0x53   :  { %v13165_v36 = vsub.f32 %v575_v22, %v13154_v28  ;;  %v673_v41 = vand.u32 4294901760, %v13159_v33  ;;  %v680_v42 = vand.u32 4294901760, %v13161_v34  ;;  %v667_v45 = vsub.f32 %v665_v30, %v666_v38 }
  0x54   :  { %v182_v35 = vsub.f32 %v13142_v21, %v181_v27  ;;  %v660_v37 = vsub.f32 %v13145_v23, %v659_v29  ;;  %v194_v39 = vand.u32 4294901760, %v193_v31  ;;  %v201_v40 = vand.u32 4294901760, %v200_v32 }
  0x55   :  { %v648_v44 = vand.u32 4294901760, %v13165_v36  ;;  %v11831_v47 = vpack.c.bf16 %v13137_v17, %v13135_v16  ;;  %v13173_v48 = vpack.c.bf16 %v587_v19, %v584_v15  ;;  %v668_v51 = vand.u32 4294901760, %v667_v45 }
  0x56   :  { %v183_v43 = vand.u32 4294901760, %v182_v35  ;;  %v11828_v46 = vpack.c.bf16 %v201_v40, %v194_v39  ;;  %v661_v50 = vand.u32 4294901760, %v660_v37  ;;  %v674_v52 = vsub.f32 %v13159_v33, %v673_v41 }
  0x57   :  { %v649_v49 = vsub.f32 %v13165_v36, %v648_v44  ;;  %v681_v53 = vsub.f32 %v13161_v34, %v680_v42  ;;  %v13203_v59 = vpack.c.bf16 %v665_v30, %v13145_v23  ;;  %v11837_v60 = vpack.c.bf16 %v199_v25, %v192_v24 }
  0x58   :  { %10599 = vmatmul.mubr.f32.vlgmr.msra.gmra.mrb[0].mxu1 %v183_v43  ;;  %11829 = vmatpush3.bf16.msra.mxu0 %v11828_v46  ;;  %v13187_v55 = vpack.c.bf16 %v668_v51, %v661_v50  ;;  %v675_v56 = vand.u32 4294901760, %v674_v52  ;;  %v13213_v61 = vpack.c.bf16 %v13161_v34, %v13159_v33  ;;  %v13219_v62 = vpack.c.bf16 %v666_v38, %v659_v29  ;;  %v572_v29 = vld [vmem:[#allocation5] sm:$0x1] }
  0x59   :  { %11844 = vmatpush3.bf16.msra.mxu1 %v13150_v26  ;;  %11830 = vmatprep.subr.bf16.mxu0 %v12979_v0  ;;  %v650_v54 = vand.u32 4294901760, %v649_v49  ;;  %v682_v57 = vand.u32 4294901760, %v681_v53  ;;  %v13230_v63 = vpack.c.bf16 %v680_v42, %v673_v41  ;;  %vm4748_vm5 = vcmask 1042432  }
  0x5a   :  { %11845 = vmatprep.subr.bf16.mxu1 %v12979_v0  ;;  %10644 = vmatprep.mubr.msk.f32.mxu1 %vm12980_vm0, %v12981_v1  ;;  %vm4750_vm6 = vcmask 1043456   ;;  %vm4752_vm7 = vcmask 1044480   ;;  %vm4754_vm8 = vcmask 1045504   ;;  %vm4756_vm9 = vcmask 1046528  }
  0x5b   :  { %10606 = vmatmul.mubr.f32.vlgmr.msra.gmra.mrb[0].mxu0 %v13130_v11  ;;  %v13194_v58 = vpack.c.bf16 %v682_v57, %v675_v56  ;;  %vm4762_vm10 = vcmask 261127  }
  0x5c   :  { %11832 = vmatpush3.bf16.msra.mxu0 %v11831_v47  ;;  %10612 = vmatprep.mubr.msk.f32.mxu0 %vm12980_vm0, %v12981_v1 }
  0x5d   :  { %11847 = vmatpush3.bf16.msra.mxu1 %v13173_v48  ;;  %11833 = vmatprep.subr.bf16.mxu0 %v12979_v0 }
  0x5e   :  { %11848 = vmatprep.subr.bf16.mxu1 %v12979_v0 }
  0x60   :  { %10645 = vmatmul.mubr.f32.vlgmr.msra.gmra.mrb[2].mxu1 %v650_v54 }
  0x61   :  { %11850 = vmatpush3.bf16.msra.mxu1 %v13187_v55  ;;  %10655 = vmatprep.mubr.msk.f32.mxu1 %vm12980_vm0, %v12981_v1 }
  0x62   :  { %11851 = vmatprep.subr.bf16.mxu1 %v12979_v0 }
  0x63   :  { %10613 = vmatmul.mubr.f32.vlgmr.msra.gmra.mrb[0].mxu0 %v13142_v21 }
  0x64   :  { %11835 = vmatpush3.bf16.msra.mxu0 %v13139_v18  ;;  %10619 = vmatprep.mubr.msk.f32.mxu0 %vm12980_vm0, %v12981_v1 }
  0x65   :  { %11853 = vmatpush3.bf16.msra.mxu1 %v13194_v58  ;;  %11836 = vmatprep.subr.bf16.mxu0 %v12979_v0 }
  0x66   :  { %11854 = vmatprep.subr.bf16.mxu1 %v12979_v0 }
  0x68   :  { %10656 = vmatmul.mubr.f32.vlgmr.msra.gmra.mrb[4].mxu1 %v13154_v28 }
  0x69   :  { %11856 = vmatpush3.bf16.msra.mxu1 %v13203_v59  ;;  %10666 = vmatprep.mubr.msk.f32.mxu1 %vm12980_vm0, %v12981_v1 }
  0x6a   :  { %11857 = vmatprep.subr.bf16.mxu1 %v12979_v0 }
  0x6b   :  { %10620 = vmatmul.mubr.f32.vlgmr.msra.gmra.mrb[0].mxu0 %v181_v27 }
  0x6c   :  { %11838 = vmatpush3.bf16.msra.mxu0 %v11837_v60  ;;  %10626 = vmatprep.mubr.msk.f32.mxu0 %vm12980_vm0, %v12981_v1 }
  0x6d   :  { %11859 = vmatpush3.bf16.msra.mxu1 %v13213_v61  ;;  %11839 = vmatprep.subr.bf16.mxu0 %v12979_v0 }
  0x6e   :  { %11866 = vmatprep.subr.bf16.mxu1 %v12979_v0 }
  0x70   :  { %10667 = vmatmul.mubr.f32.vlgmr.msra.gmra.mrb[6].mxu1 %v13165_v36 }
  0x71   :  { %11868 = vmatpush3.bf16.msra.mxu1 %v13219_v62  ;;  %10688 = vmatprep.mubr.msk.f32.mxu1 %vm12980_vm0, %v12981_v1 }
  0x72   :  { %11869 = vmatprep.subr.bf16.mxu1 %v12979_v0 }
  0x73   :  { %10627 = vmatmul.mubr.f32.vlgmr.msra.gmra.mrb[0].mxu0 %v13130_v11 }
  0x74   :  { %11841 = vmatpush3.bf16.msra.mxu0 %v13139_v18  ;;  %10633 = vmatprep.mubr.msk.f32.mxu0 %vm12980_vm0, %v12981_v1 }
  0x75   :  { %11860 = vmatprep.subr.bf16.mxu0 %v12979_v0  ;;  %11871 = vmatpush3.bf16.msra.mxu1 %v13230_v63 }
  0x76   :  { %11878 = vmatprep.subr.bf16.mxu1 %v12979_v0 }
  0x78   :  { %10689 = vmatmul.mubr.f32.vlgmr.msra.gmra.mrb[8].mxu1 %v13154_v28 }
  0x79   :  { %11880 = vmatpush3.bf16.msra.mxu1 %v13150_v26  ;;  %10710 = vmatprep.mubr.msk.f32.mxu1 %vm12980_vm0, %v12981_v1 }
  0x7a   :  { %11881 = vmatprep.subr.bf16.mxu1 %v12979_v0 }
  0x7b   :  { %10634 = vmatmul.mubr.f32.vlgmr.msra.gmra.mrb[0].mxu0 %v13130_v11 }
  0x7c   :  { %11862 = vmatpush3.bf16.msra.mxu0 %v13150_v26  ;;  %10677 = vmatprep.mubr.msk.f32.mxu0 %vm12980_vm0, %v12981_v1 }
  0x7d   :  { %11863 = vmatprep.subr.bf16.mxu0 %v12979_v0  ;;  %11883 = vmatpush3.bf16.msra.mxu1 %v13173_v48 }
  0x7e   :  { %11884 = vmatprep.subr.bf16.mxu1 %v12979_v0 }
  0x80   :  { %11865 = vmatpush3.bf16.msra.mxu0 %v13173_v48 }
  0x81   :  { %11872 = vmatprep.subr.bf16.mxu0 %v12979_v0 }
  0x83   :  { %10678 = vmatmul.mubr.f32.vlgmr.msra.gmra.mrb[2].mxu0 %v648_v44 }
  0x84   :  { %11874 = vmatpush3.bf16.msra.mxu0 %v13150_v26  ;;  %10699 = vmatprep.mubr.msk.f32.mxu0 %vm12980_vm0, %v12981_v1 }
  0x85   :  { %11875 = vmatprep.subr.bf16.mxu0 %v12979_v0 }
  0x88   :  { %11877 = vmatpush3.bf16.msra.mxu0 %v13173_v48 }
  0x89   :  { %11914 = vmatprep.subr.bf16.mxu0 %v12979_v0 }
  0x8b   :  { %10700 = vmatmul.mubr.f32.vlgmr.msra.gmra.mrb[4].mxu0 %v13154_v28 }
  0x8c   :  { %11916 = vmatpush3.bf16.msra.mxu0 %v13150_v26  ;;  %10776 = vmatprep.mubr.msk.f32.mxu0 %vm12980_vm0, %v12981_v1 }
  0x8d   :  { %11917 = vmatprep.subr.bf16.mxu0 %v12979_v0 }
  0x90   :  { %11919 = vmatpush3.bf16.msra.mxu0 %v13173_v48 }
  0x91   :  { %11920 = vmatprep.subr.bf16.mxu0 %v12979_v0 }
 0x12b   :  { %v185_v2 = vpop.f32.mrb[0].mxu1 }
 0x12c   :  { %v10600_v3 = vpop.f32.mrb[1].mxu1  ;;  %v186_v15 = vadd.f32 %v10016_v12, %v185_v2 }
 0x133   :  { %v652_v4 = vpop.f32.mrb[2].mxu1 }
 0x134   :  { %v10646_v5 = vpop.f32.mrb[3].mxu1 }
 0x13b   :  { %v743_v6 = vpop.f32.mrb[4].mxu1 }
 0x13c   :  { %v744_v7 = vadd.f32 %v743_v6, %v652_v4  ;;  %v10657_v8 = vpop.f32.mrb[5].mxu1 }
 0x143   :  { %v823_v9 = vpop.f32.mrb[6].mxu1 }
 0x144   :  { %v824_v10 = vadd.f32 %v823_v9, %v744_v7  ;;  %v10668_v11 = vpop.f32.mrb[7].mxu1 }
 0x14b   :  { %v983_v13 = vpop.f32.mrb[8].mxu1 }
 0x14c   :  { %v10690_v14 = vpop.f32.mrb[9].mxu1 }
 0x14e   :  { %v567_v16 = vpop.f32.mrb[0].mxu0 }
 0x14f   :  { %v13271_v17 = vadd.f32 %v567_v16, %v186_v15  ;;  %v10635_v18 = vpop.f32.mrb[1].mxu0 }
 0x156   :  { %v900_v19 = vpop.f32.mrb[2].mxu0 }
 0x157   :  { %v901_v20 = vadd.f32 %v900_v19, %v824_v10  ;;  %v10679_v21 = vpop.f32.mrb[3].mxu0 }
 0x159   :  { %v984_v22 = vadd.f32 %v983_v13, %v901_v20 }
 0x15e   :  { %v1058_v23 = vpop.f32.mrb[4].mxu0 }
 0x15f   :  { %v1059_v24 = vadd.f32 %v1058_v23, %v984_v22  ;;  %v10701_v25 = vpop.f32.mrb[5].mxu0 }
 0x161   :  { %v1062_v27 = vadd.f32 %v13271_v17, %v1059_v24 }
 0x163   :  { %12677 = vtanh.f32 %v1062_v27  ;;  %v10017_v30 = vmul.f32 -1.442695, %v1062_v27 }
 0x165   :  { %12679 = vpow2.f32 %v10017_v30 }
 0x16d   :  { %v12678_v28 = vpop.eup %12677 }
 0x16e   :  { %1076 = vrot.lane.b32.xlu0 %v12678_v28, %s12982_s26 }
 0x16f   :  { %v12680_v31 = vpop.eup %12679 }
 0x170   :  { %v1066_v32 = vadd.f32 1.0, %v12680_v31 }
 0x172   :  { %1071 = vrot.lane.b32.xlu0 %v572_v29, %s12983_s5  ;;  %12681 = vrcp.f32 %v1066_v32 }
 0x17c   :  { %v12682_v33 = vpop.eup %12681 }
 0x1e0   :  { %v1077_v34 = vpop.permute.xlu0 %1076 }
 0x1e1   :  { %v1079_v35 = vmul.f32 %v12682_v33, %v1077_v34 }
 0x1e3   :  { %1081 = vrot.lane.b32.xlu1 %v1079_v35, %s12983_s5 }
 0x1e4   :  { %v1072_v36 = vpop.permute.xlu0 %1071 }
 0x1e5   :  { %v1074_v37 = vmul.f32 %v12682_v33, %v1072_v36 }
 0x255   :  { %v1082_v38 = vpop.permute.xlu1 %1081 }
 0x256   :  { %v13277_v39 = vadd.f32 %v1082_v38, %v1074_v37 }
 0x258   :  { %12683 = vtanh.f32 %v13277_v39  ;;  %v1593_v6 = vrot.slane %v13277_v39, 7 }
 0x262   :  { %v12684_v40 = vpop.eup %12683 }
 0x263   :  { %1087 = vrot.lane.b32.xlu1 %v12684_v40, %s12982_s26 }
 0x2d5   :  { %v1088_v41 = vpop.permute.xlu1 %1087 }
 0x2d6   :  { %v13281_v42 = vmul.f32 %v12682_v33, %v1088_v41 }
 0x2d8   :  { %1092 = vrot.lane.b32.xlu0 %v13281_v42, %s12983_s5 }
 0x34a   :  { %v1093_v43 = vpop.permute.xlu0 %1092 }
 0x34b   :  { %v1094_v44 = vsel %vm573_vm2, %v1093_v43, 0 }
 0x34c   :  { %v1165_v45 = vand.u32 4294901760, %v1094_v44 }
 0x34e   :  { %v1166_v46 = vsub.f32 %v1094_v44, %v1165_v45 }
 0x350   :  { %v1167_v47 = vand.u32 4294901760, %v1166_v46 }
 0x352   :  { %v1168_v49 = vsub.f32 %v1166_v46, %v1167_v47 }
 0x354   :  { %v1169_v50 = vand.u32 4294901760, %v1168_v49 }
 0x356   :  { %10711 = vmatmul.mubr.f32.vlgmr.msra.gmra.mrb[10].mxu1 %v1169_v50 }
 0x357   :  { %11886 = vmatpush3.bf16.msra.mxu1 %v13187_v55  ;;  %10721 = vmatprep.mubr.msk.f32.mxu1 %vm12980_vm0, %v12981_v1 }
 0x358   :  { %11887 = vmatprep.subr.bf16.mxu1 %v12979_v0 }
 0x35b   :  { %11889 = vmatpush3.bf16.msra.mxu1 %v13194_v58 }
 0x35c   :  { %11890 = vmatprep.subr.bf16.mxu1 %v12979_v0 }
 0x35e   :  { %10722 = vmatmul.mubr.f32.vlgmr.msra.gmra.mrb[10].mxu1 %v1165_v45 }
 0x35f   :  { %11892 = vmatpush3.bf16.msra.mxu1 %v13203_v59  ;;  %10732 = vmatprep.mubr.msk.f32.mxu1 %vm12980_vm0, %v12981_v1 }
 0x360   :  { %11893 = vmatprep.subr.bf16.mxu1 %v12979_v0 }
 0x363   :  { %11895 = vmatpush3.bf16.msra.mxu1 %v13213_v61 }
 0x364   :  { %11896 = vmatprep.subr.bf16.mxu1 %v12979_v0 }
 0x366   :  { %10733 = vmatmul.mubr.f32.vlgmr.msra.gmra.mrb[10].mxu1 %v1166_v46 }
 0x367   :  { %11898 = vmatpush3.bf16.msra.mxu1 %v13150_v26  ;;  %10743 = vmatprep.mubr.msk.f32.mxu1 %vm12980_vm0, %v12981_v1 }
 0x368   :  { %11899 = vmatprep.subr.bf16.mxu1 %v12979_v0 }
 0x36b   :  { %11901 = vmatpush3.bf16.msra.mxu1 %v13173_v48 }
 0x36c   :  { %11902 = vmatprep.subr.bf16.mxu1 %v12979_v0 }
 0x36e   :  { %10744 = vmatmul.mubr.f32.vlgmr.msra.gmra.mrb[10].mxu1 %v1167_v47 }
 0x36f   :  { %11904 = vmatpush3.bf16.msra.mxu1 %v13219_v62  ;;  %10754 = vmatprep.mubr.msk.f32.mxu1 %vm12980_vm0, %v12981_v1 }
 0x370   :  { %11905 = vmatprep.subr.bf16.mxu1 %v12979_v0 }
 0x373   :  { %11907 = vmatpush3.bf16.msra.mxu1 %v13230_v63 }
 0x374   :  { %11908 = vmatprep.subr.bf16.mxu1 %v12979_v0 }
 0x376   :  { %10755 = vmatmul.mubr.f32.vlgmr.msra.gmra.mrb[10].mxu1 %v1165_v45 }
 0x377   :  { %11910 = vmatpush3.bf16.msra.mxu1 %v13150_v26  ;;  %10765 = vmatprep.mubr.msk.f32.mxu1 %vm12980_vm0, %v12981_v1 }
 0x378   :  { %11911 = vmatprep.subr.bf16.mxu1 %v12979_v0 }
 0x37b   :  { %11913 = vmatpush3.bf16.msra.mxu1 %v13173_v48 }
 0x37c   :  { %11950 = vmatprep.subr.bf16.mxu1 %v12979_v0 }
 0x37e   :  { %10766 = vmatmul.mubr.f32.vlgmr.msra.gmra.mrb[10].mxu1 %v1165_v45 }
 0x37f   :  { %11952 = vmatpush3.bf16.msra.mxu1 %v13150_v26  ;;  %10842 = vmatprep.mubr.msk.f32.mxu1 %vm12980_vm0, %v12981_v1 }
 0x380   :  { %11953 = vmatprep.subr.bf16.mxu1 %v12979_v0 }
 0x383   :  { %11955 = vmatpush3.bf16.msra.mxu1 %v13173_v48 }
 0x384   :  { %11956 = vmatprep.subr.bf16.mxu1 %v12979_v0 }
 0x451   :  { %v1577_v51 = vpop.f32.mrb[10].mxu1 }
 0x452   :  { %v1582_v52 = vrot.slane %v1577_v51, 7  ;;  %v10767_v53 = vpop.f32.mrb[11].mxu1 }
 0x454   :  { %v1584_v54 = vadd.f32 %v13271_v17, %v1582_v52 }
 0x456   :  { %12685 = vtanh.f32 %v1584_v54  ;;  %v10018_v57 = vmul.f32 -1.442695, %v1584_v54 }
 0x458   :  { %12687 = vpow2.f32 %v10018_v57 }
 0x460   :  { %v12686_v56 = vpop.eup %12685 }
 0x461   :  { %1597 = vrot.lane.b32.xlu1 %v12686_v56, %s12982_s26 }
 0x462   :  { %v12688_v60 = vpop.eup %12687 }
 0x463   :  { %v1588_v2 = vadd.f32 1.0, %v12688_v60 }
 0x465   :  { %12689 = vrcp.f32 %v1588_v2 }
 0x46f   :  { %v12690_v3 = vpop.eup %12689 }
 0x470   :  { %v1595_v7 = vmul.f32 %v12690_v3, %v1593_v6 }
 0x4d3   :  { %v1598_v4 = vpop.permute.xlu1 %1597 }
 0x4d4   :  { %v1600_v5 = vmul.f32 %v12690_v3, %v1598_v4 }
 0x4d6   :  { %1602 = vrot.lane.b32.xlu0 %v1600_v5, %s12983_s5 }
 0x548   :  { %v1603_v8 = vpop.permute.xlu0 %1602 }
 0x549   :  { %v13326_v9 = vadd.f32 %v1603_v8, %v1595_v7 }
 0x54b   :  { %12691 = vtanh.f32 %v13326_v9  ;;  %v2115_v34 = vrot.slane %v13326_v9, 7 }
 0x555   :  { %v12692_v10 = vpop.eup %12691 }
 0x556   :  { %1608 = vrot.lane.b32.xlu1 %v12692_v10, %s12982_s26 }
 0x5c8   :  { %v1609_v11 = vpop.permute.xlu1 %1608 }
 0x5c9   :  { %v13330_v12 = vmul.f32 %v12690_v3, %v1609_v11 }
 0x5cb   :  { %v1613_v13 = vrot.slane %v13330_v12, 1  ;;  %v4745_v41 = vsel %vm4744_vm3, %v13281_v42, %v13330_v12 }
 0x5cd   :  { %1614 = vrot.lane.b32.xlu0 %v1613_v13, %s12983_s5 }
 0x63f   :  { %v1615_v14 = vpop.permute.xlu0 %1614 }
 0x640   :  { %v1616_v15 = vsel %vm573_vm2, %v1615_v14, 0 }
 0x641   :  { %v1687_v16 = vand.u32 4294901760, %v1616_v15 }
 0x643   :  { %v1688_v18 = vsub.f32 %v1616_v15, %v1687_v16 }
 0x645   :  { %v1689_v19 = vand.u32 4294901760, %v1688_v18 }
 0x647   :  { %v1690_v20 = vsub.f32 %v1688_v18, %v1689_v19 }
 0x649   :  { %v1691_v21 = vand.u32 4294901760, %v1690_v20 }
 0x64b   :  { %10777 = vmatmul.mubr.f32.vlgmr.msra.gmra.mrb[6].mxu0 %v1691_v21 }
 0x64c   :  { %11922 = vmatpush3.bf16.msra.mxu0 %v13187_v55  ;;  %10787 = vmatprep.mubr.msk.f32.mxu0 %vm12980_vm0, %v12981_v1 }
 0x64d   :  { %11923 = vmatprep.subr.bf16.mxu0 %v12979_v0 }
 0x650   :  { %11925 = vmatpush3.bf16.msra.mxu0 %v13194_v58 }
 0x651   :  { %11926 = vmatprep.subr.bf16.mxu0 %v12979_v0 }
 0x653   :  { %10788 = vmatmul.mubr.f32.vlgmr.msra.gmra.mrb[6].mxu0 %v1687_v16 }
 0x654   :  { %11928 = vmatpush3.bf16.msra.mxu0 %v13203_v59  ;;  %10798 = vmatprep.mubr.msk.f32.mxu0 %vm12980_vm0, %v12981_v1 }
 0x655   :  { %11929 = vmatprep.subr.bf16.mxu0 %v12979_v0 }
 0x658   :  { %11931 = vmatpush3.bf16.msra.mxu0 %v13213_v61 }
 0x659   :  { %11932 = vmatprep.subr.bf16.mxu0 %v12979_v0 }
 0x65b   :  { %10799 = vmatmul.mubr.f32.vlgmr.msra.gmra.mrb[6].mxu0 %v1688_v18 }
 0x65c   :  { %11934 = vmatpush3.bf16.msra.mxu0 %v13150_v26  ;;  %10809 = vmatprep.mubr.msk.f32.mxu0 %vm12980_vm0, %v12981_v1 }
 0x65d   :  { %11935 = vmatprep.subr.bf16.mxu0 %v12979_v0 }
 0x660   :  { %11937 = vmatpush3.bf16.msra.mxu0 %v13173_v48 }
 0x661   :  { %11938 = vmatprep.subr.bf16.mxu0 %v12979_v0 }
 0x663   :  { %10810 = vmatmul.mubr.f32.vlgmr.msra.gmra.mrb[6].mxu0 %v1689_v19 }
 0x664   :  { %11940 = vmatpush3.bf16.msra.mxu0 %v13219_v62  ;;  %10820 = vmatprep.mubr.msk.f32.mxu0 %vm12980_vm0, %v12981_v1 }
 0x665   :  { %11941 = vmatprep.subr.bf16.mxu0 %v12979_v0 }
 0x668   :  { %11943 = vmatpush3.bf16.msra.mxu0 %v13230_v63 }
 0x669   :  { %11944 = vmatprep.subr.bf16.mxu0 %v12979_v0 }
 0x66b   :  { %10821 = vmatmul.mubr.f32.vlgmr.msra.gmra.mrb[6].mxu0 %v1687_v16 }
 0x66c   :  { %11946 = vmatpush3.bf16.msra.mxu0 %v13150_v26  ;;  %10831 = vmatprep.mubr.msk.f32.mxu0 %vm12980_vm0, %v12981_v1 }
 0x66d   :  { %11947 = vmatprep.subr.bf16.mxu0 %v12979_v0 }
 0x670   :  { %11949 = vmatpush3.bf16.msra.mxu0 %v13173_v48 }
 0x671   :  { %11986 = vmatprep.subr.bf16.mxu0 %v12979_v0 }
 0x673   :  { %10832 = vmatmul.mubr.f32.vlgmr.msra.gmra.mrb[6].mxu0 %v1687_v16 }
 0x674   :  { %11988 = vmatpush3.bf16.msra.mxu0 %v13150_v26  ;;  %10908 = vmatprep.mubr.msk.f32.mxu0 %vm12980_vm0, %v12981_v1 }
 0x675   :  { %11989 = vmatprep.subr.bf16.mxu0 %v12979_v0 }
 0x678   :  { %11991 = vmatpush3.bf16.msra.mxu0 %v13173_v48 }
 0x679   :  { %11992 = vmatprep.subr.bf16.mxu0 %v12979_v0 }
 0x746   :  { %v2099_v22 = vpop.f32.mrb[6].mxu0 }
 0x747   :  { %v2104_v23 = vrot.slane %v2099_v22, 6  ;;  %v10833_v24 = vpop.f32.mrb[7].mxu0 }
 0x749   :  { %v2106_v25 = vadd.f32 %v13271_v17, %v2104_v23 }
 0x74b   :  { %12693 = vtanh.f32 %v2106_v25  ;;  %v10019_v28 = vmul.f32 -1.442695, %v2106_v25 }
 0x74d   :  { %12695 = vpow2.f32 %v10019_v28 }
 0x755   :  { %v12694_v27 = vpop.eup %12693 }
 0x756   :  { %2119 = vrot.lane.b32.xlu1 %v12694_v27, %s12982_s26 }
 0x757   :  { %v12696_v29 = vpop.eup %12695 }
 0x758   :  { %v2110_v30 = vadd.f32 1.0, %v12696_v29 }
 0x75a   :  { %12697 = vrcp.f32 %v2110_v30 }
 0x764   :  { %v12698_v31 = vpop.eup %12697 }
 0x765   :  { %v2117_v35 = vmul.f32 %v12698_v31, %v2115_v34 }
 0x7c8   :  { %v2120_v32 = vpop.permute.xlu1 %2119 }
 0x7c9   :  { %v2122_v33 = vmul.f32 %v12698_v31, %v2120_v32 }
 0x7cb   :  { %2124 = vrot.lane.b32.xlu0 %v2122_v33, %s12983_s5 }
 0x83d   :  { %v2125_v36 = vpop.permute.xlu0 %2124 }
 0x83e   :  { %v13375_v37 = vadd.f32 %v2125_v36, %v2117_v35 }
 0x840   :  { %12699 = vtanh.f32 %v13375_v37  ;;  %v2637_v7 = vrot.slane %v13375_v37, 7 }
 0x84a   :  { %v12700_v38 = vpop.eup %12699 }
 0x84b   :  { %2130 = vrot.lane.b32.xlu1 %v12700_v38, %s12982_s26 }
 0x8bd   :  { %v2131_v39 = vpop.permute.xlu1 %2130 }
 0x8be   :  { %v2133_v40 = vmul.f32 %v12698_v31, %v2131_v39 }
 0x8c0   :  { %v2135_v43 = vrot.slane %v2133_v40, 2  ;;  %v13383_v44 = vsel %vm4746_vm4, %v4745_v41, %v2133_v40 }
 0x8c2   :  { %2136 = vrot.lane.b32.xlu0 %v2135_v43, %s12983_s5 }
 0x934   :  { %v2137_v45 = vpop.permute.xlu0 %2136 }
 0x935   :  { %v2138_v46 = vsel %vm573_vm2, %v2137_v45, 0 }
 0x936   :  { %v2209_v47 = vand.u32 4294901760, %v2138_v46 }
 0x938   :  { %v2210_v49 = vsub.f32 %v2138_v46, %v2209_v47 }
 0x93a   :  { %v2211_v50 = vand.u32 4294901760, %v2210_v49 }
 0x93c   :  { %v2212_v51 = vsub.f32 %v2210_v49, %v2211_v50 }
 0x93e   :  { %v2213_v52 = vand.u32 4294901760, %v2212_v51 }
 0x940   :  { %10843 = vmatmul.mubr.f32.vlgmr.msra.gmra.mrb[12].mxu1 %v2213_v52 }
 0x941   :  { %11958 = vmatpush3.bf16.msra.mxu1 %v13187_v55  ;;  %10853 = vmatprep.mubr.msk.f32.mxu1 %vm12980_vm0, %v12981_v1 }
 0x942   :  { %11959 = vmatprep.subr.bf16.mxu1 %v12979_v0 }
 0x945   :  { %11961 = vmatpush3.bf16.msra.mxu1 %v13194_v58 }
 0x946   :  { %11962 = vmatprep.subr.bf16.mxu1 %v12979_v0 }
 0x948   :  { %10854 = vmatmul.mubr.f32.vlgmr.msra.gmra.mrb[12].mxu1 %v2209_v47 }
 0x949   :  { %11964 = vmatpush3.bf16.msra.mxu1 %v13203_v59  ;;  %10864 = vmatprep.mubr.msk.f32.mxu1 %vm12980_vm0, %v12981_v1 }
 0x94a   :  { %11965 = vmatprep.subr.bf16.mxu1 %v12979_v0 }
 0x94d   :  { %11967 = vmatpush3.bf16.msra.mxu1 %v13213_v61 }
 0x94e   :  { %11968 = vmatprep.subr.bf16.mxu1 %v12979_v0 }
 0x950   :  { %10865 = vmatmul.mubr.f32.vlgmr.msra.gmra.mrb[12].mxu1 %v2210_v49 }
 0x951   :  { %11970 = vmatpush3.bf16.msra.mxu1 %v13150_v26  ;;  %10875 = vmatprep.mubr.msk.f32.mxu1 %vm12980_vm0, %v12981_v1 }
 0x952   :  { %11971 = vmatprep.subr.bf16.mxu1 %v12979_v0 }
 0x955   :  { %11973 = vmatpush3.bf16.msra.mxu1 %v13173_v48 }
 0x956   :  { %11974 = vmatprep.subr.bf16.mxu1 %v12979_v0 }
 0x958   :  { %10876 = vmatmul.mubr.f32.vlgmr.msra.gmra.mrb[12].mxu1 %v2211_v50 }
 0x959   :  { %11976 = vmatpush3.bf16.msra.mxu1 %v13219_v62  ;;  %10886 = vmatprep.mubr.msk.f32.mxu1 %vm12980_vm0, %v12981_v1 }
 0x95a   :  { %11977 = vmatprep.subr.bf16.mxu1 %v12979_v0 }
 0x95d   :  { %11979 = vmatpush3.bf16.msra.mxu1 %v13230_v63 }
 0x95e   :  { %11980 = vmatprep.subr.bf16.mxu1 %v12979_v0 }
 0x960   :  { %10887 = vmatmul.mubr.f32.vlgmr.msra.gmra.mrb[12].mxu1 %v2209_v47 }
 0x961   :  { %11982 = vmatpush3.bf16.msra.mxu1 %v13150_v26  ;;  %10897 = vmatprep.mubr.msk.f32.mxu1 %vm12980_vm0, %v12981_v1 }
 0x962   :  { %11983 = vmatprep.subr.bf16.mxu1 %v12979_v0 }
 0x965   :  { %11985 = vmatpush3.bf16.msra.mxu1 %v13173_v48 }
 0x966   :  { %12022 = vmatprep.subr.bf16.mxu1 %v12979_v0 }
 0x968   :  { %10898 = vmatmul.mubr.f32.vlgmr.msra.gmra.mrb[12].mxu1 %v2209_v47 }
 0x969   :  { %12024 = vmatpush3.bf16.msra.mxu1 %v13150_v26  ;;  %10974 = vmatprep.mubr.msk.f32.mxu1 %vm12980_vm0, %v12981_v1 }
 0x96a   :  { %12025 = vmatprep.subr.bf16.mxu1 %v12979_v0 }
 0x96d   :  { %12027 = vmatpush3.bf16.msra.mxu1 %v13173_v48 }
 0x96e   :  { %12028 = vmatprep.subr.bf16.mxu1 %v12979_v0 }
 0xa3b   :  { %v2621_v42 = vpop.f32.mrb[12].mxu1 }
 0xa3c   :  { %v2626_v53 = vrot.slane %v2621_v42, 5  ;;  %v10899_v54 = vpop.f32.mrb[13].mxu1 }
 0xa3e   :  { %v2628_v56 = vadd.f32 %v13271_v17, %v2626_v53 }
 0xa40   :  { %12701 = vtanh.f32 %v2628_v56  ;;  %v10020_v60 = vmul.f32 -1.442695, %v2628_v56 }
 0xa42   :  { %12703 = vpow2.f32 %v10020_v60 }
 0xa4a   :  { %v12702_v57 = vpop.eup %12701 }
 0xa4b   :  { %2641 = vrot.lane.b32.xlu1 %v12702_v57, %s12982_s26 }
 0xa4c   :  { %v12704_v2 = vpop.eup %12703 }
 0xa4d   :  { %v2632_v3 = vadd.f32 1.0, %v12704_v2 }
 0xa4f   :  { %12705 = vrcp.f32 %v2632_v3 }
 0xa59   :  { %v12706_v4 = vpop.eup %12705 }
 0xa5a   :  { %v2639_v8 = vmul.f32 %v12706_v4, %v2637_v7 }
 0xabd   :  { %v2642_v5 = vpop.permute.xlu1 %2641 }
 0xabe   :  { %v2644_v6 = vmul.f32 %v12706_v4, %v2642_v5 }
 0xac0   :  { %2646 = vrot.lane.b32.xlu0 %v2644_v6, %s12983_s5 }
 0xb32   :  { %v2647_v9 = vpop.permute.xlu0 %2646 }
 0xb33   :  { %v13427_v10 = vadd.f32 %v2647_v9, %v2639_v8 }
 0xb35   :  { %12707 = vtanh.f32 %v13427_v10  ;;  %v3159_v36 = vrot.slane %v13427_v10, 7 }
 0xb3f   :  { %v12708_v11 = vpop.eup %12707 }
 0xb40   :  { %2652 = vrot.lane.b32.xlu1 %v12708_v11, %s12982_s26 }
 0xbb2   :  { %v2653_v12 = vpop.permute.xlu1 %2652 }
 0xbb3   :  { %v2655_v13 = vmul.f32 %v12706_v4, %v2653_v12 }
 0xbb5   :  { %v2657_v14 = vrot.slane %v2655_v13, 3  ;;  %v13433_v15 = vsel %vm4748_vm5, %v13383_v44, %v2655_v13 }
 0xbb7   :  { %2658 = vrot.lane.b32.xlu0 %v2657_v14, %s12983_s5 }
 0xc29   :  { %v2659_v16 = vpop.permute.xlu0 %2658 }
 0xc2a   :  { %v2660_v18 = vsel %vm573_vm2, %v2659_v16, 0 }
 0xc2b   :  { %v2731_v19 = vand.u32 4294901760, %v2660_v18 }
 0xc2d   :  { %v2732_v20 = vsub.f32 %v2660_v18, %v2731_v19 }
 0xc2f   :  { %v2733_v21 = vand.u32 4294901760, %v2732_v20 }
 0xc31   :  { %v2734_v22 = vsub.f32 %v2732_v20, %v2733_v21 }
 0xc33   :  { %v2735_v23 = vand.u32 4294901760, %v2734_v22 }
 0xc35   :  { %10909 = vmatmul.mubr.f32.vlgmr.msra.gmra.mrb[8].mxu0 %v2735_v23 }
 0xc36   :  { %11994 = vmatpush3.bf16.msra.mxu0 %v13187_v55  ;;  %10919 = vmatprep.mubr.msk.f32.mxu0 %vm12980_vm0, %v12981_v1 }
 0xc37   :  { %11995 = vmatprep.subr.bf16.mxu0 %v12979_v0 }
 0xc3a   :  { %11997 = vmatpush3.bf16.msra.mxu0 %v13194_v58 }
 0xc3b   :  { %11998 = vmatprep.subr.bf16.mxu0 %v12979_v0 }
 0xc3d   :  { %10920 = vmatmul.mubr.f32.vlgmr.msra.gmra.mrb[8].mxu0 %v2731_v19 }
 0xc3e   :  { %12000 = vmatpush3.bf16.msra.mxu0 %v13203_v59  ;;  %10930 = vmatprep.mubr.msk.f32.mxu0 %vm12980_vm0, %v12981_v1 }
 0xc3f   :  { %12001 = vmatprep.subr.bf16.mxu0 %v12979_v0 }
 0xc42   :  { %12003 = vmatpush3.bf16.msra.mxu0 %v13213_v61 }
 0xc43   :  { %12004 = vmatprep.subr.bf16.mxu0 %v12979_v0 }
 0xc45   :  { %10931 = vmatmul.mubr.f32.vlgmr.msra.gmra.mrb[8].mxu0 %v2732_v20 }
 0xc46   :  { %12006 = vmatpush3.bf16.msra.mxu0 %v13150_v26  ;;  %10941 = vmatprep.mubr.msk.f32.mxu0 %vm12980_vm0, %v12981_v1 }
 0xc47   :  { %12007 = vmatprep.subr.bf16.mxu0 %v12979_v0 }
 0xc4a   :  { %12009 = vmatpush3.bf16.msra.mxu0 %v13173_v48 }
 0xc4b   :  { %12010 = vmatprep.subr.bf16.mxu0 %v12979_v0 }
 0xc4d   :  { %10942 = vmatmul.mubr.f32.vlgmr.msra.gmra.mrb[8].mxu0 %v2733_v21 }
 0xc4e   :  { %12012 = vmatpush3.bf16.msra.mxu0 %v13219_v62  ;;  %10952 = vmatprep.mubr.msk.f32.mxu0 %vm12980_vm0, %v12981_v1 }
 0xc4f   :  { %12013 = vmatprep.subr.bf16.mxu0 %v12979_v0 }
 0xc52   :  { %12015 = vmatpush3.bf16.msra.mxu0 %v13230_v63 }
 0xc53   :  { %12016 = vmatprep.subr.bf16.mxu0 %v12979_v0 }
 0xc55   :  { %10953 = vmatmul.mubr.f32.vlgmr.msra.gmra.mrb[8].mxu0 %v2731_v19 }
 0xc56   :  { %12018 = vmatpush3.bf16.msra.mxu0 %v13150_v26  ;;  %10963 = vmatprep.mubr.msk.f32.mxu0 %vm12980_vm0, %v12981_v1 }
 0xc57   :  { %12019 = vmatprep.subr.bf16.mxu0 %v12979_v0 }
 0xc5a   :  { %12021 = vmatpush3.bf16.msra.mxu0 %v13173_v48 }
 0xc5b   :  { %12058 = vmatprep.subr.bf16.mxu0 %v12979_v0 }
 0xc5d   :  { %10964 = vmatmul.mubr.f32.vlgmr.msra.gmra.mrb[8].mxu0 %v2731_v19 }
 0xc5e   :  { %12060 = vmatpush3.bf16.msra.mxu0 %v13150_v26  ;;  %11040 = vmatprep.mubr.msk.f32.mxu0 %vm12980_vm0, %v12981_v1 }
 0xc5f   :  { %12061 = vmatprep.subr.bf16.mxu0 %v12979_v0 }
 0xc62   :  { %12063 = vmatpush3.bf16.msra.mxu0 %v13173_v48 }
 0xc63   :  { %12064 = vmatprep.subr.bf16.mxu0 %v12979_v0 }
 0xd30   :  { %v3143_v24 = vpop.f32.mrb[8].mxu0 }
 0xd31   :  { %v3148_v25 = vrot.slane %v3143_v24, 4  ;;  %v10965_v27 = vpop.f32.mrb[9].mxu0 }
 0xd33   :  { %v3150_v28 = vadd.f32 %v13271_v17, %v3148_v25 }
 0xd35   :  { %12709 = vtanh.f32 %v3150_v28  ;;  %v10021_v30 = vmul.f32 -1.442695, %v3150_v28 }
 0xd37   :  { %12711 = vpow2.f32 %v10021_v30 }
 0xd3f   :  { %v12710_v29 = vpop.eup %12709 }
 0xd40   :  { %3163 = vrot.lane.b32.xlu1 %v12710_v29, %s12982_s26 }
 0xd41   :  { %v12712_v31 = vpop.eup %12711 }
 0xd42   :  { %v3154_v32 = vadd.f32 1.0, %v12712_v31 }
 0xd44   :  { %12713 = vrcp.f32 %v3154_v32 }
 0xd4e   :  { %v12714_v33 = vpop.eup %12713 }
 0xd4f   :  { %v3161_v37 = vmul.f32 %v12714_v33, %v3159_v36 }
 0xdb2   :  { %v3164_v34 = vpop.permute.xlu1 %3163 }
 0xdb3   :  { %v3166_v35 = vmul.f32 %v12714_v33, %v3164_v34 }
 0xdb5   :  { %3168 = vrot.lane.b32.xlu0 %v3166_v35, %s12983_s5 }
 0xe27   :  { %v3169_v38 = vpop.permute.xlu0 %3168 }
 0xe28   :  { %v13477_v39 = vadd.f32 %v3169_v38, %v3161_v37 }
 0xe2a   :  { %12715 = vtanh.f32 %v13477_v39  ;;  %v3681_v8 = vrot.slane %v13477_v39, 7 }
 0xe34   :  { %v12716_v40 = vpop.eup %12715 }
 0xe35   :  { %3174 = vrot.lane.b32.xlu1 %v12716_v40, %s12982_s26 }
 0xea7   :  { %v3175_v41 = vpop.permute.xlu1 %3174 }
 0xea8   :  { %v3177_v43 = vmul.f32 %v12714_v33, %v3175_v41 }
 0xeaa   :  { %v3179_v44 = vrot.slane %v3177_v43, 4  ;;  %v13483_v45 = vsel %vm4750_vm6, %v13433_v15, %v3177_v43 }
 0xeac   :  { %3180 = vrot.lane.b32.xlu0 %v3179_v44, %s12983_s5 }
 0xf1e   :  { %v3181_v46 = vpop.permute.xlu0 %3180 }
 0xf1f   :  { %v3182_v47 = vsel %vm573_vm2, %v3181_v46, 0 }
 0xf20   :  { %v3253_v49 = vand.u32 4294901760, %v3182_v47 }
 0xf22   :  { %v3254_v50 = vsub.f32 %v3182_v47, %v3253_v49 }
 0xf24   :  { %v3255_v51 = vand.u32 4294901760, %v3254_v50 }
 0xf26   :  { %v3256_v52 = vsub.f32 %v3254_v50, %v3255_v51 }
 0xf28   :  { %v3257_v42 = vand.u32 4294901760, %v3256_v52 }
 0xf2a   :  { %10975 = vmatmul.mubr.f32.vlgmr.msra.gmra.mrb[14].mxu1 %v3257_v42 }
 0xf2b   :  { %12030 = vmatpush3.bf16.msra.mxu1 %v13187_v55  ;;  %10985 = vmatprep.mubr.msk.f32.mxu1 %vm12980_vm0, %v12981_v1 }
 0xf2c   :  { %12031 = vmatprep.subr.bf16.mxu1 %v12979_v0 }
 0xf2f   :  { %12033 = vmatpush3.bf16.msra.mxu1 %v13194_v58 }
 0xf30   :  { %12034 = vmatprep.subr.bf16.mxu1 %v12979_v0 }
 0xf32   :  { %10986 = vmatmul.mubr.f32.vlgmr.msra.gmra.mrb[14].mxu1 %v3253_v49 }
 0xf33   :  { %12036 = vmatpush3.bf16.msra.mxu1 %v13203_v59  ;;  %10996 = vmatprep.mubr.msk.f32.mxu1 %vm12980_vm0, %v12981_v1 }
 0xf34   :  { %12037 = vmatprep.subr.bf16.mxu1 %v12979_v0 }
 0xf37   :  { %12039 = vmatpush3.bf16.msra.mxu1 %v13213_v61 }
 0xf38   :  { %12040 = vmatprep.subr.bf16.mxu1 %v12979_v0 }
 0xf3a   :  { %10997 = vmatmul.mubr.f32.vlgmr.msra.gmra.mrb[14].mxu1 %v3254_v50 }
 0xf3b   :  { %12042 = vmatpush3.bf16.msra.mxu1 %v13150_v26  ;;  %11007 = vmatprep.mubr.msk.f32.mxu1 %vm12980_vm0, %v12981_v1 }
 0xf3c   :  { %12043 = vmatprep.subr.bf16.mxu1 %v12979_v0 }
 0xf3f   :  { %12045 = vmatpush3.bf16.msra.mxu1 %v13173_v48 }
 0xf40   :  { %12046 = vmatprep.subr.bf16.mxu1 %v12979_v0 }
 0xf42   :  { %11008 = vmatmul.mubr.f32.vlgmr.msra.gmra.mrb[14].mxu1 %v3255_v51 }
 0xf43   :  { %12048 = vmatpush3.bf16.msra.mxu1 %v13219_v62  ;;  %11018 = vmatprep.mubr.msk.f32.mxu1 %vm12980_vm0, %v12981_v1 }
 0xf44   :  { %12049 = vmatprep.subr.bf16.mxu1 %v12979_v0 }
 0xf47   :  { %12051 = vmatpush3.bf16.msra.mxu1 %v13230_v63 }
 0xf48   :  { %12052 = vmatprep.subr.bf16.mxu1 %v12979_v0 }
 0xf4a   :  { %11019 = vmatmul.mubr.f32.vlgmr.msra.gmra.mrb[14].mxu1 %v3253_v49 }
 0xf4b   :  { %12054 = vmatpush3.bf16.msra.mxu1 %v13150_v26  ;;  %11029 = vmatprep.mubr.msk.f32.mxu1 %vm12980_vm0, %v12981_v1 }
 0xf4c   :  { %12055 = vmatprep.subr.bf16.mxu1 %v12979_v0 }
 0xf4f   :  { %12057 = vmatpush3.bf16.msra.mxu1 %v13173_v48 }
 0xf50   :  { %12094 = vmatprep.subr.bf16.mxu1 %v12979_v0 }
 0xf52   :  { %11030 = vmatmul.mubr.f32.vlgmr.msra.gmra.mrb[14].mxu1 %v3253_v49 }
 0xf53   :  { %12096 = vmatpush3.bf16.msra.mxu1 %v13150_v26  ;;  %11106 = vmatprep.mubr.msk.f32.mxu1 %vm12980_vm0, %v12981_v1 }
 0xf54   :  { %12097 = vmatprep.subr.bf16.mxu1 %v12979_v0 }
 0xf57   :  { %12099 = vmatpush3.bf16.msra.mxu1 %v13173_v48 }
 0xf58   :  { %12100 = vmatprep.subr.bf16.mxu1 %v12979_v0 }
0x1025   :  { %v3665_v53 = vpop.f32.mrb[14].mxu1 }
0x1026   :  { %v3670_v54 = vrot.slane %v3665_v53, 3  ;;  %v11031_v56 = vpop.f32.mrb[15].mxu1 }
0x1028   :  { %v3672_v57 = vadd.f32 %v13271_v17, %v3670_v54 }
0x102a   :  { %12717 = vtanh.f32 %v3672_v57  ;;  %v10022_v2 = vmul.f32 -1.442695, %v3672_v57 }
0x102c   :  { %12719 = vpow2.f32 %v10022_v2 }
0x1034   :  { %v12718_v60 = vpop.eup %12717 }
0x1035   :  { %3685 = vrot.lane.b32.xlu1 %v12718_v60, %s12982_s26 }
0x1036   :  { %v12720_v3 = vpop.eup %12719 }
0x1037   :  { %v3676_v4 = vadd.f32 1.0, %v12720_v3 }
0x1039   :  { %12721 = vrcp.f32 %v3676_v4 }
0x1043   :  { %v12722_v5 = vpop.eup %12721 }
0x1044   :  { %v3683_v9 = vmul.f32 %v12722_v5, %v3681_v8 }
0x10a7   :  { %v3686_v6 = vpop.permute.xlu1 %3685 }
0x10a8   :  { %v3688_v7 = vmul.f32 %v12722_v5, %v3686_v6  ;;  %v4770_v6 = vld [vmem:[#allocation7 + $0x8] sm:$0xff] }
0x10a9   :  { %v4793_v8 = vand.u32 4294901760, %v4770_v6 }
0x10aa   :  { %3690 = vrot.lane.b32.xlu0 %v3688_v7, %s12983_s5 }
0x111c   :  { %v3691_v10 = vpop.permute.xlu0 %3690 }
0x111d   :  { %v13527_v11 = vadd.f32 %v3691_v10, %v3683_v9 }
0x111f   :  { %12723 = vtanh.f32 %v13527_v11  ;;  %v4203_v37 = vrot.slane %v13527_v11, 7  ;;  %v13627_v11 = vsub.f32 %v4770_v6, %v4793_v8 }
0x1129   :  { %v12724_v12 = vpop.eup %12723 }
0x112a   :  { %3696 = vrot.lane.b32.xlu1 %v12724_v12, %s12982_s26  ;;  %v4771_v12 = vld [vmem:[#allocation7 + $0x10] sm:$0xff] }
0x119c   :  { %v3697_v13 = vpop.permute.xlu1 %3696 }
0x119d   :  { %v3699_v14 = vmul.f32 %v12722_v5, %v3697_v13  ;;  %v4769_v5 = vld [vmem:[#allocation7] sm:$0xff]  ;;  %v4772_v13 = vld [vmem:[#allocation7 + $0x18] sm:$0xff] }
0x119e   :  { %v4790_v7 = vand.u32 4294901760, %v4769_v5 }
0x119f   :  { %v3701_v15 = vrot.slane %v3699_v14, 5  ;;  %v13533_v16 = vsel %vm4752_vm7, %v13483_v45, %v3699_v14  ;;  %v4796_v14 = vand.u32 4294901760, %v4771_v12 }
0x11a0   :  { %v13623_v9 = vpack.c.bf16 %v4793_v8, %v4790_v7  ;;  %v13625_v10 = vsub.f32 %v4769_v5, %v4790_v7 }
0x11a1   :  { %3702 = vrot.lane.b32.xlu0 %v3701_v15, %s12983_s5  ;;  %v4799_v15 = vand.u32 4294901760, %v4772_v13 }
0x1213   :  { %v3703_v18 = vpop.permute.xlu0 %3702 }
0x1214   :  { %v3704_v19 = vsel %vm573_vm2, %v3703_v18, 0  ;;  %v4878_v18 = vand.u32 4294901760, %v13627_v11 }
0x1215   :  { %v3775_v20 = vand.u32 4294901760, %v3704_v19 }
0x1217   :  { %v3776_v21 = vsub.f32 %v3704_v19, %v3775_v20  ;;  %v13633_v19 = vpack.c.bf16 %v4799_v15, %v4796_v14 }
0x1219   :  { %v3777_v22 = vand.u32 4294901760, %v3776_v21 }
0x121b   :  { %v3778_v23 = vsub.f32 %v3776_v21, %v3777_v22 }
0x121d   :  { %v3779_v24 = vand.u32 4294901760, %v3778_v23  ;;  %v4879_v23 = vsub.f32 %v13627_v11, %v4878_v18 }
0x121f   :  { %11041 = vmatmul.mubr.f32.vlgmr.msra.gmra.mrb[10].mxu0 %v3779_v24 }
0x1220   :  { %12066 = vmatpush3.bf16.msra.mxu0 %v13187_v55  ;;  %11051 = vmatprep.mubr.msk.f32.mxu0 %vm12980_vm0, %v12981_v1 }
0x1221   :  { %12067 = vmatprep.subr.bf16.mxu0 %v12979_v0 }
0x1224   :  { %12069 = vmatpush3.bf16.msra.mxu0 %v13194_v58 }
0x1225   :  { %12070 = vmatprep.subr.bf16.mxu0 %v12979_v0 }
0x1227   :  { %11052 = vmatmul.mubr.f32.vlgmr.msra.gmra.mrb[10].mxu0 %v3775_v20 }
0x1228   :  { %12072 = vmatpush3.bf16.msra.mxu0 %v13203_v59  ;;  %11062 = vmatprep.mubr.msk.f32.mxu0 %vm12980_vm0, %v12981_v1 }
0x1229   :  { %12073 = vmatprep.subr.bf16.mxu0 %v12979_v0 }
0x122c   :  { %12075 = vmatpush3.bf16.msra.mxu0 %v13213_v61 }
0x122d   :  { %12076 = vmatprep.subr.bf16.mxu0 %v12979_v0 }
0x122f   :  { %11063 = vmatmul.mubr.f32.vlgmr.msra.gmra.mrb[10].mxu0 %v3776_v21  ;;  %v13637_v21 = vsub.f32 %v4772_v13, %v4799_v15 }
0x1230   :  { %12078 = vmatpush3.bf16.msra.mxu0 %v13150_v26  ;;  %11073 = vmatprep.mubr.msk.f32.mxu0 %vm12980_vm0, %v12981_v1 }
0x1231   :  { %12079 = vmatprep.subr.bf16.mxu0 %v12979_v0 }
0x1234   :  { %12081 = vmatpush3.bf16.msra.mxu0 %v13173_v48 }
0x1235   :  { %12082 = vmatprep.subr.bf16.mxu0 %v12979_v0 }
0x1237   :  { %11074 = vmatmul.mubr.f32.vlgmr.msra.gmra.mrb[10].mxu0 %v3777_v22 }
0x1238   :  { %12084 = vmatpush3.bf16.msra.mxu0 %v13219_v62  ;;  %11084 = vmatprep.mubr.msk.f32.mxu0 %vm12980_vm0, %v12981_v1 }
0x1239   :  { %12085 = vmatprep.subr.bf16.mxu0 %v12979_v0 }
0x123c   :  { %12087 = vmatpush3.bf16.msra.mxu0 %v13230_v63 }
0x123d   :  { %12088 = vmatprep.subr.bf16.mxu0 %v12979_v0 }
0x123f   :  { %11085 = vmatmul.mubr.f32.vlgmr.msra.gmra.mrb[10].mxu0 %v3775_v20 }
0x1240   :  { %12090 = vmatpush3.bf16.msra.mxu0 %v13150_v26  ;;  %11095 = vmatprep.mubr.msk.f32.mxu0 %vm12980_vm0, %v12981_v1 }
0x1241   :  { %12091 = vmatprep.subr.bf16.mxu0 %v12979_v0 }
0x1244   :  { %12093 = vmatpush3.bf16.msra.mxu0 %v13173_v48 }
0x1245   :  { %12130 = vmatprep.subr.bf16.mxu0 %v12979_v0 }
0x1247   :  { %11096 = vmatmul.mubr.f32.vlgmr.msra.gmra.mrb[10].mxu0 %v3775_v20  ;;  %v13635_v20 = vsub.f32 %v4771_v12, %v4796_v14 }
0x1248   :  { %11172 = vmatprep.mubr.msk.f32.mxu0 %vm12980_vm0, %v12981_v1  ;;  %12132 = vmatpush3.bf16.msra.mxu0 %v13623_v9 }
0x1249   :  { %12133 = vmatprep.subr.bf16.mxu0 %v12979_v0 }
0x124c   :  { %12135 = vmatpush3.bf16.msra.mxu0 %v13633_v19 }
0x124d   :  { %12136 = vmatprep.subr.bf16.mxu0 %v12979_v0 }
0x131a   :  { %v4187_v25 = vpop.f32.mrb[10].mxu0 }
0x131b   :  { %v4192_v27 = vrot.slane %v4187_v25, 2  ;;  %v11097_v28 = vpop.f32.mrb[11].mxu0  ;;  %v4880_v25 = vand.u32 4294901760, %v4879_v23 }
0x131c   :  { %v4892_v28 = vand.u32 4294901760, %v13637_v21 }
0x131d   :  { %v4194_v29 = vadd.f32 %v13271_v17, %v4192_v27  ;;  %v4885_v27 = vand.u32 4294901760, %v13635_v20 }
0x131f   :  { %12725 = vtanh.f32 %v4194_v29  ;;  %v10023_v31 = vmul.f32 -1.442695, %v4194_v29 }
0x1321   :  { %12727 = vpow2.f32 %v10023_v31 }
0x1329   :  { %v12726_v30 = vpop.eup %12725 }
0x132a   :  { %4207 = vrot.lane.b32.xlu1 %v12726_v30, %s12982_s26 }
0x132b   :  { %v12728_v32 = vpop.eup %12727 }
0x132c   :  { %v4198_v33 = vadd.f32 1.0, %v12728_v32  ;;  %v4886_v32 = vsub.f32 %v13635_v20, %v4885_v27 }
0x132e   :  { %12729 = vrcp.f32 %v4198_v33  ;;  %v4893_v33 = vsub.f32 %v13637_v21, %v4892_v28 }
0x1338   :  { %v12730_v34 = vpop.eup %12729 }
0x1339   :  { %v4205_v38 = vmul.f32 %v12730_v34, %v4203_v37 }
0x139c   :  { %v4208_v35 = vpop.permute.xlu1 %4207 }
0x139d   :  { %v4210_v36 = vmul.f32 %v12730_v34, %v4208_v35  ;;  %v4887_v35 = vand.u32 4294901760, %v4886_v32 }
0x139f   :  { %4212 = vrot.lane.b32.xlu0 %v4210_v36, %s12983_s5  ;;  %v4894_v36 = vand.u32 4294901760, %v4893_v33 }
0x13a1   :  { %v13655_v37 = vpack.c.bf16 %v4894_v36, %v4887_v35 }
0x1411   :  { %v4213_v39 = vpop.permute.xlu0 %4212 }
0x1412   :  { %v13573_v40 = vadd.f32 %v4213_v39, %v4205_v38  ;;  %v12143_v38 = vpack.c.bf16 %v13627_v11, %v13625_v10  ;;  %v12146_v39 = vpack.c.bf16 %v13637_v21, %v13635_v20 }
0x1414   :  { %12731 = vtanh.f32 %v13573_v40  ;;  %v4725_v60 = vrot.slane %v13573_v40, 7 }
0x141e   :  { %v12732_v41 = vpop.eup %12731 }
0x141f   :  { %4218 = vrot.lane.b32.xlu1 %v12732_v41, %s12982_s26  ;;  %v13663_v41 = vpack.c.bf16 %v4892_v28, %v4885_v27 }
0x1491   :  { %v4219_v43 = vpop.permute.xlu1 %4218 }
0x1492   :  { %v4221_v44 = vmul.f32 %v12730_v34, %v4219_v43  ;;  %v4773_v43 = vld [vmem:[#allocation8] sm:$0xff] }
0x1494   :  { %v4223_v45 = vrot.slane %v4221_v44, 6  ;;  %v13579_v46 = vsel %vm4754_vm8, %v13533_v16, %v4221_v44  ;;  %v4871_v16 = vand.u32 4294901760, %v13625_v10  ;;  %v4774_v44 = vld [vmem:[#allocation8 + $0x8] sm:$0xff] }
0x1496   :  { %4224 = vrot.lane.b32.xlu0 %v4223_v45, %s12983_s5  ;;  %v4872_v22 = vsub.f32 %v13625_v10, %v4871_v16  ;;  %v13661_v40 = vpack.c.bf16 %v4878_v18, %v4871_v16  ;;  %v5280_v45 = vand.u32 4294901760, %v4773_v43 }
0x1498   :  { %v4873_v24 = vand.u32 4294901760, %v4872_v22 }
0x149a   :  { %v13647_v31 = vpack.c.bf16 %v4880_v25, %v4873_v24  ;;  %v5275_v25 = vld [vmem:[#allocation5 + $0x1] sm:$0x1] }
0x1508   :  { %v4225_v47 = vpop.permute.xlu0 %4224 }
0x1509   :  { %v4226_v49 = vsel %vm573_vm2, %v4225_v47, 0  ;;  %v5360_v47 = vsub.f32 %v4773_v43, %v5280_v45 }
0x150a   :  { %v4297_v50 = vand.u32 4294901760, %v4226_v49 }
0x150c   :  { %v4298_v51 = vsub.f32 %v4226_v49, %v4297_v50 }
0x150e   :  { %v4299_v52 = vand.u32 4294901760, %v4298_v51 }
0x1510   :  { %v4300_v42 = vsub.f32 %v4298_v51, %v4299_v52 }
0x1512   :  { %v4301_v53 = vand.u32 4294901760, %v4300_v42 }
0x1514   :  { %11107 = vmatmul.mubr.f32.vlgmr.msra.gmra.mrb[16].mxu1 %v4301_v53 }
0x1515   :  { %12102 = vmatpush3.bf16.msra.mxu1 %v13187_v55  ;;  %11117 = vmatprep.mubr.msk.f32.mxu1 %vm12980_vm0, %v12981_v1 }
0x1516   :  { %12103 = vmatprep.subr.bf16.mxu1 %v12979_v0 }
0x1519   :  { %12105 = vmatpush3.bf16.msra.mxu1 %v13194_v58 }
0x151a   :  { %12106 = vmatprep.subr.bf16.mxu1 %v12979_v0 }
0x151c   :  { %11118 = vmatmul.mubr.f32.vlgmr.msra.gmra.mrb[16].mxu1 %v4297_v50 }
0x151d   :  { %12108 = vmatpush3.bf16.msra.mxu1 %v13203_v59  ;;  %11128 = vmatprep.mubr.msk.f32.mxu1 %vm12980_vm0, %v12981_v1 }
0x151e   :  { %12109 = vmatprep.subr.bf16.mxu1 %v12979_v0 }
0x1521   :  { %12111 = vmatpush3.bf16.msra.mxu1 %v13213_v61 }
0x1522   :  { %12112 = vmatprep.subr.bf16.mxu1 %v12979_v0 }
0x1524   :  { %11129 = vmatmul.mubr.f32.vlgmr.msra.gmra.mrb[16].mxu1 %v4298_v51  ;;  %v4775_v51 = vld [vmem:[#allocation8 + $0x10] sm:$0xff] }
0x1525   :  { %12114 = vmatpush3.bf16.msra.mxu1 %v13150_v26  ;;  %11139 = vmatprep.mubr.msk.f32.mxu1 %vm12980_vm0, %v12981_v1 }
0x1526   :  { %12115 = vmatprep.subr.bf16.mxu1 %v12979_v0 }
0x1529   :  { %12117 = vmatpush3.bf16.msra.mxu1 %v13173_v48 }
0x152a   :  { %12118 = vmatprep.subr.bf16.mxu1 %v12979_v0 }
0x152c   :  { %11140 = vmatmul.mubr.f32.vlgmr.msra.gmra.mrb[16].mxu1 %v4299_v52  ;;  %v4776_v52 = vld [vmem:[#allocation8 + $0x18] sm:$0xff] }
0x152d   :  { %12120 = vmatpush3.bf16.msra.mxu1 %v13219_v62  ;;  %11150 = vmatprep.mubr.msk.f32.mxu1 %vm12980_vm0, %v12981_v1 }
0x152e   :  { %12121 = vmatprep.subr.bf16.mxu1 %v12979_v0 }
0x1531   :  { %12123 = vmatpush3.bf16.msra.mxu1 %v13230_v63 }
0x1532   :  { %12124 = vmatprep.subr.bf16.mxu1 %v12979_v0 }
0x1534   :  { %11151 = vmatmul.mubr.f32.vlgmr.msra.gmra.mrb[16].mxu1 %v4297_v50 }
0x1535   :  { %12126 = vmatpush3.bf16.msra.mxu1 %v13150_v26  ;;  %11161 = vmatprep.mubr.msk.f32.mxu1 %vm12980_vm0, %v12981_v1 }
0x1536   :  { %12127 = vmatprep.subr.bf16.mxu1 %v12979_v0 }
0x1539   :  { %12129 = vmatpush3.bf16.msra.mxu1 %v13173_v48 }
0x153a   :  { %12166 = vmatprep.subr.bf16.mxu1 %v12979_v0 }
0x153c   :  { %11162 = vmatmul.mubr.f32.vlgmr.msra.gmra.mrb[16].mxu1 %v4297_v50  ;;  %v5274_v50 = vld [vmem:[#allocation2 + $0x1] sm:$0x1] }
0x153d   :  { %11238 = vmatprep.mubr.msk.f32.mxu1 %vm12980_vm0, %v12981_v1  ;;  %v5277_v42 = vsel %vm573_vm2, %v5274_v50, 0 }
0x160f   :  { %v4709_v55 = vpop.f32.mrb[16].mxu1 }
0x1610   :  { %v4714_v58 = vrot.slane %v4709_v55, 1  ;;  %v11163_v59 = vpop.f32.mrb[17].mxu1  ;;  %v5286_v55 = vand.u32 4294901760, %v4775_v51 }
0x1611   :  { %v5361_v59 = vand.u32 4294901760, %v5360_v47 }
0x1612   :  { %v4716_v61 = vadd.f32 %v13271_v17, %v4714_v58  ;;  %v5289_v58 = vand.u32 4294901760, %v4776_v52 }
0x1614   :  { %12733 = vtanh.f32 %v4716_v61  ;;  %v10024_v62 = vmul.f32 -1.442695, %v4716_v61 }
0x1616   :  { %12735 = vpow2.f32 %v10024_v62  ;;  %v5362_v62 = vsub.f32 %v5360_v47, %v5361_v59 }
0x161e   :  { %v12734_v26 = vpop.eup %12733 }
0x161f   :  { %4729 = vrot.lane.b32.xlu1 %v12734_v26, %s12982_s26  ;;  %v13668_v26 = vand.u32 4294901760, %v5277_v42 }
0x1620   :  { %v12736_v63 = vpop.eup %12735 }
0x1621   :  { %v4720_v54 = vadd.f32 1.0, %v12736_v63  ;;  %v5374_v63 = vsub.f32 %v4775_v51, %v5286_v55 }
0x1623   :  { %12737 = vrcp.f32 %v4720_v54  ;;  %v5381_v54 = vsub.f32 %v4776_v52, %v5289_v58 }
0x1625   :  { %v13690_v22 = vpack.c.bf16 %v5381_v54, %v5374_v63 }
0x162d   :  { %v12738_v48 = vpop.eup %12737 }
0x162e   :  { %v4727_v2 = vmul.f32 %v12738_v48, %v4725_v60  ;;  %v5363_v60 = vand.u32 4294901760, %v5362_v62 }
0x1691   :  { %v4730_v56 = vpop.permute.xlu1 %4729 }
0x1692   :  { %v4732_v57 = vmul.f32 %v12738_v48, %v4730_v56  ;;  %v13673_v56 = vsub.f32 %v5277_v42, %v13668_v26 }
0x1694   :  { %4734 = vrot.lane.b32.xlu0 %v4732_v57, %s12983_s5  ;;  %v13675_v57 = vpack.c.bf16 %v5289_v58, %v5286_v55  ;;  %v5350_v5 = vand.u32 4294901760, %v13673_v56 }
0x1696   :  { %v5351_v12 = vsub.f32 %v13673_v56, %v5350_v5 }
0x1698   :  { %v5352_v16 = vand.u32 4294901760, %v5351_v12 }
0x1706   :  { %v4735_v3 = vpop.permute.xlu0 %4734 }
0x1707   :  { %v13619_v4 = vadd.f32 %v4735_v3, %v4727_v2  ;;  %v5375_v2 = vand.u32 4294901760, %v5374_v63  ;;  %v5382_v3 = vand.u32 4294901760, %v5381_v54 }
0x1709   :  { %12739 = vtanh.f32 %v13619_v4  ;;  %v5376_v6 = vsub.f32 %v5374_v63, %v5375_v2  ;;  %v5383_v7 = vsub.f32 %v5381_v54, %v5382_v3  ;;  %v13701_v24 = vpack.c.bf16 %v5382_v3, %v5375_v2 }
0x170b   :  { %v5377_v14 = vand.u32 4294901760, %v5376_v6  ;;  %v5384_v15 = vand.u32 4294901760, %v5383_v7 }
0x170d   :  { %v13687_v18 = vpack.c.bf16 %v5384_v15, %v5377_v14 }
0x1713   :  { %v12740_v17 = vpop.eup %12739 }
0x1714   :  { %4740 = vrot.lane.b32.xlu1 %v12740_v17, %s12982_s26 }
0x1786   :  { %v4741_v29 = vpop.permute.xlu1 %4740 }
0x1787   :  { %v13645_v30 = vmul.f32 %v12738_v48, %v4741_v29 }
0x1789   :  { %v4757_v34 = vsel %vm4756_vm9, %v13579_v46, %v13645_v30  ;;  %v5283_v46 = vand.u32 4294901760, %v4774_v44 }
0x178a   :  { %4785 = vrot.lane.b32.xlu0 %v4757_v34, %s12983_s5 }
0x178b   :  { %v5367_v49 = vsub.f32 %v4774_v44, %v5283_v46  ;;  %v13666_v53 = vpack.c.bf16 %v5283_v46, %v5280_v45  ;;  %v10025_v46 = vld [vmem:[%s14231_s8] ss:$0 sm:$0xff]  ;;  %s12984_s8 = smov 96  }
0x178d   :  { %v5368_v61 = vand.u32 4294901760, %v5367_v49  ;;  %12168 = vmatpush3.bf16.msra.mxu1 %v13666_v53  ;;  %v13685_v13 = vpack.c.bf16 %v5367_v49, %v5360_v47 }
0x178e   :  { %12169 = vmatprep.subr.bf16.mxu1 %v12979_v0  ;;  %5773 = vrot.lane.b32.xlu0 %v5275_v25, %s12983_s5 }
0x178f   :  { %v5369_v48 = vsub.f32 %v5367_v49, %v5368_v61  ;;  %v13696_v23 = vpack.c.bf16 %v5368_v61, %v5361_v59 }
0x1791   :  { %v5370_v17 = vand.u32 4294901760, %v5369_v48  ;;  %12171 = vmatpush3.bf16.msra.mxu1 %v13675_v57 }
0x1792   :  { %12178 = vmatprep.subr.bf16.mxu1 %v12979_v0 }
0x1793   :  { %v13679_v8 = vpack.c.bf16 %v5370_v17, %v5363_v60 }
0x1794   :  { %11239 = vmatmul.mubr.f32.vlgmr.msra.gmra.mrb[18].mxu1 %v5352_v16 }
0x1795   :  { %12180 = vmatpush3.bf16.msra.mxu1 %v13685_v13  ;;  %11260 = vmatprep.mubr.msk.f32.mxu1 %vm12980_vm0, %v12981_v1 }
0x1796   :  { %12181 = vmatprep.subr.bf16.mxu1 %v12979_v0 }
0x1799   :  { %12183 = vmatpush3.bf16.msra.mxu1 %v13690_v22 }
0x179a   :  { %12190 = vmatprep.subr.bf16.mxu1 %v12979_v0 }
0x179c   :  { %11261 = vmatmul.mubr.f32.vlgmr.msra.gmra.mrb[20].mxu1 %v13673_v56 }
0x179d   :  { %12192 = vmatpush3.bf16.msra.mxu1 %v13696_v23  ;;  %11282 = vmatprep.mubr.msk.f32.mxu1 %vm12980_vm0, %v12981_v1 }
0x179e   :  { %12193 = vmatprep.subr.bf16.mxu1 %v12979_v0 }
0x17a1   :  { %12195 = vmatpush3.bf16.msra.mxu1 %v13701_v24 }
0x17a2   :  { %12202 = vmatprep.subr.bf16.mxu1 %v12979_v0 }
0x17a4   :  { %11283 = vmatmul.mubr.f32.vlgmr.msra.gmra.mrb[22].mxu1 %v13668_v26 }
0x17a5   :  { %12204 = vmatpush3.bf16.msra.mxu1 %v13666_v53  ;;  %11304 = vmatprep.mubr.msk.f32.mxu1 %vm12980_vm0, %v12981_v1 }
0x17a6   :  { %12205 = vmatprep.subr.bf16.mxu1 %v12979_v0 }
0x17a9   :  { %12207 = vmatpush3.bf16.msra.mxu1 %v13675_v57 }
0x17aa   :  { %12208 = vmatprep.subr.bf16.mxu1 %v12979_v0 }
0x17fc   :  { %v4786_v27 = vpop.permute.xlu0 %4785 }
0x17fd   :  { %v4787_v28 = vsel %vm573_vm2, %v4786_v27, 0 }
0x17fe   :  { %v4858_v29 = vand.u32 4294901760, %v4787_v28 }
0x1800   :  { %v4859_v32 = vsub.f32 %v4787_v28, %v4858_v29  ;;  %v5774_v63 = vpop.permute.xlu0 %5773 }
0x1802   :  { %v4860_v33 = vand.u32 4294901760, %v4859_v32 }
0x1804   :  { %v4861_v34 = vsub.f32 %v4859_v32, %v4860_v33 }
0x1806   :  { %v4862_v35 = vand.u32 4294901760, %v4861_v34 }
0x1808   :  { %11173 = vmatmul.mubr.f32.vlgmr.msra.gmra.mrb[12].mxu0 %v4862_v35 }
0x1809   :  { %12138 = vmatpush3.bf16.msra.mxu0 %v13647_v31  ;;  %11183 = vmatprep.mubr.msk.f32.mxu0 %vm12980_vm0, %v12981_v1 }
0x180a   :  { %12139 = vmatprep.subr.bf16.mxu0 %v12979_v0 }
0x180d   :  { %12141 = vmatpush3.bf16.msra.mxu0 %v13655_v37 }
0x180e   :  { %12142 = vmatprep.subr.bf16.mxu0 %v12979_v0 }
0x1810   :  { %11184 = vmatmul.mubr.f32.vlgmr.msra.gmra.mrb[12].mxu0 %v4858_v29 }
0x1811   :  { %12144 = vmatpush3.bf16.msra.mxu0 %v12143_v38  ;;  %11194 = vmatprep.mubr.msk.f32.mxu0 %vm12980_vm0, %v12981_v1 }
0x1812   :  { %12145 = vmatprep.subr.bf16.mxu0 %v12979_v0 }
0x1815   :  { %12147 = vmatpush3.bf16.msra.mxu0 %v12146_v39 }
0x1816   :  { %12148 = vmatprep.subr.bf16.mxu0 %v12979_v0 }
0x1818   :  { %11195 = vmatmul.mubr.f32.vlgmr.msra.gmra.mrb[12].mxu0 %v4859_v32 }
0x1819   :  { %12150 = vmatpush3.bf16.msra.mxu0 %v13623_v9  ;;  %11205 = vmatprep.mubr.msk.f32.mxu0 %vm12980_vm0, %v12981_v1 }
0x181a   :  { %12151 = vmatprep.subr.bf16.mxu0 %v12979_v0 }
0x181d   :  { %12153 = vmatpush3.bf16.msra.mxu0 %v13633_v19 }
0x181e   :  { %12154 = vmatprep.subr.bf16.mxu0 %v12979_v0 }
0x1820   :  { %11206 = vmatmul.mubr.f32.vlgmr.msra.gmra.mrb[12].mxu0 %v4860_v33 }
0x1821   :  { %12156 = vmatpush3.bf16.msra.mxu0 %v13661_v40  ;;  %11216 = vmatprep.mubr.msk.f32.mxu0 %vm12980_vm0, %v12981_v1 }
0x1822   :  { %12157 = vmatprep.subr.bf16.mxu0 %v12979_v0 }
0x1825   :  { %12159 = vmatpush3.bf16.msra.mxu0 %v13663_v41 }
0x1826   :  { %12160 = vmatprep.subr.bf16.mxu0 %v12979_v0 }
0x1828   :  { %11217 = vmatmul.mubr.f32.vlgmr.msra.gmra.mrb[12].mxu0 %v4858_v29 }
0x1829   :  { %12162 = vmatpush3.bf16.msra.mxu0 %v13623_v9  ;;  %11227 = vmatprep.mubr.msk.f32.mxu0 %vm12980_vm0, %v12981_v1 }
0x182a   :  { %12163 = vmatprep.subr.bf16.mxu0 %v12979_v0 }
0x182d   :  { %12165 = vmatpush3.bf16.msra.mxu0 %v13633_v19 }
0x182e   :  { %12172 = vmatprep.subr.bf16.mxu0 %v12979_v0 }
0x1830   :  { %11228 = vmatmul.mubr.f32.vlgmr.msra.gmra.mrb[12].mxu0 %v4858_v29 }
0x1831   :  { %12174 = vmatpush3.bf16.msra.mxu0 %v13679_v8  ;;  %11249 = vmatprep.mubr.msk.f32.mxu0 %vm12980_vm0, %v12981_v1 }
0x1832   :  { %12175 = vmatprep.subr.bf16.mxu0 %v12979_v0 }
0x1835   :  { %12177 = vmatpush3.bf16.msra.mxu0 %v13687_v18 }
0x1836   :  { %12184 = vmatprep.subr.bf16.mxu0 %v12979_v0 }
0x1838   :  { %11250 = vmatmul.mubr.f32.vlgmr.msra.gmra.mrb[14].mxu0 %v13668_v26 }
0x1839   :  { %12186 = vmatpush3.bf16.msra.mxu0 %v13666_v53  ;;  %11271 = vmatprep.mubr.msk.f32.mxu0 %vm12980_vm0, %v12981_v1 }
0x183a   :  { %12187 = vmatprep.subr.bf16.mxu0 %v12979_v0 }
0x183d   :  { %12189 = vmatpush3.bf16.msra.mxu0 %v13675_v57 }
0x183e   :  { %12196 = vmatprep.subr.bf16.mxu0 %v12979_v0 }
0x1840   :  { %11272 = vmatmul.mubr.f32.vlgmr.msra.gmra.mrb[16].mxu0 %v5350_v5 }
0x1841   :  { %12198 = vmatpush3.bf16.msra.mxu0 %v13666_v53  ;;  %11293 = vmatprep.mubr.msk.f32.mxu0 %vm12980_vm0, %v12981_v1 }
0x1842   :  { %12199 = vmatprep.subr.bf16.mxu0 %v12979_v0 }
0x1845   :  { %12201 = vmatpush3.bf16.msra.mxu0 %v13675_v57 }
0x1846   :  { %12238 = vmatprep.subr.bf16.mxu0 %v12979_v0 }
0x1848   :  { %11294 = vmatmul.mubr.f32.vlgmr.msra.gmra.mrb[18].mxu0 %v13668_v26 }
0x1849   :  { %12240 = vmatpush3.bf16.msra.mxu0 %v13666_v53  ;;  %11370 = vmatprep.mubr.msk.f32.mxu0 %vm12980_vm0, %v12981_v1 }
0x184a   :  { %12241 = vmatprep.subr.bf16.mxu0 %v12979_v0 }
0x184d   :  { %12243 = vmatpush3.bf16.msra.mxu0 %v13675_v57 }
0x184e   :  { %12244 = vmatprep.subr.bf16.mxu0 %v12979_v0 }
0x1867   :  { %v5354_v9 = vpop.f32.mrb[18].mxu1 }
0x1868   :  { %v11240_v10 = vpop.f32.mrb[19].mxu1 }
0x186f   :  { %v5525_v11 = vpop.f32.mrb[20].mxu1 }
0x1870   :  { %v11262_v19 = vpop.f32.mrb[21].mxu1 }
0x1877   :  { %v5685_v20 = vpop.f32.mrb[22].mxu1 }
0x1878   :  { %v11284_v21 = vpop.f32.mrb[23].mxu1 }
0x1903   :  { %v5270_v31 = vpop.f32.mrb[12].mxu0 }
0x1904   :  { %v11229_v36 = vpop.f32.mrb[13].mxu0  ;;  %v13782_v49 = vadd.f32 %v10025_v46, %v5270_v31 }
0x190b   :  { %v5445_v37 = vpop.f32.mrb[14].mxu0 }
0x190c   :  { %v5446_v38 = vadd.f32 %v5445_v37, %v5354_v9  ;;  %v11251_v39 = vpop.f32.mrb[15].mxu0 }
0x190e   :  { %v5526_v40 = vadd.f32 %v5525_v11, %v5446_v38 }
0x1913   :  { %v5602_v41 = vpop.f32.mrb[16].mxu0 }
0x1914   :  { %v5603_v43 = vadd.f32 %v5602_v41, %v5526_v40  ;;  %v11273_v44 = vpop.f32.mrb[17].mxu0 }
0x1916   :  { %v5686_v45 = vadd.f32 %v5685_v20, %v5603_v43 }
0x191b   :  { %v5760_v47 = vpop.f32.mrb[18].mxu0 }
0x191c   :  { %v5761_v50 = vadd.f32 %v5760_v47, %v5686_v45  ;;  %v11295_v51 = vpop.f32.mrb[19].mxu0 }
0x191e   :  { %v5764_v52 = vadd.f32 %v13782_v49, %v5761_v50 }
0x1920   :  { %12741 = vtanh.f32 %v5764_v52  ;;  %v10026_v55 = vmul.f32 -1.442695, %v5764_v52 }
0x1922   :  { %12743 = vpow2.f32 %v10026_v55 }
0x192a   :  { %v12742_v42 = vpop.eup %12741 }
0x192b   :  { %5778 = vrot.lane.b32.xlu1 %v12742_v42, %s12982_s26 }
0x192c   :  { %v12744_v58 = vpop.eup %12743 }
0x192d   :  { %v5768_v59 = vadd.f32 1.0, %v12744_v58 }
0x192f   :  { %12745 = vrcp.f32 %v5768_v59 }
0x1939   :  { %v12746_v61 = vpop.eup %12745 }
0x193a   :  { %v5776_v54 = vmul.f32 %v12746_v61, %v5774_v63 }
0x199d   :  { %v5779_v26 = vpop.permute.xlu1 %5778 }
0x199e   :  { %v5781_v62 = vmul.f32 %v12746_v61, %v5779_v26 }
0x19a0   :  { %5783 = vrot.lane.b32.xlu1 %v5781_v62, %s12983_s5 }
0x1a12   :  { %v5784_v48 = vpop.permute.xlu1 %5783 }
0x1a13   :  { %v13787_v56 = vadd.f32 %v5784_v48, %v5776_v54 }
0x1a15   :  { %12747 = vtanh.f32 %v13787_v56  ;;  %v6295_v11 = vrot.slane %v13787_v56, 7 }
0x1a1f   :  { %v12748_v60 = vpop.eup %12747 }
0x1a20   :  { %5789 = vrot.lane.b32.xlu0 %v12748_v60, %s12982_s26 }
0x1a92   :  { %v5790_v2 = vpop.permute.xlu0 %5789 }
0x1a93   :  { %v13791_v3 = vmul.f32 %v12746_v61, %v5790_v2 }
0x1a95   :  { %5794 = vrot.lane.b32.xlu1 %v13791_v3, %s12983_s5 }
0x1b07   :  { %v5795_v17 = vpop.permute.xlu1 %5794 }
0x1b08   :  { %v5796_v5 = vsel %vm573_vm2, %v5795_v17, 0 }
0x1b09   :  { %v5867_v6 = vand.u32 4294901760, %v5796_v5 }
0x1b0b   :  { %v5868_v7 = vsub.f32 %v5796_v5, %v5867_v6 }
0x1b0d   :  { %v5869_v12 = vand.u32 4294901760, %v5868_v7 }
0x1b0f   :  { %v5870_v14 = vsub.f32 %v5868_v7, %v5869_v12 }
0x1b11   :  { %v5871_v15 = vand.u32 4294901760, %v5870_v14 }
0x1b13   :  { %11305 = vmatmul.mubr.f32.vlgmr.msra.gmra.mrb[24].mxu1 %v5871_v15 }
0x1b14   :  { %12210 = vmatpush3.bf16.msra.mxu1 %v13679_v8  ;;  %11315 = vmatprep.mubr.msk.f32.mxu1 %vm12980_vm0, %v12981_v1 }
0x1b15   :  { %12211 = vmatprep.subr.bf16.mxu1 %v12979_v0 }
0x1b18   :  { %12213 = vmatpush3.bf16.msra.mxu1 %v13687_v18 }
0x1b19   :  { %12214 = vmatprep.subr.bf16.mxu1 %v12979_v0 }
0x1b1b   :  { %11316 = vmatmul.mubr.f32.vlgmr.msra.gmra.mrb[24].mxu1 %v5867_v6 }
0x1b1c   :  { %12216 = vmatpush3.bf16.msra.mxu1 %v13685_v13  ;;  %11326 = vmatprep.mubr.msk.f32.mxu1 %vm12980_vm0, %v12981_v1 }
0x1b1d   :  { %12217 = vmatprep.subr.bf16.mxu1 %v12979_v0 }
0x1b20   :  { %12219 = vmatpush3.bf16.msra.mxu1 %v13690_v22 }
0x1b21   :  { %12220 = vmatprep.subr.bf16.mxu1 %v12979_v0 }
0x1b23   :  { %11327 = vmatmul.mubr.f32.vlgmr.msra.gmra.mrb[24].mxu1 %v5868_v7 }
0x1b24   :  { %12222 = vmatpush3.bf16.msra.mxu1 %v13666_v53  ;;  %11337 = vmatprep.mubr.msk.f32.mxu1 %vm12980_vm0, %v12981_v1 }
0x1b25   :  { %12223 = vmatprep.subr.bf16.mxu1 %v12979_v0 }
0x1b28   :  { %12225 = vmatpush3.bf16.msra.mxu1 %v13675_v57 }
0x1b29   :  { %12226 = vmatprep.subr.bf16.mxu1 %v12979_v0 }
0x1b2b   :  { %11338 = vmatmul.mubr.f32.vlgmr.msra.gmra.mrb[24].mxu1 %v5869_v12 }
0x1b2c   :  { %12228 = vmatpush3.bf16.msra.mxu1 %v13696_v23  ;;  %11348 = vmatprep.mubr.msk.f32.mxu1 %vm12980_vm0, %v12981_v1 }
0x1b2d   :  { %12229 = vmatprep.subr.bf16.mxu1 %v12979_v0 }
0x1b30   :  { %12231 = vmatpush3.bf16.msra.mxu1 %v13701_v24 }
0x1b31   :  { %12232 = vmatprep.subr.bf16.mxu1 %v12979_v0 }
0x1b33   :  { %11349 = vmatmul.mubr.f32.vlgmr.msra.gmra.mrb[24].mxu1 %v5867_v6 }
0x1b34   :  { %12234 = vmatpush3.bf16.msra.mxu1 %v13666_v53  ;;  %11359 = vmatprep.mubr.msk.f32.mxu1 %vm12980_vm0, %v12981_v1 }
0x1b35   :  { %12235 = vmatprep.subr.bf16.mxu1 %v12979_v0 }
0x1b38   :  { %12237 = vmatpush3.bf16.msra.mxu1 %v13675_v57 }
0x1b39   :  { %12274 = vmatprep.subr.bf16.mxu1 %v12979_v0 }
0x1b3b   :  { %11360 = vmatmul.mubr.f32.vlgmr.msra.gmra.mrb[24].mxu1 %v5867_v6 }
0x1b3c   :  { %12276 = vmatpush3.bf16.msra.mxu1 %v13666_v53  ;;  %11436 = vmatprep.mubr.msk.f32.mxu1 %vm12980_vm0, %v12981_v1 }
0x1b3d   :  { %12277 = vmatprep.subr.bf16.mxu1 %v12979_v0 }
0x1b40   :  { %12279 = vmatpush3.bf16.msra.mxu1 %v13675_v57 }
0x1b41   :  { %12280 = vmatprep.subr.bf16.mxu1 %v12979_v0 }
0x1c0e   :  { %v6279_v16 = vpop.f32.mrb[24].mxu1 }
0x1c0f   :  { %v6284_v25 = vrot.slane %v6279_v16, 7  ;;  %v11361_v27 = vpop.f32.mrb[25].mxu1 }
0x1c11   :  { %v6286_v28 = vadd.f32 %v13782_v49, %v6284_v25 }
0x1c13   :  { %12749 = vtanh.f32 %v6286_v28  ;;  %v10027_v32 = vmul.f32 -1.442695, %v6286_v28 }
0x1c15   :  { %12751 = vpow2.f32 %v10027_v32 }
0x1c1d   :  { %v12750_v29 = vpop.eup %12749 }
0x1c1e   :  { %6299 = vrot.lane.b32.xlu0 %v12750_v29, %s12982_s26 }
0x1c1f   :  { %v12752_v33 = vpop.eup %12751 }
0x1c20   :  { %v6290_v34 = vadd.f32 1.0, %v12752_v33 }
0x1c22   :  { %12753 = vrcp.f32 %v6290_v34 }
0x1c2c   :  { %v12754_v35 = vpop.eup %12753 }
0x1c2d   :  { %v6297_v19 = vmul.f32 %v12754_v35, %v6295_v11 }
0x1c90   :  { %v6300_v9 = vpop.permute.xlu0 %6299 }
0x1c91   :  { %v6302_v10 = vmul.f32 %v12754_v35, %v6300_v9 }
0x1c93   :  { %6304 = vrot.lane.b32.xlu1 %v6302_v10, %s12983_s5 }
0x1d05   :  { %v6305_v20 = vpop.permute.xlu1 %6304 }
0x1d06   :  { %v13836_v21 = vadd.f32 %v6305_v20, %v6297_v19 }
0x1d08   :  { %12755 = vtanh.f32 %v13836_v21  ;;  %v6817_v63 = vrot.slane %v13836_v21, 7 }
0x1d12   :  { %v12756_v31 = vpop.eup %12755 }
0x1d13   :  { %6310 = vrot.lane.b32.xlu0 %v12756_v31, %s12982_s26 }
0x1d85   :  { %v6311_v36 = vpop.permute.xlu0 %6310 }
0x1d86   :  { %v13840_v37 = vmul.f32 %v12754_v35, %v6311_v36 }
0x1d88   :  { %v6315_v38 = vrot.slane %v13840_v37, 1  ;;  %v9446_v5 = vsel %vm4744_vm3, %v13791_v3, %v13840_v37 }
0x1d8a   :  { %6316 = vrot.lane.b32.xlu1 %v6315_v38, %s12983_s5 }
0x1dfc   :  { %v6317_v39 = vpop.permute.xlu1 %6316 }
0x1dfd   :  { %v6318_v40 = vsel %vm573_vm2, %v6317_v39, 0 }
0x1dfe   :  { %v6389_v41 = vand.u32 4294901760, %v6318_v40 }
0x1e00   :  { %v6390_v43 = vsub.f32 %v6318_v40, %v6389_v41 }
0x1e02   :  { %v6391_v44 = vand.u32 4294901760, %v6390_v43 }
0x1e04   :  { %v6392_v45 = vsub.f32 %v6390_v43, %v6391_v44 }
0x1e06   :  { %v6393_v46 = vand.u32 4294901760, %v6392_v45 }
0x1e08   :  { %11371 = vmatmul.mubr.f32.vlgmr.msra.gmra.mrb[20].mxu0 %v6393_v46 }
0x1e09   :  { %12246 = vmatpush3.bf16.msra.mxu0 %v13679_v8  ;;  %11381 = vmatprep.mubr.msk.f32.mxu0 %vm12980_vm0, %v12981_v1 }
0x1e0a   :  { %12247 = vmatprep.subr.bf16.mxu0 %v12979_v0 }
0x1e0d   :  { %12249 = vmatpush3.bf16.msra.mxu0 %v13687_v18 }
0x1e0e   :  { %12250 = vmatprep.subr.bf16.mxu0 %v12979_v0 }
0x1e10   :  { %11382 = vmatmul.mubr.f32.vlgmr.msra.gmra.mrb[20].mxu0 %v6389_v41 }
0x1e11   :  { %12252 = vmatpush3.bf16.msra.mxu0 %v13685_v13  ;;  %11392 = vmatprep.mubr.msk.f32.mxu0 %vm12980_vm0, %v12981_v1 }
0x1e12   :  { %12253 = vmatprep.subr.bf16.mxu0 %v12979_v0 }
0x1e15   :  { %12255 = vmatpush3.bf16.msra.mxu0 %v13690_v22 }
0x1e16   :  { %12256 = vmatprep.subr.bf16.mxu0 %v12979_v0 }
0x1e18   :  { %11393 = vmatmul.mubr.f32.vlgmr.msra.gmra.mrb[20].mxu0 %v6390_v43 }
0x1e19   :  { %12258 = vmatpush3.bf16.msra.mxu0 %v13666_v53  ;;  %11403 = vmatprep.mubr.msk.f32.mxu0 %vm12980_vm0, %v12981_v1 }
0x1e1a   :  { %12259 = vmatprep.subr.bf16.mxu0 %v12979_v0 }
0x1e1d   :  { %12261 = vmatpush3.bf16.msra.mxu0 %v13675_v57 }
0x1e1e   :  { %12262 = vmatprep.subr.bf16.mxu0 %v12979_v0 }
0x1e20   :  { %11404 = vmatmul.mubr.f32.vlgmr.msra.gmra.mrb[20].mxu0 %v6391_v44 }
0x1e21   :  { %12264 = vmatpush3.bf16.msra.mxu0 %v13696_v23  ;;  %11414 = vmatprep.mubr.msk.f32.mxu0 %vm12980_vm0, %v12981_v1 }
0x1e22   :  { %12265 = vmatprep.subr.bf16.mxu0 %v12979_v0 }
0x1e25   :  { %12267 = vmatpush3.bf16.msra.mxu0 %v13701_v24 }
0x1e26   :  { %12268 = vmatprep.subr.bf16.mxu0 %v12979_v0 }
0x1e28   :  { %11415 = vmatmul.mubr.f32.vlgmr.msra.gmra.mrb[20].mxu0 %v6389_v41 }
0x1e29   :  { %12270 = vmatpush3.bf16.msra.mxu0 %v13666_v53  ;;  %11425 = vmatprep.mubr.msk.f32.mxu0 %vm12980_vm0, %v12981_v1 }
0x1e2a   :  { %12271 = vmatprep.subr.bf16.mxu0 %v12979_v0 }
0x1e2d   :  { %12273 = vmatpush3.bf16.msra.mxu0 %v13675_v57 }
0x1e2e   :  { %12310 = vmatprep.subr.bf16.mxu0 %v12979_v0 }
0x1e30   :  { %11426 = vmatmul.mubr.f32.vlgmr.msra.gmra.mrb[20].mxu0 %v6389_v41 }
0x1e31   :  { %12312 = vmatpush3.bf16.msra.mxu0 %v13666_v53  ;;  %11502 = vmatprep.mubr.msk.f32.mxu0 %vm12980_vm0, %v12981_v1 }
0x1e32   :  { %12313 = vmatprep.subr.bf16.mxu0 %v12979_v0 }
0x1e35   :  { %12315 = vmatpush3.bf16.msra.mxu0 %v13675_v57 }
0x1e36   :  { %12316 = vmatprep.subr.bf16.mxu0 %v12979_v0 }
0x1f03   :  { %v6801_v47 = vpop.f32.mrb[20].mxu0 }
0x1f04   :  { %v6806_v50 = vrot.slane %v6801_v47, 6  ;;  %v11427_v51 = vpop.f32.mrb[21].mxu0 }
0x1f06   :  { %v6808_v52 = vadd.f32 %v13782_v49, %v6806_v50 }
0x1f08   :  { %12757 = vtanh.f32 %v6808_v52  ;;  %v10028_v55 = vmul.f32 -1.442695, %v6808_v52 }
0x1f0a   :  { %12759 = vpow2.f32 %v10028_v55 }
0x1f12   :  { %v12758_v42 = vpop.eup %12757 }
0x1f13   :  { %6821 = vrot.lane.b32.xlu0 %v12758_v42, %s12982_s26 }
0x1f14   :  { %v12760_v58 = vpop.eup %12759 }
0x1f15   :  { %v6812_v59 = vadd.f32 1.0, %v12760_v58 }
0x1f17   :  { %12761 = vrcp.f32 %v6812_v59 }
0x1f21   :  { %v12762_v61 = vpop.eup %12761 }
0x1f22   :  { %v6819_v54 = vmul.f32 %v12762_v61, %v6817_v63 }
0x1f85   :  { %v6822_v26 = vpop.permute.xlu0 %6821 }
0x1f86   :  { %v6824_v62 = vmul.f32 %v12762_v61, %v6822_v26 }
0x1f88   :  { %6826 = vrot.lane.b32.xlu1 %v6824_v62, %s12983_s5 }
0x1ffa   :  { %v6827_v48 = vpop.permute.xlu1 %6826 }
0x1ffb   :  { %v13885_v56 = vadd.f32 %v6827_v48, %v6819_v54 }
0x1ffd   :  { %12763 = vtanh.f32 %v13885_v56  ;;  %v7339_v21 = vrot.slane %v13885_v56, 7 }
0x2007   :  { %v12764_v60 = vpop.eup %12763 }
0x2008   :  { %6832 = vrot.lane.b32.xlu0 %v12764_v60, %s12982_s26 }
0x207a   :  { %v6833_v2 = vpop.permute.xlu0 %6832 }
0x207b   :  { %v6835_v17 = vmul.f32 %v12762_v61, %v6833_v2 }
0x207d   :  { %v6837_v6 = vrot.slane %v6835_v17, 2  ;;  %v13893_v7 = vsel %vm4746_vm4, %v9446_v5, %v6835_v17 }
0x207f   :  { %6838 = vrot.lane.b32.xlu1 %v6837_v6, %s12983_s5 }
0x20f1   :  { %v6839_v12 = vpop.permute.xlu1 %6838 }
0x20f2   :  { %v6840_v14 = vsel %vm573_vm2, %v6839_v12, 0 }
0x20f3   :  { %v6911_v15 = vand.u32 4294901760, %v6840_v14 }
0x20f5   :  { %v6912_v16 = vsub.f32 %v6840_v14, %v6911_v15 }
0x20f7   :  { %v6913_v25 = vand.u32 4294901760, %v6912_v16 }
0x20f9   :  { %v6914_v27 = vsub.f32 %v6912_v16, %v6913_v25 }
0x20fb   :  { %v6915_v28 = vand.u32 4294901760, %v6914_v27 }
0x20fd   :  { %11437 = vmatmul.mubr.f32.vlgmr.msra.gmra.mrb[26].mxu1 %v6915_v28 }
0x20fe   :  { %12282 = vmatpush3.bf16.msra.mxu1 %v13679_v8  ;;  %11447 = vmatprep.mubr.msk.f32.mxu1 %vm12980_vm0, %v12981_v1 }
0x20ff   :  { %12283 = vmatprep.subr.bf16.mxu1 %v12979_v0 }
0x2102   :  { %12285 = vmatpush3.bf16.msra.mxu1 %v13687_v18 }
0x2103   :  { %12286 = vmatprep.subr.bf16.mxu1 %v12979_v0 }
0x2105   :  { %11448 = vmatmul.mubr.f32.vlgmr.msra.gmra.mrb[26].mxu1 %v6911_v15 }
0x2106   :  { %12288 = vmatpush3.bf16.msra.mxu1 %v13685_v13  ;;  %11458 = vmatprep.mubr.msk.f32.mxu1 %vm12980_vm0, %v12981_v1 }
0x2107   :  { %12289 = vmatprep.subr.bf16.mxu1 %v12979_v0 }
0x210a   :  { %12291 = vmatpush3.bf16.msra.mxu1 %v13690_v22 }
0x210b   :  { %12292 = vmatprep.subr.bf16.mxu1 %v12979_v0 }
0x210d   :  { %11459 = vmatmul.mubr.f32.vlgmr.msra.gmra.mrb[26].mxu1 %v6912_v16 }
0x210e   :  { %12294 = vmatpush3.bf16.msra.mxu1 %v13666_v53  ;;  %11469 = vmatprep.mubr.msk.f32.mxu1 %vm12980_vm0, %v12981_v1 }
0x210f   :  { %12295 = vmatprep.subr.bf16.mxu1 %v12979_v0 }
0x2112   :  { %12297 = vmatpush3.bf16.msra.mxu1 %v13675_v57 }
0x2113   :  { %12298 = vmatprep.subr.bf16.mxu1 %v12979_v0 }
0x2115   :  { %11470 = vmatmul.mubr.f32.vlgmr.msra.gmra.mrb[26].mxu1 %v6913_v25 }
0x2116   :  { %12300 = vmatpush3.bf16.msra.mxu1 %v13696_v23  ;;  %11480 = vmatprep.mubr.msk.f32.mxu1 %vm12980_vm0, %v12981_v1 }
0x2117   :  { %12301 = vmatprep.subr.bf16.mxu1 %v12979_v0 }
0x211a   :  { %12303 = vmatpush3.bf16.msra.mxu1 %v13701_v24 }
0x211b   :  { %12304 = vmatprep.subr.bf16.mxu1 %v12979_v0 }
0x211d   :  { %11481 = vmatmul.mubr.f32.vlgmr.msra.gmra.mrb[26].mxu1 %v6911_v15 }
0x211e   :  { %12306 = vmatpush3.bf16.msra.mxu1 %v13666_v53  ;;  %11491 = vmatprep.mubr.msk.f32.mxu1 %vm12980_vm0, %v12981_v1 }
0x211f   :  { %12307 = vmatprep.subr.bf16.mxu1 %v12979_v0 }
0x2122   :  { %12309 = vmatpush3.bf16.msra.mxu1 %v13675_v57 }
0x2123   :  { %12346 = vmatprep.subr.bf16.mxu1 %v12979_v0 }
0x2125   :  { %11492 = vmatmul.mubr.f32.vlgmr.msra.gmra.mrb[26].mxu1 %v6911_v15 }
0x2126   :  { %12348 = vmatpush3.bf16.msra.mxu1 %v13666_v53  ;;  %11568 = vmatprep.mubr.msk.f32.mxu1 %vm12980_vm0, %v12981_v1 }
0x2127   :  { %12349 = vmatprep.subr.bf16.mxu1 %v12979_v0 }
0x212a   :  { %12351 = vmatpush3.bf16.msra.mxu1 %v13675_v57 }
0x212b   :  { %12352 = vmatprep.subr.bf16.mxu1 %v12979_v0 }
0x21f8   :  { %v7323_v3 = vpop.f32.mrb[26].mxu1 }
0x21f9   :  { %v7328_v29 = vrot.slane %v7323_v3, 5  ;;  %v11493_v32 = vpop.f32.mrb[27].mxu1 }
0x21fb   :  { %v7330_v33 = vadd.f32 %v13782_v49, %v7328_v29 }
0x21fd   :  { %12765 = vtanh.f32 %v7330_v33  ;;  %v10029_v35 = vmul.f32 -1.442695, %v7330_v33 }
0x21ff   :  { %12767 = vpow2.f32 %v10029_v35 }
0x2207   :  { %v12766_v34 = vpop.eup %12765 }
0x2208   :  { %7343 = vrot.lane.b32.xlu0 %v12766_v34, %s12982_s26 }
0x2209   :  { %v12768_v9 = vpop.eup %12767 }
0x220a   :  { %v7334_v10 = vadd.f32 1.0, %v12768_v9 }
0x220c   :  { %12769 = vrcp.f32 %v7334_v10 }
0x2216   :  { %v12770_v11 = vpop.eup %12769 }
0x2217   :  { %v7341_v31 = vmul.f32 %v12770_v11, %v7339_v21 }
0x227a   :  { %v7344_v19 = vpop.permute.xlu0 %7343 }
0x227b   :  { %v7346_v20 = vmul.f32 %v12770_v11, %v7344_v19 }
0x227d   :  { %7348 = vrot.lane.b32.xlu1 %v7346_v20, %s12983_s5 }
0x22ef   :  { %v7349_v36 = vpop.permute.xlu1 %7348 }
0x22f0   :  { %v13937_v37 = vadd.f32 %v7349_v36, %v7341_v31 }
0x22f2   :  { %12771 = vtanh.f32 %v13937_v37  ;;  %v7861_v60 = vrot.slane %v13937_v37, 7 }
0x22fc   :  { %v12772_v38 = vpop.eup %12771 }
0x22fd   :  { %7354 = vrot.lane.b32.xlu0 %v12772_v38, %s12982_s26 }
0x236f   :  { %v7355_v39 = vpop.permute.xlu0 %7354 }
0x2370   :  { %v7357_v40 = vmul.f32 %v12770_v11, %v7355_v39 }
0x2372   :  { %v7359_v41 = vrot.slane %v7357_v40, 3  ;;  %v13943_v43 = vsel %vm4748_vm5, %v13893_v7, %v7357_v40 }
0x2374   :  { %7360 = vrot.lane.b32.xlu1 %v7359_v41, %s12983_s5 }
0x23e6   :  { %v7361_v44 = vpop.permute.xlu1 %7360 }
0x23e7   :  { %v7362_v45 = vsel %vm573_vm2, %v7361_v44, 0 }
0x23e8   :  { %v7433_v46 = vand.u32 4294901760, %v7362_v45 }
0x23ea   :  { %v7434_v47 = vsub.f32 %v7362_v45, %v7433_v46 }
0x23ec   :  { %v7435_v50 = vand.u32 4294901760, %v7434_v47 }
0x23ee   :  { %v7436_v51 = vsub.f32 %v7434_v47, %v7435_v50 }
0x23f0   :  { %v7437_v52 = vand.u32 4294901760, %v7436_v51 }
0x23f2   :  { %11503 = vmatmul.mubr.f32.vlgmr.msra.gmra.mrb[22].mxu0 %v7437_v52 }
0x23f3   :  { %12318 = vmatpush3.bf16.msra.mxu0 %v13679_v8  ;;  %11513 = vmatprep.mubr.msk.f32.mxu0 %vm12980_vm0, %v12981_v1 }
0x23f4   :  { %12319 = vmatprep.subr.bf16.mxu0 %v12979_v0 }
0x23f7   :  { %12321 = vmatpush3.bf16.msra.mxu0 %v13687_v18 }
0x23f8   :  { %12322 = vmatprep.subr.bf16.mxu0 %v12979_v0 }
0x23fa   :  { %11514 = vmatmul.mubr.f32.vlgmr.msra.gmra.mrb[22].mxu0 %v7433_v46 }
0x23fb   :  { %12324 = vmatpush3.bf16.msra.mxu0 %v13685_v13  ;;  %11524 = vmatprep.mubr.msk.f32.mxu0 %vm12980_vm0, %v12981_v1 }
0x23fc   :  { %12325 = vmatprep.subr.bf16.mxu0 %v12979_v0 }
0x23ff   :  { %12327 = vmatpush3.bf16.msra.mxu0 %v13690_v22 }
0x2400   :  { %12328 = vmatprep.subr.bf16.mxu0 %v12979_v0 }
0x2402   :  { %11525 = vmatmul.mubr.f32.vlgmr.msra.gmra.mrb[22].mxu0 %v7434_v47 }
0x2403   :  { %12330 = vmatpush3.bf16.msra.mxu0 %v13666_v53  ;;  %11535 = vmatprep.mubr.msk.f32.mxu0 %vm12980_vm0, %v12981_v1 }
0x2404   :  { %12331 = vmatprep.subr.bf16.mxu0 %v12979_v0 }
0x2407   :  { %12333 = vmatpush3.bf16.msra.mxu0 %v13675_v57 }
0x2408   :  { %12334 = vmatprep.subr.bf16.mxu0 %v12979_v0 }
0x240a   :  { %11536 = vmatmul.mubr.f32.vlgmr.msra.gmra.mrb[22].mxu0 %v7435_v50 }
0x240b   :  { %12336 = vmatpush3.bf16.msra.mxu0 %v13696_v23  ;;  %11546 = vmatprep.mubr.msk.f32.mxu0 %vm12980_vm0, %v12981_v1 }
0x240c   :  { %12337 = vmatprep.subr.bf16.mxu0 %v12979_v0 }
0x240f   :  { %12339 = vmatpush3.bf16.msra.mxu0 %v13701_v24 }
0x2410   :  { %12340 = vmatprep.subr.bf16.mxu0 %v12979_v0 }
0x2412   :  { %11547 = vmatmul.mubr.f32.vlgmr.msra.gmra.mrb[22].mxu0 %v7433_v46 }
0x2413   :  { %12342 = vmatpush3.bf16.msra.mxu0 %v13666_v53  ;;  %11557 = vmatprep.mubr.msk.f32.mxu0 %vm12980_vm0, %v12981_v1 }
0x2414   :  { %12343 = vmatprep.subr.bf16.mxu0 %v12979_v0 }
0x2417   :  { %12345 = vmatpush3.bf16.msra.mxu0 %v13675_v57 }
0x2418   :  { %12382 = vmatprep.subr.bf16.mxu0 %v12979_v0 }
0x241a   :  { %11558 = vmatmul.mubr.f32.vlgmr.msra.gmra.mrb[22].mxu0 %v7433_v46 }
0x241b   :  { %12384 = vmatpush3.bf16.msra.mxu0 %v13666_v53  ;;  %11634 = vmatprep.mubr.msk.f32.mxu0 %vm12980_vm0, %v12981_v1 }
0x241c   :  { %12385 = vmatprep.subr.bf16.mxu0 %v12979_v0 }
0x241f   :  { %12387 = vmatpush3.bf16.msra.mxu0 %v13675_v57 }
0x2420   :  { %12388 = vmatprep.subr.bf16.mxu0 %v12979_v0 }
0x24ed   :  { %v7845_v42 = vpop.f32.mrb[22].mxu0 }
0x24ee   :  { %v7850_v55 = vrot.slane %v7845_v42, 4  ;;  %v11559_v58 = vpop.f32.mrb[23].mxu0 }
0x24f0   :  { %v7852_v59 = vadd.f32 %v13782_v49, %v7850_v55 }
0x24f2   :  { %12773 = vtanh.f32 %v7852_v59  ;;  %v10030_v26 = vmul.f32 -1.442695, %v7852_v59 }
0x24f4   :  { %12775 = vpow2.f32 %v10030_v26 }
0x24fc   :  { %v12774_v61 = vpop.eup %12773 }
0x24fd   :  { %7865 = vrot.lane.b32.xlu0 %v12774_v61, %s12982_s26 }
0x24fe   :  { %v12776_v62 = vpop.eup %12775 }
0x24ff   :  { %v7856_v63 = vadd.f32 1.0, %v12776_v62 }
0x2501   :  { %12777 = vrcp.f32 %v7856_v63 }
0x250b   :  { %v12778_v54 = vpop.eup %12777 }
0x250c   :  { %v7863_v2 = vmul.f32 %v12778_v54, %v7861_v60 }
0x256f   :  { %v7866_v48 = vpop.permute.xlu0 %7865 }
0x2570   :  { %v7868_v56 = vmul.f32 %v12778_v54, %v7866_v48 }
0x2572   :  { %7870 = vrot.lane.b32.xlu1 %v7868_v56, %s12983_s5 }
0x25e4   :  { %v7871_v17 = vpop.permute.xlu1 %7870 }
0x25e5   :  { %v13987_v5 = vadd.f32 %v7871_v17, %v7863_v2 }
0x25e7   :  { %12779 = vtanh.f32 %v13987_v5  ;;  %v8383_v37 = vrot.slane %v13987_v5, 7 }
0x25f1   :  { %v12780_v6 = vpop.eup %12779 }
0x25f2   :  { %7876 = vrot.lane.b32.xlu0 %v12780_v6, %s12982_s26 }
0x2664   :  { %v7877_v7 = vpop.permute.xlu0 %7876 }
0x2665   :  { %v7879_v12 = vmul.f32 %v12778_v54, %v7877_v7 }
0x2667   :  { %v7881_v14 = vrot.slane %v7879_v12, 4  ;;  %v13993_v15 = vsel %vm4750_vm6, %v13943_v43, %v7879_v12 }
0x2669   :  { %7882 = vrot.lane.b32.xlu1 %v7881_v14, %s12983_s5 }
0x26db   :  { %v7883_v16 = vpop.permute.xlu1 %7882 }
0x26dc   :  { %v7884_v25 = vsel %vm573_vm2, %v7883_v16, 0 }
0x26dd   :  { %v7955_v27 = vand.u32 4294901760, %v7884_v25 }
0x26df   :  { %v7956_v28 = vsub.f32 %v7884_v25, %v7955_v27 }
0x26e1   :  { %v7957_v3 = vand.u32 4294901760, %v7956_v28 }
0x26e3   :  { %v7958_v29 = vsub.f32 %v7956_v28, %v7957_v3 }
0x26e5   :  { %v7959_v32 = vand.u32 4294901760, %v7958_v29 }
0x26e7   :  { %11569 = vmatmul.mubr.f32.vlgmr.msra.gmra.mrb[28].mxu1 %v7959_v32 }
0x26e8   :  { %12354 = vmatpush3.bf16.msra.mxu1 %v13679_v8  ;;  %11579 = vmatprep.mubr.msk.f32.mxu1 %vm12980_vm0, %v12981_v1 }
0x26e9   :  { %12355 = vmatprep.subr.bf16.mxu1 %v12979_v0 }
0x26ec   :  { %12357 = vmatpush3.bf16.msra.mxu1 %v13687_v18 }
0x26ed   :  { %12358 = vmatprep.subr.bf16.mxu1 %v12979_v0 }
0x26ef   :  { %11580 = vmatmul.mubr.f32.vlgmr.msra.gmra.mrb[28].mxu1 %v7955_v27 }
0x26f0   :  { %12360 = vmatpush3.bf16.msra.mxu1 %v13685_v13  ;;  %11590 = vmatprep.mubr.msk.f32.mxu1 %vm12980_vm0, %v12981_v1 }
0x26f1   :  { %12361 = vmatprep.subr.bf16.mxu1 %v12979_v0 }
0x26f4   :  { %12363 = vmatpush3.bf16.msra.mxu1 %v13690_v22 }
0x26f5   :  { %12364 = vmatprep.subr.bf16.mxu1 %v12979_v0 }
0x26f7   :  { %11591 = vmatmul.mubr.f32.vlgmr.msra.gmra.mrb[28].mxu1 %v7956_v28 }
0x26f8   :  { %12366 = vmatpush3.bf16.msra.mxu1 %v13666_v53  ;;  %11601 = vmatprep.mubr.msk.f32.mxu1 %vm12980_vm0, %v12981_v1 }
0x26f9   :  { %12367 = vmatprep.subr.bf16.mxu1 %v12979_v0 }
0x26fc   :  { %12369 = vmatpush3.bf16.msra.mxu1 %v13675_v57 }
0x26fd   :  { %12370 = vmatprep.subr.bf16.mxu1 %v12979_v0 }
0x26ff   :  { %11602 = vmatmul.mubr.f32.vlgmr.msra.gmra.mrb[28].mxu1 %v7957_v3 }
0x2700   :  { %12372 = vmatpush3.bf16.msra.mxu1 %v13696_v23  ;;  %11612 = vmatprep.mubr.msk.f32.mxu1 %vm12980_vm0, %v12981_v1 }
0x2701   :  { %12373 = vmatprep.subr.bf16.mxu1 %v12979_v0 }
0x2704   :  { %12375 = vmatpush3.bf16.msra.mxu1 %v13701_v24 }
0x2705   :  { %12376 = vmatprep.subr.bf16.mxu1 %v12979_v0 }
0x2707   :  { %11613 = vmatmul.mubr.f32.vlgmr.msra.gmra.mrb[28].mxu1 %v7955_v27 }
0x2708   :  { %12378 = vmatpush3.bf16.msra.mxu1 %v13666_v53  ;;  %11623 = vmatprep.mubr.msk.f32.mxu1 %vm12980_vm0, %v12981_v1 }
0x2709   :  { %12379 = vmatprep.subr.bf16.mxu1 %v12979_v0 }
0x270c   :  { %12381 = vmatpush3.bf16.msra.mxu1 %v13675_v57 }
0x270d   :  { %12418 = vmatprep.subr.bf16.mxu1 %v12979_v0 }
0x270f   :  { %11624 = vmatmul.mubr.f32.vlgmr.msra.gmra.mrb[28].mxu1 %v7955_v27 }
0x2710   :  { %12420 = vmatpush3.bf16.msra.mxu1 %v13666_v53  ;;  %11700 = vmatprep.mubr.msk.f32.mxu1 %vm12980_vm0, %v12981_v1 }
0x2711   :  { %12421 = vmatprep.subr.bf16.mxu1 %v12979_v0 }
0x2714   :  { %12423 = vmatpush3.bf16.msra.mxu1 %v13675_v57 }
0x2715   :  { %12424 = vmatprep.subr.bf16.mxu1 %v12979_v0 }
0x27e2   :  { %v8367_v33 = vpop.f32.mrb[28].mxu1 }
0x27e3   :  { %v8372_v34 = vrot.slane %v8367_v33, 3  ;;  %v11625_v35 = vpop.f32.mrb[29].mxu1 }
0x27e5   :  { %v8374_v9 = vadd.f32 %v13782_v49, %v8372_v34 }
0x27e7   :  { %12781 = vtanh.f32 %v8374_v9  ;;  %v10031_v11 = vmul.f32 -1.442695, %v8374_v9 }
0x27e9   :  { %12783 = vpow2.f32 %v10031_v11 }
0x27f1   :  { %v12782_v10 = vpop.eup %12781 }
0x27f2   :  { %8387 = vrot.lane.b32.xlu0 %v12782_v10, %s12982_s26 }
0x27f3   :  { %v12784_v19 = vpop.eup %12783 }
0x27f4   :  { %v8378_v20 = vadd.f32 1.0, %v12784_v19 }
0x27f6   :  { %12785 = vrcp.f32 %v8378_v20 }
0x2800   :  { %v12786_v21 = vpop.eup %12785 }
0x2801   :  { %v8385_v38 = vmul.f32 %v12786_v21, %v8383_v37  ;;  %v9464_v37 = vld [vmem:[%s14232_s9 + $0x8] sm:$0xff] }
0x2864   :  { %v8388_v31 = vpop.permute.xlu0 %8387 }
0x2865   :  { %v8390_v36 = vmul.f32 %v12786_v21, %v8388_v31 }
0x2867   :  { %8392 = vrot.lane.b32.xlu1 %v8390_v36, %s12983_s5  ;;  %v9463_v36 = vld [vmem:[%s14232_s9] sm:$0xff] }
0x28d9   :  { %v8393_v39 = vpop.permute.xlu1 %8392 }
0x28da   :  { %v14037_v40 = vadd.f32 %v8393_v39, %v8385_v38  ;;  %v9480_v38 = vand.u32 4294901760, %v9463_v36  ;;  %v9483_v39 = vand.u32 4294901760, %v9464_v37 }
0x28dc   :  { %12787 = vtanh.f32 %v14037_v40  ;;  %v8905_v5 = vrot.slane %v14037_v40, 7  ;;  %v14137_v40 = vpack.c.bf16 %v9483_v39, %v9480_v38 }
0x28e6   :  { %v12788_v41 = vpop.eup %12787 }
0x28e7   :  { %8398 = vrot.lane.b32.xlu0 %v12788_v41, %s12982_s26  ;;  %v9560_v41 = vsub.f32 %v9463_v36, %v9480_v38 }
0x2959   :  { %v8399_v43 = vpop.permute.xlu0 %8398 }
0x295a   :  { %v8401_v44 = vmul.f32 %v12786_v21, %v8399_v43  ;;  %v9567_v43 = vsub.f32 %v9464_v37, %v9483_v39 }
0x295c   :  { %v8403_v45 = vrot.slane %v8401_v44, 5  ;;  %v14043_v46 = vsel %vm4752_vm7, %v13993_v15, %v8401_v44 }
0x295e   :  { %8404 = vrot.lane.b32.xlu1 %v8403_v45, %s12983_s5 }
0x29d0   :  { %v8405_v47 = vpop.permute.xlu1 %8404 }
0x29d1   :  { %v8406_v50 = vsel %vm573_vm2, %v8405_v47, 0  ;;  %v9568_v47 = vand.u32 4294901760, %v9567_v43 }
0x29d2   :  { %v8477_v51 = vand.u32 4294901760, %v8406_v50 }
0x29d4   :  { %v8478_v52 = vsub.f32 %v8406_v50, %v8477_v51 }
0x29d6   :  { %v8479_v42 = vand.u32 4294901760, %v8478_v52 }
0x29d8   :  { %v8480_v55 = vsub.f32 %v8478_v52, %v8479_v42 }
0x29da   :  { %v8481_v58 = vand.u32 4294901760, %v8480_v55  ;;  %v9569_v55 = vsub.f32 %v9567_v43, %v9568_v47 }
0x29dc   :  { %11635 = vmatmul.mubr.f32.vlgmr.msra.gmra.mrb[24].mxu0 %v8481_v58 }
0x29dd   :  { %12390 = vmatpush3.bf16.msra.mxu0 %v13679_v8  ;;  %11645 = vmatprep.mubr.msk.f32.mxu0 %vm12980_vm0, %v12981_v1 }
0x29de   :  { %12391 = vmatprep.subr.bf16.mxu0 %v12979_v0 }
0x29e1   :  { %12393 = vmatpush3.bf16.msra.mxu0 %v13687_v18 }
0x29e2   :  { %12394 = vmatprep.subr.bf16.mxu0 %v12979_v0 }
0x29e4   :  { %11646 = vmatmul.mubr.f32.vlgmr.msra.gmra.mrb[24].mxu0 %v8477_v51 }
0x29e5   :  { %12396 = vmatpush3.bf16.msra.mxu0 %v13685_v13  ;;  %11656 = vmatprep.mubr.msk.f32.mxu0 %vm12980_vm0, %v12981_v1 }
0x29e6   :  { %12397 = vmatprep.subr.bf16.mxu0 %v12979_v0 }
0x29e9   :  { %12399 = vmatpush3.bf16.msra.mxu0 %v13690_v22 }
0x29ea   :  { %12400 = vmatprep.subr.bf16.mxu0 %v12979_v0 }
0x29ec   :  { %11657 = vmatmul.mubr.f32.vlgmr.msra.gmra.mrb[24].mxu0 %v8478_v52 }
0x29ed   :  { %12402 = vmatpush3.bf16.msra.mxu0 %v13666_v53  ;;  %11667 = vmatprep.mubr.msk.f32.mxu0 %vm12980_vm0, %v12981_v1 }
0x29ee   :  { %12403 = vmatprep.subr.bf16.mxu0 %v12979_v0 }
0x29f1   :  { %12405 = vmatpush3.bf16.msra.mxu0 %v13675_v57 }
0x29f2   :  { %12406 = vmatprep.subr.bf16.mxu0 %v12979_v0 }
0x29f4   :  { %11668 = vmatmul.mubr.f32.vlgmr.msra.gmra.mrb[24].mxu0 %v8479_v42 }
0x29f5   :  { %12408 = vmatpush3.bf16.msra.mxu0 %v13696_v23  ;;  %11678 = vmatprep.mubr.msk.f32.mxu0 %vm12980_vm0, %v12981_v1 }
0x29f6   :  { %12409 = vmatprep.subr.bf16.mxu0 %v12979_v0 }
0x29f9   :  { %12411 = vmatpush3.bf16.msra.mxu0 %v13701_v24 }
0x29fa   :  { %12412 = vmatprep.subr.bf16.mxu0 %v12979_v0 }
0x29fc   :  { %11679 = vmatmul.mubr.f32.vlgmr.msra.gmra.mrb[24].mxu0 %v8477_v51 }
0x29fd   :  { %12414 = vmatpush3.bf16.msra.mxu0 %v13666_v53  ;;  %11689 = vmatprep.mubr.msk.f32.mxu0 %vm12980_vm0, %v12981_v1 }
0x29fe   :  { %12415 = vmatprep.subr.bf16.mxu0 %v12979_v0 }
0x2a01   :  { %12417 = vmatpush3.bf16.msra.mxu0 %v13675_v57 }
0x2a02   :  { %12454 = vmatprep.subr.bf16.mxu0 %v12979_v0 }
0x2a04   :  { %11690 = vmatmul.mubr.f32.vlgmr.msra.gmra.mrb[24].mxu0 %v8477_v51 }
0x2a05   :  { %11766 = vmatprep.mubr.msk.f32.mxu0 %vm12980_vm0, %v12981_v1  ;;  %12456 = vmatpush3.bf16.msra.mxu0 %v14137_v40 }
0x2a06   :  { %12457 = vmatprep.subr.bf16.mxu0 %v12979_v0 }
0x2ad7   :  { %v8889_v59 = vpop.f32.mrb[24].mxu0 }
0x2ad8   :  { %v8894_v61 = vrot.slane %v8889_v59, 2  ;;  %v11691_v26 = vpop.f32.mrb[25].mxu0 }
0x2ada   :  { %v8896_v62 = vadd.f32 %v13782_v49, %v8894_v61 }
0x2adc   :  { %12789 = vtanh.f32 %v8896_v62  ;;  %v10032_v54 = vmul.f32 -1.442695, %v8896_v62  ;;  %v9570_v62 = vand.u32 4294901760, %v9569_v55 }
0x2ade   :  { %12791 = vpow2.f32 %v10032_v54 }
0x2ae6   :  { %v12790_v63 = vpop.eup %12789 }
0x2ae7   :  { %8909 = vrot.lane.b32.xlu0 %v12790_v63, %s12982_s26 }
0x2ae8   :  { %v12792_v48 = vpop.eup %12791 }
0x2ae9   :  { %v8900_v56 = vadd.f32 1.0, %v12792_v48 }
0x2aeb   :  { %12793 = vrcp.f32 %v8900_v56 }
0x2af5   :  { %v12794_v60 = vpop.eup %12793 }
0x2af6   :  { %v8907_v6 = vmul.f32 %v12794_v60, %v8905_v5 }
0x2b59   :  { %v8910_v2 = vpop.permute.xlu0 %8909 }
0x2b5a   :  { %v8912_v17 = vmul.f32 %v12794_v60, %v8910_v2 }
0x2b5c   :  { %8914 = vrot.lane.b32.xlu1 %v8912_v17, %s12983_s5 }
0x2bce   :  { %v8915_v7 = vpop.permute.xlu1 %8914 }
0x2bcf   :  { %v14083_v12 = vadd.f32 %v8915_v7, %v8907_v6 }
0x2bd1   :  { %12795 = vtanh.f32 %v14083_v12 }
0x2bdb   :  { %v12796_v14 = vpop.eup %12795 }
0x2bdc   :  { %8920 = vrot.lane.b32.xlu0 %v12796_v14, %s12982_s26 }
0x2c4e   :  { %v8921_v15 = vpop.permute.xlu0 %8920 }
0x2c4f   :  { %v8923_v16 = vmul.f32 %v12794_v60, %v8921_v15 }
0x2c51   :  { %v8925_v25 = vrot.slane %v8923_v16, 6  ;;  %v14089_v27 = vsel %vm4754_vm8, %v14043_v46, %v8923_v16  ;;  %v9561_v46 = vand.u32 4294901760, %v9560_v41 }
0x2c53   :  { %8926 = vrot.lane.b32.xlu1 %v8925_v25, %s12983_s5  ;;  %v9562_v42 = vsub.f32 %v9560_v41, %v9561_v46  ;;  %v12479_v15 = vpack.c.bf16 %v9568_v47, %v9561_v46 }
0x2c55   :  { %v9563_v58 = vand.u32 4294901760, %v9562_v42 }
0x2c57   :  { %v12461_v56 = vpack.c.bf16 %v9570_v62, %v9563_v58 }
0x2cc5   :  { %v8927_v28 = vpop.permute.xlu1 %8926 }
0x2cc6   :  { %v8928_v3 = vsel %vm573_vm2, %v8927_v28, 0 }
0x2cc7   :  { %v8999_v29 = vand.u32 4294901760, %v8928_v3 }
0x2cc9   :  { %v9000_v32 = vsub.f32 %v8928_v3, %v8999_v29 }
0x2ccb   :  { %v9001_v33 = vand.u32 4294901760, %v9000_v32 }
0x2ccd   :  { %v9002_v34 = vsub.f32 %v9000_v32, %v9001_v33 }
0x2ccf   :  { %v9003_v35 = vand.u32 4294901760, %v9002_v34 }
0x2cd1   :  { %11701 = vmatmul.mubr.f32.vlgmr.msra.gmra.mrb[30].mxu1 %v9003_v35 }
0x2cd2   :  { %12426 = vmatpush3.bf16.msra.mxu1 %v13679_v8  ;;  %11711 = vmatprep.mubr.msk.f32.mxu1 %vm12980_vm0, %v12981_v1 }
0x2cd3   :  { %12427 = vmatprep.subr.bf16.mxu1 %v12979_v0 }
0x2cd6   :  { %12429 = vmatpush3.bf16.msra.mxu1 %v13687_v18 }
0x2cd7   :  { %12430 = vmatprep.subr.bf16.mxu1 %v12979_v0 }
0x2cd9   :  { %11712 = vmatmul.mubr.f32.vlgmr.msra.gmra.mrb[30].mxu1 %v8999_v29 }
0x2cda   :  { %12432 = vmatpush3.bf16.msra.mxu1 %v13685_v13  ;;  %11722 = vmatprep.mubr.msk.f32.mxu1 %vm12980_vm0, %v12981_v1 }
0x2cdb   :  { %12433 = vmatprep.subr.bf16.mxu1 %v12979_v0 }
0x2cde   :  { %12435 = vmatpush3.bf16.msra.mxu1 %v13690_v22 }
0x2cdf   :  { %12436 = vmatprep.subr.bf16.mxu1 %v12979_v0 }
0x2ce1   :  { %11723 = vmatmul.mubr.f32.vlgmr.msra.gmra.mrb[30].mxu1 %v9000_v32 }
0x2ce2   :  { %12438 = vmatpush3.bf16.msra.mxu1 %v13666_v53  ;;  %11733 = vmatprep.mubr.msk.f32.mxu1 %vm12980_vm0, %v12981_v1 }
0x2ce3   :  { %12439 = vmatprep.subr.bf16.mxu1 %v12979_v0 }
0x2ce6   :  { %12441 = vmatpush3.bf16.msra.mxu1 %v13675_v57 }
0x2ce7   :  { %12442 = vmatprep.subr.bf16.mxu1 %v12979_v0 }
0x2ce9   :  { %11734 = vmatmul.mubr.f32.vlgmr.msra.gmra.mrb[30].mxu1 %v9001_v33 }
0x2cea   :  { %12444 = vmatpush3.bf16.msra.mxu1 %v13696_v23  ;;  %11744 = vmatprep.mubr.msk.f32.mxu1 %vm12980_vm0, %v12981_v1 }
0x2ceb   :  { %12445 = vmatprep.subr.bf16.mxu1 %v12979_v0 }
0x2cee   :  { %12447 = vmatpush3.bf16.msra.mxu1 %v13701_v24 }
0x2cef   :  { %12448 = vmatprep.subr.bf16.mxu1 %v12979_v0 }
0x2cf1   :  { %11745 = vmatmul.mubr.f32.vlgmr.msra.gmra.mrb[30].mxu1 %v8999_v29 }
0x2cf2   :  { %12450 = vmatpush3.bf16.msra.mxu1 %v13666_v53  ;;  %11755 = vmatprep.mubr.msk.f32.mxu1 %vm12980_vm0, %v12981_v1 }
0x2cf3   :  { %12451 = vmatprep.subr.bf16.mxu1 %v12979_v0 }
0x2cf6   :  { %12453 = vmatpush3.bf16.msra.mxu1 %v13675_v57  ;;  %v9427_v57 = vrot.slane %v14083_v12, 7  ;;  %v12467_v12 = vpack.c.bf16 %v9567_v43, %v9560_v41 }
0x2cf9   :  { %11756 = vmatmul.mubr.f32.vlgmr.msra.gmra.mrb[30].mxu1 %v8999_v29 }
0x2dcc   :  { %v9411_v8 = vpop.f32.mrb[30].mxu1 }
0x2dcd   :  { %v9416_v13 = vrot.slane %v9411_v8, 1  ;;  %v11757_v18 = vpop.f32.mrb[31].mxu1 }
0x2dcf   :  { %v9418_v22 = vadd.f32 %v13782_v49, %v9416_v13 }
0x2dd1   :  { %12797 = vtanh.f32 %v9418_v22  ;;  %v10033_v24 = vmul.f32 -1.442695, %v9418_v22 }
0x2dd3   :  { %12799 = vpow2.f32 %v10033_v24 }
0x2ddb   :  { %v12798_v23 = vpop.eup %12797 }
0x2ddc   :  { %9431 = vrot.lane.b32.xlu0 %v12798_v23, %s12982_s26 }
0x2ddd   :  { %v12800_v53 = vpop.eup %12799 }
0x2dde   :  { %v9422_v9 = vadd.f32 1.0, %v12800_v53 }
0x2de0   :  { %12801 = vrcp.f32 %v9422_v9 }
0x2dea   :  { %v12802_v10 = vpop.eup %12801 }
0x2deb   :  { %v9429_v20 = vmul.f32 %v12802_v10, %v9427_v57 }
0x2e4e   :  { %v9432_v11 = vpop.permute.xlu0 %9431 }
0x2e4f   :  { %v9434_v19 = vmul.f32 %v12802_v10, %v9432_v11 }
0x2e51   :  { %9436 = vrot.lane.b32.xlu1 %v9434_v19, %s12983_s5 }
0x2ec3   :  { %v9437_v21 = vpop.permute.xlu1 %9436 }
0x2ec4   :  { %v9439_v31 = vadd.f32 %v9437_v21, %v9429_v20 }
0x2ec6   :  { %12803 = vtanh.f32 %v9439_v31 }
0x2ed0   :  { %v12804_v49 = vpop.eup %12803 }
0x2ed1   :  { %9442 = vrot.lane.b32.xlu0 %v12804_v49, %s12982_s26 }
0x2ed5   :  { %4759 = vrot.lane.b32.xlu0 %v13645_v30, %s12983_s5  ;;  %v9465_v30 = vld [vmem:[%s14232_s9 + $0x10] sm:$0xff] }
0x2ed6   :  { %v9486_v44 = vand.u32 4294901760, %v9465_v30 }
0x2ed8   :  { %v9574_v51 = vsub.f32 %v9465_v30, %v9486_v44 }
0x2ed9   :  { %4765 = vrot.lane.b32.xlu0 %v13619_v4, %s12984_s8  ;;  %v9466_v4 = vld [vmem:[%s14232_s9 + $0x18] sm:$0xff]  ;;  %s12985_s9 = smov [#allocation11]  }
0x2eda   :  { %v9489_v45 = vand.u32 4294901760, %v9466_v4  ;;  %v9575_v59 = vand.u32 4294901760, %v9574_v51  ;;  %s9988_s23 = sshll.u32 %s12985_s9, 4  ;;  %s9989_s23 = int_to_ptr.vmem [resolvable:$true] %s9988_s23 }
0x2edb   :  { %s12897_s24 = scalar_lea.vmem %s9989_s23, 32  ;;  %p12902_p5 = scmp.lt.s32.totalorder %s9989_s23, %s9989_s23 }
0x2edc   :  { %v14147_v50 = vpack.c.bf16 %v9489_v45, %v9486_v44  ;;  %v9581_v52 = vsub.f32 %v9466_v4, %v9489_v45  ;;  %v9576_v54 = vsub.f32 %v9574_v51, %v9575_v59  ;;  %p12898_p4 = scmp.ne.s32.totalorder %s9989_s23, %s12897_s24  ;;  %p12903_p6 = scmp.lt.s32.totalorder %s12897_s24, %s12897_s24 }
0x2ede   :  { %12459 = vmatpush3.bf16.msra.mxu0 %v14147_v50  ;;  %v9582_v61 = vand.u32 4294901760, %v9581_v52  ;;  %v9577_v2 = vand.u32 4294901760, %v9576_v54  ;;  %v12470_v14 = vpack.c.bf16 %v9581_v52, %v9574_v51  ;;  %p12904_p7 = por %p12903_p6, %p12902_p5 }
0x2edf   :  { %12460 = vmatprep.subr.bf16.mxu0 %v12979_v0 }
0x2ee0   :  { %v9583_v48 = vsub.f32 %v9581_v52, %v9582_v61  ;;  %v12482_v16 = vpack.c.bf16 %v9582_v61, %v9575_v59  ;;  %p12905_p8 = pnand %p12904_p7, %p12898_p4 }
0x2ee2   :  { %v9584_v17 = vand.u32 4294901760, %v9583_v48 }
0x2ee4   :  { %v12464_v6 = vpack.c.bf16 %v9584_v17, %v9577_v2 }
0x2f43   :  { %v9443_v26 = vpop.permute.xlu0 %9442 }
0x2f44   :  { %v9445_v63 = vmul.f32 %v12802_v10, %v9443_v26 }
0x2f46   :  { %v9452_v60 = vsel %vm4756_vm9, %v14089_v27, %v9445_v63 }
0x2f47   :  { %9475 = vrot.lane.b32.xlu1 %v9452_v60, %s12983_s5  ;;  %v4760_v5 = vpop.permute.xlu0 %4759 }
0x2f48   :  { %4763 = vst.msk [vmem:[#allocation11 - $0x7] sm:$0x80] %vm4762_vm10, %v4760_v5 }
0x2f4b   :  { %9454 = vrot.lane.b32.xlu1 %v9445_v63, %s12983_s5  ;;  %v4766_v7 = vpop.permute.xlu0 %4765 }
0x2f4c   :  { %4768 = vst.msk [vmem:[#allocation13 - $0x7] sm:$0x80] %vm4762_vm10, %v4766_v7 }
0x2f4f   :  { %9459 = vrot.lane.b32.xlu1 %v9439_v31, %s12984_s8 }
0x2fb9   :  { %v9476_v25 = vpop.permute.xlu1 %9475 }
0x2fba   :  { %v9477_v27 = vsel %vm573_vm2, %v9476_v25, 0 }
0x2fbb   :  { %v9548_v28 = vand.u32 4294901760, %v9477_v27 }
0x2fbd   :  { %v9549_v3 = vsub.f32 %v9477_v27, %v9548_v28  ;;  %v9455_v29 = vpop.permute.xlu1 %9454 }
0x2fbe   :  { %9457 = vst.msk [vmem:[#allocation11 - $0x6] sm:$0x80] %vm4762_vm10, %v9455_v29 }
0x2fbf   :  { %v9550_v32 = vand.u32 4294901760, %v9549_v3 }
0x2fc1   :  { %v9551_v33 = vsub.f32 %v9549_v3, %v9550_v32  ;;  %v9460_v34 = vpop.permute.xlu1 %9459 }
0x2fc2   :  { %9462 = vst.msk [vmem:[#allocation13 - $0x6] sm:$0x80] %vm4762_vm10, %v9460_v34 }
0x2fc3   :  { %v9552_v35 = vand.u32 4294901760, %v9551_v33 }
0x2fc5   :  { %11767 = vmatmul.mubr.f32.vlgmr.msra.gmra.mrb[26].mxu0 %v9552_v35 }
0x2fc6   :  { %12462 = vmatpush3.bf16.msra.mxu0 %v12461_v56  ;;  %11777 = vmatprep.mubr.msk.f32.mxu0 %vm12980_vm0, %v12981_v1 }
0x2fc7   :  { %12463 = vmatprep.subr.bf16.mxu0 %v12979_v0 }
0x2fca   :  { %12465 = vmatpush3.bf16.msra.mxu0 %v12464_v6 }
0x2fcb   :  { %12466 = vmatprep.subr.bf16.mxu0 %v12979_v0 }
0x2fcd   :  { %11778 = vmatmul.mubr.f32.vlgmr.msra.gmra.mrb[26].mxu0 %v9548_v28 }
0x2fce   :  { %12468 = vmatpush3.bf16.msra.mxu0 %v12467_v12  ;;  %11788 = vmatprep.mubr.msk.f32.mxu0 %vm12980_vm0, %v12981_v1 }
0x2fcf   :  { %12469 = vmatprep.subr.bf16.mxu0 %v12979_v0 }
0x2fd2   :  { %12471 = vmatpush3.bf16.msra.mxu0 %v12470_v14 }
0x2fd3   :  { %12472 = vmatprep.subr.bf16.mxu0 %v12979_v0 }
0x2fd5   :  { %11789 = vmatmul.mubr.f32.vlgmr.msra.gmra.mrb[26].mxu0 %v9549_v3 }
0x2fd6   :  { %12474 = vmatpush3.bf16.msra.mxu0 %v14137_v40  ;;  %11799 = vmatprep.mubr.msk.f32.mxu0 %vm12980_vm0, %v12981_v1 }
0x2fd7   :  { %12475 = vmatprep.subr.bf16.mxu0 %v12979_v0 }
0x2fda   :  { %12477 = vmatpush3.bf16.msra.mxu0 %v14147_v50 }
0x2fdb   :  { %12478 = vmatprep.subr.bf16.mxu0 %v12979_v0 }
0x2fdd   :  { %11800 = vmatmul.mubr.f32.vlgmr.msra.gmra.mrb[26].mxu0 %v9550_v32 }
0x2fde   :  { %12480 = vmatpush3.bf16.msra.mxu0 %v12479_v15  ;;  %11810 = vmatprep.mubr.msk.f32.mxu0 %vm12980_vm0, %v12981_v1 }
0x2fdf   :  { %12481 = vmatprep.subr.bf16.mxu0 %v12979_v0 }
0x2fe2   :  { %12483 = vmatpush3.bf16.msra.mxu0 %v12482_v16 }
0x2fe3   :  { %12484 = vmatprep.subr.bf16.mxu0 %v12979_v0 }
0x2fe5   :  { %11811 = vmatmul.mubr.f32.vlgmr.msra.gmra.mrb[26].mxu0 %v9548_v28 }
0x2fe6   :  { %12486 = vmatpush3.bf16.msra.mxu0 %v14137_v40  ;;  %11821 = vmatprep.mubr.msk.f32.mxu0 %vm12980_vm0, %v12981_v1 }
0x2fe7   :  { %12487 = vmatprep.subr.bf16.mxu0 %v12979_v0 }
0x2fea   :  { %12489 = vmatpush3.bf16.msra.mxu0 %v14147_v50 }
0x2fed   :  { %11822 = vmatmul.mubr.f32.vlgmr.msra.gmra.mrb[26].mxu0 %v9548_v28 }
0x2fee   :  { %12908 = shalt.err (!%p12905_p8)
}
0x2fef   :  { %s12909_s25 = scalar_lea.hbm %s14235_s12, 32 }
0x2ff0   :  { %p12910_p9 = scmp.ne.s32.totalorder %s14235_s12, %s12909_s25  ;;  %p12913_p10 = scmp.lt.u32.totalorder %s12909_s25, %s14235_s12 }
0x2ff2   :  { %p12915_p11 = pnand %p12913_p10, %p12910_p9 }
0x2ff4   :  { %12918 = shalt.err (!%p12915_p11)
}
0x2ff5   :  { %9991 = dma.vmem_to_hbm [thread:$0]  %s9989_s23, 32, %s14235_s12, [#allocation12]  }
0x2ff6   :  { %s12986_s4 = smov [#allocation13]  }
0x2ff7   :  { %s9998_s2 = sshll.u32 %s12986_s4, 4  ;;  %s9999_s2 = int_to_ptr.vmem [resolvable:$true] %s9998_s2 }
0x2ff8   :  { %s12919_s26 = scalar_lea.vmem %s9999_s2, 32  ;;  %p12924_p13 = scmp.lt.s32.totalorder %s9999_s2, %s9999_s2 }
0x2ff9   :  { %p12920_p12 = scmp.ne.s32.totalorder %s9999_s2, %s12919_s26  ;;  %p12925_p0 = scmp.lt.s32.totalorder %s12919_s26, %s12919_s26 }
0x2ffb   :  { %p12926_p1 = por %p12925_p0, %p12924_p13 }
0x2ffd   :  { %p12927_p2 = pnand %p12926_p1, %p12920_p12 }
0x2fff   :  { %12930 = shalt.err (!%p12927_p2)
}
0x3000   :  { %s12931_s17 = scalar_lea.hbm %s14236_s13, 32 }
0x3001   :  { %p12932_p3 = scmp.ne.s32.totalorder %s14236_s13, %s12931_s17  ;;  %p12935_p4 = scmp.lt.u32.totalorder %s12931_s17, %s14236_s13 }
0x3003   :  { %p12937_p5 = pnand %p12935_p4, %p12932_p3 }
0x3005   :  { %12940 = shalt.err (!%p12937_p5)
}
0x3006   :  { %10001 = dma.vmem_to_hbm [thread:$0]  %s9999_s2, 32, %s14236_s13, [#allocation12]   ;;  %v10034_v0 = vld [vmem:[%s14233_s10] ss:$0 sm:$0xff]  ;;  %vm9970_vm11 = vcmask 64512  }
0x3007   :  { %s12987_s21 = smov [#allocation10]  }
0x3008   :  { %s9978_s22 = sshll.u32 %s12987_s21, 4  ;;  %s9979_s22 = int_to_ptr.vmem [resolvable:$true] %s9978_s22 }
0x3009   :  { %s12941_s9 = scalar_lea.vmem %s9979_s22, 128  ;;  %p12946_p7 = scmp.lt.s32.totalorder %s9979_s22, %s9979_s22 }
0x300a   :  { %p12942_p6 = scmp.ne.s32.totalorder %s9979_s22, %s12941_s9  ;;  %p12947_p8 = scmp.lt.s32.totalorder %s12941_s9, %s12941_s9 }
0x300c   :  { %p12948_p9 = por %p12947_p8, %p12946_p7 }
0x300e   :  { %p12949_p10 = pnand %p12948_p9, %p12942_p6 }
0x30c0   :  { %v9960_v1 = vpop.f32.mrb[26].mxu0 }
0x30c1   :  { %v12493_v8 = vadd.f32 %v10034_v0, %v9960_v1  ;;  %v11823_v13 = vpop.f32.mrb[27].mxu0 }
0x30c3   :  { %v10035_v18 = vmul.f32 -1.442695, %v12493_v8 }
0x30c5   :  { %12805 = vpow2.f32 %v10035_v18 }
0x30cf   :  { %v12806_v22 = vpop.eup %12805 }
0x30d0   :  { %v9967_v23 = vadd.f32 1.0, %v12806_v22 }
0x30d2   :  { %12807 = vrcp.f32 %v9967_v23 }
0x30dc   :  { %v12808_v24 = vpop.eup %12807 }
0x30dd   :  { %9971 = vst.msk [vmem:[#allocation10] sm:$0xff] %vm9970_vm11, %v12808_v24 }
0x30de   :  { %12952 = shalt.err (!%p12949_p10)
}
0x30df   :  { %s12953_s23 = scalar_lea.hbm %s14234_s11, 128 }
0x30e0   :  { %p12954_p11 = scmp.ne.s32.totalorder %s14234_s11, %s12953_s23  ;;  %p12957_p12 = scmp.lt.u32.totalorder %s12953_s23, %s14234_s11 }
0x30e2   :  { %p12959_p13 = pnand %p12957_p12, %p12954_p11 }
0x30e4   :  { %12962 = shalt.err (!%p12959_p13)
}
0x30e5   :  { %9981 = dma.vmem_to_hbm [thread:$0]  %s9979_s22, 128, %s14234_s11, [#allocation4]  }
0x30e6   :  { %12969 = dma.done.wait [#allocation4], 128  }
0x30e7   :  { %12970 = vsyncadd [#allocation4], 4294967168 }
0x30e8   :  { %12971 = dma.done.wait [#allocation12], 64  }
0x30e9   :  { %12972 = vsyncadd [#allocation12], 4294967232 }
0x30ea   :  { %10011 = vsyncpa [#allocation3], 1 }
0x30eb   :  { %10012 = vsyncpa [#allocation6], 1 }
0x30ec   :  { %10013 = vsyncpa [#allocation9], 1 }
0x30ed   :  { %10014 = vsyncpa [#allocation4], 1 }
0x30ee   :  { %10015 = vsyncpa [#allocation12], 1 }

</bundles_post_ra>
